<compile_context>
chip_gen: v6e
topology: v6e:2x2x1
jax: 0.10.0
libtpu: 0.0.40
codegen_flags: <defaults>
</compile_context>

<pallas_src>
import math
from functools import partial

import numpy as np
import jax
import jax.numpy as jnp
from jax.experimental import pallas as pl
from jax.experimental.pallas import tpu as pltpu


# ----------------------------------------------------------------------------
# Generic tiled GEMM (used for the 7x7 stem conv via im2col)
# ----------------------------------------------------------------------------
def _round_up(x, m):
    return ((x + m - 1) // m) * m


def _make_gemm_kernel(relu):
    def kernel(a_ref, b_ref, o_ref, acc_ref):
        @pl.when(pl.program_id(2) == 0)
        def _():
            acc_ref[...] = jnp.zeros_like(acc_ref)

        acc_ref[...] += jnp.dot(a_ref[...], b_ref[...],
                                preferred_element_type=jnp.float32)

        @pl.when(pl.program_id(2) == pl.num_programs(2) - 1)
        def _():
            r = acc_ref[...]
            if relu:
                r = jnp.maximum(r, 0.0)
            o_ref[...] = r.astype(o_ref.dtype)

    return kernel


def pallas_gemm(a, b, relu=False):
    """out = a @ b (optionally ReLU).  bf16 operands, f32 accumulation, tiled (M,N,K) grid."""
    M, K = a.shape
    K2, N = b.shape
    assert K == K2
    tm = min(256, _round_up(M, 8))
    tn = min(128, _round_up(N, 128))
    tk = min(256, _round_up(K, 128))
    Mp, Np, Kp = _round_up(M, tm), _round_up(N, tn), _round_up(K, tk)
    a_p = jnp.pad(a, ((0, Mp - M), (0, Kp - K))).astype(jnp.bfloat16)
    b_p = jnp.pad(b, ((0, Kp - K), (0, Np - N))).astype(jnp.bfloat16)
    out = pl.pallas_call(
        _make_gemm_kernel(relu),
        out_shape=jax.ShapeDtypeStruct((Mp, Np), jnp.float32),
        grid=(Mp // tm, Np // tn, Kp // tk),
        in_specs=[pl.BlockSpec((tm, tk), lambda i, j, k: (i, k)),
                  pl.BlockSpec((tk, tn), lambda i, j, k: (k, j))],
        out_specs=pl.BlockSpec((tm, tn), lambda i, j, k: (i, j)),
        scratch_shapes=[pltpu.VMEM((tm, tn), jnp.float32)],
        compiler_params=pltpu.CompilerParams(
            dimension_semantics=("parallel", "parallel", "arbitrary")),
    )(a_p, b_p)
    return out[:M, :N]


# ----------------------------------------------------------------------------
# Stem conv (7x7 / stride 2) via im2col GEMM (Cin=4 -> duplication negligible)
# ----------------------------------------------------------------------------
def _im2col(x_nhwc, kh, kw, stride, pad):
    N, H, W, C = x_nhwc.shape
    xp = jnp.pad(x_nhwc, ((0, 0), (pad, pad), (pad, pad), (0, 0)))
    OH = (H + 2 * pad - kh) // stride + 1
    OW = (W + 2 * pad - kw) // stride + 1
    cols = []
    for i in range(kh):
        for j in range(kw):
            cols.append(xp[:, i:i + stride * OH:stride, j:j + stride * OW:stride, :])
    p = jnp.stack(cols, axis=3)                         # (N, OH, OW, kh*kw, C)
    return p.reshape(N * OH * OW, kh * kw * C), (N, OH, OW)


def _conv_weight_to_gemm(w_oikk):
    """PyTorch (Cout, Cin, kh, kw) -> (kh*kw*Cin, Cout), matching the im2col order."""
    cout, cin, kh, kw = w_oikk.shape
    return jnp.transpose(w_oikk, (2, 3, 1, 0)).reshape(kh * kw * cin, cout)


def conv2d_gemm(x_nhwc, w_oikk, stride, pad, relu=False):
    kh, kw = int(w_oikk.shape[2]), int(w_oikk.shape[3])
    a, (N, OH, OW) = _im2col(x_nhwc, kh, kw, stride, pad)
    out = pallas_gemm(a, _conv_weight_to_gemm(w_oikk), relu=relu)
    return out.reshape(N, OH, OW, int(w_oikk.shape[0]))


# ----------------------------------------------------------------------------
# Fused BasicBlock kernel: relu(conv2(relu(conv1(x))) + residual), all in VMEM
# ----------------------------------------------------------------------------
def _conv3x3_taps(w_oikk):
    """(Cout, Cin, 3, 3) -> (9, Cin, Cout) bf16, tap-major (t = i*3 + j)."""
    cout, cin, kh, kw = w_oikk.shape
    return jnp.transpose(w_oikk, (2, 3, 1, 0)).reshape(kh * kw, cin, cout).astype(jnp.bfloat16)


def _make_block_kernel(OH, OW, Cin, planes, stride, has_down):
    M = OH * OW

    def kernel(*refs):
        if has_down:
            x_ref, w1_ref, w2_ref, wd_ref, o_ref, h1p_ref = refs
        else:
            x_ref, w1_ref, w2_ref, o_ref, h1p_ref = refs
            wd_ref = None

        # ---- conv1: 3x3, stride=`stride`, pad=1, + ReLU (f32 accumulate) ----
        acc1 = jnp.zeros((M, planes), jnp.float32)
        for i in range(3):
            for j in range(3):
                t = i * 3 + j
                if stride == 1:
                    win = x_ref[0, i:i + OH, j:j + OW, :]
                else:  # stride 2: read from the space-to-depth phases
                    p = (i % 2) * 2 + (j % 2)
                    r0, c0 = i // 2, j // 2
                    win = x_ref[0, p, r0:r0 + OH, c0:c0 + OW, :]
                a = win.reshape(M, Cin).astype(jnp.bfloat16)
                acc1 = acc1 + jnp.dot(a, w1_ref[t],
                                      preferred_element_type=jnp.float32)
        h1 = jnp.maximum(acc1, 0.0)

        # Stage zero-padded h1 in VMEM scratch for conv2's 3x3 windows.
        h1p_ref[...] = jnp.zeros_like(h1p_ref)
        h1p_ref[1:1 + OH, 1:1 + OW, :] = h1.reshape(OH, OW, planes).astype(jnp.bfloat16)

        # ---- conv2: 3x3, stride=1, pad=1 ----
        acc2 = jnp.zeros((M, planes), jnp.float32)
        for i in range(3):
            for j in range(3):
                t = i * 3 + j
                win = h1p_ref[i:i + OH, j:j + OW, :]
                acc2 = acc2 + jnp.dot(win.reshape(M, planes), w2_ref[t],
                                      preferred_element_type=jnp.float32)

        # ---- residual path ----
        if has_down:
            # 1x1 / stride-2 conv on x == phase (1,1) interior of the padded input.
            xc = x_ref[0, 3, 0:OH, 0:OW, :].reshape(M, Cin).astype(jnp.bfloat16)
            res = jnp.dot(xc, wd_ref[...], preferred_element_type=jnp.float32)
        else:
            # identity residual: interior of the padded input (Cin == planes here).
            res = x_ref[0, 1:1 + OH, 1:1 + OW, :].reshape(M, planes)

        out = jnp.maximum(acc2 + res, 0.0)
        o_ref[0] = out.reshape(OH, OW, planes)

    return kernel


def fused_basic_block(x_nhwc, w_conv1, w_conv2, w_down, stride):
    """One pallas_call per BasicBlock; grid over images, activations VMEM-resident."""
    N, H, W, Cin = x_nhwc.shape
    planes = int(w_conv1.shape[0])
    OH = (H + 2 - 3) // stride + 1
    OW = (W + 2 - 3) // stride + 1

    w1 = _conv3x3_taps(w_conv1)      # (9, Cin, planes)     bf16
    w2 = _conv3x3_taps(w_conv2)      # (9, planes, planes)  bf16

    xp = jnp.pad(x_nhwc, ((0, 0), (1, 1), (1, 1), (0, 0)))
    if stride == 1:
        xin = xp                                              # (N, H+2, W+2, Cin)
    else:
        Hp, Wp = H + 2, W + 2
        xp = jnp.pad(xp, ((0, 0), (0, Hp % 2), (0, Wp % 2), (0, 0)))  # even extents
        phases = [xp[:, di::2, dj::2, :] for di in (0, 1) for dj in (0, 1)]
        xin = jnp.stack(phases, axis=1)                       # (N, 4, ceil/2, ceil/2, Cin)
    in_block = (1,) + xin.shape[1:]

    in_specs = [pl.BlockSpec(in_block, lambda n: (n,) + (0,) * (len(in_block) - 1)),
                pl.BlockSpec(w1.shape, lambda n: (0, 0, 0)),
                pl.BlockSpec(w2.shape, lambda n: (0, 0, 0))]
    args = [xin, w1, w2]
    if w_down is not None:
        wd = jnp.transpose(w_down[:, :, 0, 0], (1, 0)).astype(jnp.bfloat16)  # (Cin, planes)
        in_specs.append(pl.BlockSpec(wd.shape, lambda n: (0, 0)))
        args.append(wd)

    kernel = _make_block_kernel(OH, OW, Cin, planes, stride, w_down is not None)
    # TODO(synk): for large H/W, tile the spatial dims instead of holding one full
    # padded image per grid step in VMEM.
    return pl.pallas_call(
        kernel,
        out_shape=jax.ShapeDtypeStruct((N, OH, OW, planes), jnp.float32),
        grid=(N,),
        in_specs=in_specs,
        out_specs=pl.BlockSpec((1, OH, OW, planes), lambda n: (n, 0, 0, 0)),
        scratch_shapes=[pltpu.VMEM((OH + 2, OW + 2, planes), jnp.bfloat16)],
        compiler_params=pltpu.CompilerParams(dimension_semantics=("parallel",)),
    )(*args)


# ----------------------------------------------------------------------------
# Bilinear upsample (align_corners=True) as one Kronecker-matrix GEMM per image
# ----------------------------------------------------------------------------
def _interp_matrix(in_size, out_size):
    """Bilinear interpolation matrix (align_corners=True): out = M @ in."""
    if out_size == 1:
        m = np.zeros((1, in_size), np.float32)
        m[0, 0] = 1.0
        return m
    scale = (in_size - 1) / (out_size - 1)
    src = np.arange(out_size) * scale
    lo = np.clip(np.floor(src).astype(np.int64), 0, in_size - 1)
    hi = np.minimum(lo + 1, in_size - 1)
    frac = (src - lo).astype(np.float32)
    m = np.zeros((out_size, in_size), np.float32)
    m[np.arange(out_size), lo] += 1.0 - frac
    m[np.arange(out_size), hi] += frac
    return m


def _upsample_kernel(x_ref, m_ref, o_ref):
    # x_ref: (1, C, h*w), m_ref: (h*w, gh*gw) -> o_ref: (1, C, gh*gw), lane-dense output.
    o_ref[0] = jnp.dot(x_ref[0], m_ref[...], preferred_element_type=jnp.float32)


def bilinear_upsample_to_nchw(x_nhwc, gh, gw):
    N, h, w, C = x_nhwc.shape
    m_comb = np.kron(_interp_matrix(h, gh), _interp_matrix(w, gw))   # (gh*gw, h*w)
    m_t = jnp.asarray(m_comb.T, jnp.float32)                         # (h*w, gh*gw)
    x_ncp = jnp.transpose(x_nhwc.reshape(N, h * w, C), (0, 2, 1))    # (N, C, h*w)
    G = gh * gw
    y = pl.pallas_call(
        _upsample_kernel,
        out_shape=jax.ShapeDtypeStruct((N, C, G), jnp.float32),
        grid=(N,),
        in_specs=[pl.BlockSpec((1, C, h * w), lambda n: (n, 0, 0)),
                  pl.BlockSpec((h * w, G), lambda n: (0, 0))],
        out_specs=pl.BlockSpec((1, C, G), lambda n: (n, 0, 0)),
        compiler_params=pltpu.CompilerParams(dimension_semantics=("parallel",)),
    )(x_ncp, m_t)
    return y.reshape(N, C, gh, gw)


# ----------------------------------------------------------------------------
# VolumeEncoder forward
# ----------------------------------------------------------------------------
def make_params(key, output_cls_size, n_conv_hidden):
    """Deterministic PyTorch-style init: normal(0, sqrt(2 / (kh*kw*Cout)))."""
    def conv_w(k, cout, cin, kh, kw):
        n = kh * kw * cout
        return jax.random.normal(k, (cout, cin, kh, kw), jnp.float32) * math.sqrt(2.0 / n)

    ks = jax.random.split(key, 6)
    return {
        "conv1": conv_w(ks[0], 128, output_cls_size, 7, 7),
        "l1_conv1": conv_w(ks[1], 128, 128, 3, 3),
        "l1_conv2": conv_w(ks[2], 128, 128, 3, 3),
        "l2_conv1": conv_w(ks[3], n_conv_hidden, 128, 3, 3),
        "l2_conv2": conv_w(ks[4], n_conv_hidden, n_conv_hidden, 3, 3),
        "l2_down": conv_w(ks[5], n_conv_hidden, 128, 1, 1),
    }


@partial(jax.jit, static_argnames=("grid_size",))
def volume_encoder_forward(params, stack_vols, grid_size):
    """stack_vols: (bsize, slen, fsize, H, W) -> (bsize, slen, n_conv_hidden, gh, gw)."""
    bsize, slen, fsize, H, W = stack_vols.shape
    x = stack_vols.reshape(bsize * slen, fsize, H, W)
    x = jnp.transpose(x, (0, 2, 3, 1))                            # NCHW -> NHWC

    # stem: conv 7x7 / stride 2 / pad 3 + ReLU  (tiled GEMM, K padded 196->256)
    x = conv2d_gemm(x, params["conv1"], stride=2, pad=3, relu=True)

    # layer1: BasicBlock(128 -> 128), stride 1, identity residual (one fused kernel)
    x = fused_basic_block(x, params["l1_conv1"], params["l1_conv2"], None, stride=1)

    # layer2: BasicBlock(128 -> n_conv_hidden), stride 2, 1x1-conv downsample (fused)
    x = fused_basic_block(x, params["l2_conv1"], params["l2_conv2"],
                          params["l2_down"], stride=2)

    # bilinear upsample to (grid_size[1], grid_size[0]), align_corners=True -> NCHW
    gh, gw = grid_size[1], grid_size[0]
    y = bilinear_upsample_to_nchw(x, gh, gw)                      # (N, C, gh, gw)

    N, C, _, _ = y.shape
    assert N == bsize * slen
    return y.reshape(bsize, slen, C, gh, gw)


if __name__ == "__main__":
    # Small config: output_cls_size=4, n_conv_hidden=32, grid_size=(16, 16)
    output_cls_size = 4
    n_conv_hidden = 32
    grid_size = (16, 16)
    bsize, slen, H, W = 2, 2, 16, 16

    key = jax.random.PRNGKey(0)
    k_param, k_in = jax.random.split(key)
    params = make_params(k_param, output_cls_size, n_conv_hidden)
    stack_vols = jax.random.normal(k_in, (bsize, slen, output_cls_size, H, W), jnp.float32)

    out = volume_encoder_forward(params, stack_vols, grid_size=grid_size)
    out = jax.block_until_ready(out)

    expected_shape = (bsize, slen, n_conv_hidden, grid_size[1], grid_size[0])
    assert out.shape == expected_shape, (out.shape, expected_shape)
    assert bool(jnp.all(jnp.isfinite(out)))
    print("KERNEL_OK")
</pallas_src>

<mosaic_0001>
module attributes {stable_mosaic.version = 11 : i64} {
  func.func @kernel(%arg0: i32, %arg1: i32, %arg2: i32, %arg3: memref<256x256xbf16, #tpu.memory_space<vmem>>, %arg4: memref<256x128xbf16, #tpu.memory_space<vmem>>, %arg5: memref<256x128xf32, #tpu.memory_space<vmem>>, %arg6: memref<256x128xf32, #tpu.memory_space<vmem>>) attributes {dimension_semantics = [#tpu.dimension_semantics<parallel>, #tpu.dimension_semantics<parallel>, #tpu.dimension_semantics<arbitrary>], iteration_bounds = array<i64: 1, 1, 1>, scalar_prefetch = 0 : i64, scratch_operands = 1 : i64, tpu.core_type = #tpu.core_type<tc>, window_params = [{transform_indices = @transform_0, window_bounds = array<i64: 256, 256>}, {transform_indices = @transform_1, window_bounds = array<i64: 256, 128>}, {transform_indices = @transform_2, window_bounds = array<i64: 256, 128>}]} {
    %c0_i32 = arith.constant 0 : i32
    %0 = arith.cmpi eq, %arg2, %c0_i32 : i32
    %1 = arith.extui %0 : i1 to i32
    %c0_i32_0 = arith.constant 0 : i32
    %2 = arith.cmpi ne, %1, %c0_i32_0 : i32
    scf.if %2 {
      %cst_10 = arith.constant 0.000000e+00 : f32
      %12 = vector.broadcast %cst_10 : f32 to vector<256x128xf32>
      %c0_11 = arith.constant 0 : index
      %c0_12 = arith.constant 0 : index
      %13 = vector.load %arg6[%c0_11, %c0_12] : memref<256x128xf32, #tpu.memory_space<vmem>>, vector<256x128xf32>
      tpu.vector_store %arg6[%c0_11, %c0_12], %12 {strides = array<i32>} : memref<256x128xf32, #tpu.memory_space<vmem>>, vector<256x128xf32>,
    } else {
    }
    %c0 = arith.constant 0 : index
    %c0_1 = arith.constant 0 : index
    %3 = vector.load %arg6[%c0, %c0_1] : memref<256x128xf32, #tpu.memory_space<vmem>>, vector<256x128xf32>
    %c0_2 = arith.constant 0 : index
    %c0_3 = arith.constant 0 : index
    %4 = vector.load %arg3[%c0_2, %c0_3] : memref<256x256xbf16, #tpu.memory_space<vmem>>, vector<256x256xbf16>
    %c0_4 = arith.constant 0 : index
    %c0_5 = arith.constant 0 : index
    %5 = vector.load %arg4[%c0_4, %c0_5] : memref<256x128xbf16, #tpu.memory_space<vmem>>, vector<256x128xbf16>
    %cst = arith.constant dense<0.000000e+00> : vector<256x128xf32>
    %6 = tpu.matmul %4, %5, %cst {dimension_numbers = #tpu.dot_dimension_numbers<[1], [0], [0], [1], [0, 0, 1, 1], [], []>} : vector<256x256xbf16>, vector<256x128xbf16>, vector<256x128xf32> -> vector<256x128xf32>
    %7 = arith.addf %3, %6 : vector<256x128xf32>
    %c0_6 = arith.constant 0 : index
    %c0_7 = arith.constant 0 : index
    %8 = vector.load %arg6[%c0_6, %c0_7] : memref<256x128xf32, #tpu.memory_space<vmem>>, vector<256x128xf32>
    tpu.vector_store %arg6[%c0_6, %c0_7], %7 {strides = array<i32>} : memref<256x128xf32, #tpu.memory_space<vmem>>, vector<256x128xf32>,
    %c0_i32_8 = arith.constant 0 : i32
    %9 = arith.cmpi eq, %arg2, %c0_i32_8 : i32
    %10 = arith.extui %9 : i1 to i32
    %c0_i32_9 = arith.constant 0 : i32
    %11 = arith.cmpi ne, %10, %c0_i32_9 : i32
    scf.if %11 {
      %c0_10 = arith.constant 0 : index
      %c0_11 = arith.constant 0 : index
      %12 = vector.load %arg6[%c0_10, %c0_11] : memref<256x128xf32, #tpu.memory_space<vmem>>, vector<256x128xf32>
      %cst_12 = arith.constant 0.000000e+00 : f32
      %13 = vector.broadcast %cst_12 : f32 to vector<256x128xf32>
      %14 = arith.maximumf %12, %13 : vector<256x128xf32>
      %c0_13 = arith.constant 0 : index
      %c0_14 = arith.constant 0 : index
      %15 = vector.load %arg5[%c0_13, %c0_14] : memref<256x128xf32, #tpu.memory_space<vmem>>, vector<256x128xf32>
      tpu.vector_store %arg5[%c0_13, %c0_14], %14 {strides = array<i32>} : memref<256x128xf32, #tpu.memory_space<vmem>>, vector<256x128xf32>,
    } else {
    }
    return
  }
  func.func @transform_0(%arg0: i32, %arg1: i32, %arg2: i32) -> (i32, i32) {
    %c0_i32 = arith.constant 0 : i32
    return %arg0, %arg2 : i32, i32
  }
  func.func @transform_1(%arg0: i32, %arg1: i32, %arg2: i32) -> (i32, i32) {
    %c0_i32 = arith.constant 0 : i32
    return %arg2, %arg1 : i32, i32
  }
  func.func @transform_2(%arg0: i32, %arg1: i32, %arg2: i32) -> (i32, i32) {
    %c0_i32 = arith.constant 0 : i32
    return %arg0, %arg1 : i32, i32
  }
}

module attributes {stable_mosaic.version = 11 : i64} {
  func.func @kernel(%arg0: i32, %arg1: memref<1x10x10x128xf32, #tpu.memory_space<vmem>>, %arg2: memref<9x128x128xbf16, #tpu.memory_space<vmem>>, %arg3: memref<9x128x128xbf16, #tpu.memory_space<vmem>>, %arg4: memref<1x8x8x128xf32, #tpu.memory_space<vmem>>, %arg5: memref<10x10x128xbf16, #tpu.memory_space<vmem>>) attributes {dimension_semantics = [#tpu.dimension_semantics<parallel>], iteration_bounds = array<i64: 4>, scalar_prefetch = 0 : i64, scratch_operands = 1 : i64, tpu.core_type = #tpu.core_type<tc>, window_params = [{transform_indices = @transform_0, window_bounds = array<i64: 1, 10, 10, 128>}, {pipeline_mode = #tpu.pipeline_mode<synchronous>, transform_indices = @transform_1, window_bounds = array<i64: 9, 128, 128>}, {pipeline_mode = #tpu.pipeline_mode<synchronous>, transform_indices = @transform_2, window_bounds = array<i64: 9, 128, 128>}, {transform_indices = @transform_3, window_bounds = array<i64: 1, 8, 8, 128>}]} {
    %cst = arith.constant 0.000000e+00 : f32
    %0 = vector.broadcast %cst : f32 to vector<64x128xf32>
    %c0 = arith.constant 0 : index
    %c0_0 = arith.constant 0 : index
    %c0_1 = arith.constant 0 : index
    %c0_2 = arith.constant 0 : index
    %1 = vector.load %arg1[%c0, %c0_0, %c0_1, %c0_2] : memref<1x10x10x128xf32, #tpu.memory_space<vmem>>, vector<1x8x8x128xf32>
    %2 = vector.shape_cast %1 : vector<1x8x8x128xf32> to vector<8x8x128xf32>
    %3 = vector.shape_cast %2 : vector<8x8x128xf32> to vector<64x128xf32>
    %4 = arith.truncf %3 : vector<64x128xf32> to vector<64x128xbf16>
    %c0_3 = arith.constant 0 : index
    %c0_4 = arith.constant 0 : index
    %c0_5 = arith.constant 0 : index
    %5 = vector.load %arg2[%c0_3, %c0_4, %c0_5] : memref<9x128x128xbf16, #tpu.memory_space<vmem>>, vector<1x128x128xbf16>
    %6 = vector.shape_cast %5 : vector<1x128x128xbf16> to vector<128x128xbf16>
    %cst_6 = arith.constant dense<0.000000e+00> : vector<64x128xf32>
    %7 = tpu.matmul %4, %6, %cst_6 {dimension_numbers = #tpu.dot_dimension_numbers<[1], [0], [0], [1], [0, 0, 1, 1], [], []>} : vector<64x128xbf16>, vector<128x128xbf16>, vector<64x128xf32> -> vector<64x128xf32>
    %8 = arith.addf %0, %7 : vector<64x128xf32>
    %c0_7 = arith.constant 0 : index
    %c0_8 = arith.constant 0 : index
    %c1 = arith.constant 1 : index
    %c0_9 = arith.constant 0 : index
    %9 = vector.load %arg1[%c0_7, %c0_8, %c1, %c0_9] : memref<1x10x10x128xf32, #tpu.memory_space<vmem>>, vector<1x8x8x128xf32>
    %10 = vector.shape_cast %9 : vector<1x8x8x128xf32> to vector<8x8x128xf32>
    %11 = vector.shape_cast %10 : vector<8x8x128xf32> to vector<64x128xf32>
    %12 = arith.truncf %11 : vector<64x128xf32> to vector<64x128xbf16>
    %c1_10 = arith.constant 1 : index
    %c0_11 = arith.constant 0 : index
    %c0_12 = arith.constant 0 : index
    %13 = vector.load %arg2[%c1_10, %c0_11, %c0_12] : memref<9x128x128xbf16, #tpu.memory_space<vmem>>, vector<1x128x128xbf16>
    %14 = vector.shape_cast %13 : vector<1x128x128xbf16> to vector<128x128xbf16>
    %cst_13 = arith.constant dense<0.000000e+00> : vector<64x128xf32>
    %15 = tpu.matmul %12, %14, %cst_13 {dimension_numbers = #tpu.dot_dimension_numbers<[1], [0], [0], [1], [0, 0, 1, 1], [], []>} : vector<64x128xbf16>, vector<128x128xbf16>, vector<64x128xf32> -> vector<64x128xf32>
    %16 = arith.addf %8, %15 : vector<64x128xf32>
    %c0_14 = arith.constant 0 : index
    %c0_15 = arith.constant 0 : index
    %c2 = arith.constant 2 : index
    %c0_16 = arith.constant 0 : index
    %17 = vector.load %arg1[%c0_14, %c0_15, %c2, %c0_16] : memref<1x10x10x128xf32, #tpu.memory_space<vmem>>, vector<1x8x8x128xf32>
    %18 = vector.shape_cast %17 : vector<1x8x8x128xf32> to vector<8x8x128xf32>
    %19 = vector.shape_cast %18 : vector<8x8x128xf32> to vector<64x128xf32>
    %20 = arith.truncf %19 : vector<64x128xf32> to vector<64x128xbf16>
    %c2_17 = arith.constant 2 : index
    %c0_18 = arith.constant 0 : index
    %c0_19 = arith.constant 0 : index
    %21 = vector.load %arg2[%c2_17, %c0_18, %c0_19] : memref<9x128x128xbf16, #tpu.memory_space<vmem>>, vector<1x128x128xbf16>
    %22 = vector.shape_cast %21 : vector<1x128x128xbf16> to vector<128x128xbf16>
    %cst_20 = arith.constant dense<0.000000e+00> : vector<64x128xf32>
    %23 = tpu.matmul %20, %22, %cst_20 {dimension_numbers = #tpu.dot_dimension_numbers<[1], [0], [0], [1], [0, 0, 1, 1], [], []>} : vector<64x128xbf16>, vector<128x128xbf16>, vector<64x128xf32> -> vector<64x128xf32>
    %24 = arith.addf %16, %23 : vector<64x128xf32>
    %c0_21 = arith.constant 0 : index
    %c1_22 = arith.constant 1 : index
    %c0_23 = arith.constant 0 : index
    %c0_24 = arith.constant 0 : index
    %25 = vector.load %arg1[%c0_21, %c1_22, %c0_23, %c0_24] : memref<1x10x10x128xf32, #tpu.memory_space<vmem>>, vector<1x8x8x128xf32>
    %26 = vector.shape_cast %25 : vector<1x8x8x128xf32> to vector<8x8x128xf32>
    %27 = vector.shape_cast %26 : vector<8x8x128xf32> to vector<64x128xf32>
    %28 = arith.truncf %27 : vector<64x128xf32> to vector<64x128xbf16>
    %c3 = arith.constant 3 : index
    %c0_25 = arith.constant 0 : index
    %c0_26 = arith.constant 0 : index
    %29 = vector.load %arg2[%c3, %c0_25, %c0_26] : memref<9x128x128xbf16, #tpu.memory_space<vmem>>, vector<1x128x128xbf16>
    %30 = vector.shape_cast %29 : vector<1x128x128xbf16> to vector<128x128xbf16>
    %cst_27 = arith.constant dense<0.000000e+00> : vector<64x128xf32>
    %31 = tpu.matmul %28, %30, %cst_27 {dimension_numbers = #tpu.dot_dimension_numbers<[1], [0], [0], [1], [0, 0, 1, 1], [], []>} : vector<64x128xbf16>, vector<128x128xbf16>, vector<64x128xf32> -> vector<64x128xf32>
    %32 = arith.addf %24, %31 : vector<64x128xf32>
    %c0_28 = arith.constant 0 : index
    %c1_29 = arith.constant 1 : index
    %c1_30 = arith.constant 1 : index
    %c0_31 = arith.constant 0 : index
    %33 = vector.load %arg1[%c0_28, %c1_29, %c1_30, %c0_31] : memref<1x10x10x128xf32, #tpu.memory_space<vmem>>, vector<1x8x8x128xf32>
    %34 = vector.shape_cast %33 : vector<1x8x8x128xf32> to vector<8x8x128xf32>
    %35 = vector.shape_cast %34 : vector<8x8x128xf32> to vector<64x128xf32>
    %36 = arith.truncf %35 : vector<64x128xf32> to vector<64x128xbf16>
    %c4 = arith.constant 4 : index
    %c0_32 = arith.constant 0 : index
    %c0_33 = arith.constant 0 : index
    %37 = vector.load %arg2[%c4, %c0_32, %c0_33] : memref<9x128x128xbf16, #tpu.memory_space<vmem>>, vector<1x128x128xbf16>
    %38 = vector.shape_cast %37 : vector<1x128x128xbf16> to vector<128x128xbf16>
    %cst_34 = arith.constant dense<0.000000e+00> : vector<64x128xf32>
    %39 = tpu.matmul %36, %38, %cst_34 {dimension_numbers = #tpu.dot_dimension_numbers<[1], [0], [0], [1], [0, 0, 1, 1], [], []>} : vector<64x128xbf16>, vector<128x128xbf16>, vector<64x128xf32> -> vector<64x128xf32>
    %40 = arith.addf %32, %39 : vector<64x128xf32>
    %c0_35 = arith.constant 0 : index
    %c1_36 = arith.constant 1 : index
    %c2_37 = arith.constant 2 : index
    %c0_38 = arith.constant 0 : index
    %41 = vector.load %arg1[%c0_35, %c1_36, %c2_37, %c0_38] : memref<1x10x10x128xf32, #tpu.memory_space<vmem>>, vector<1x8x8x128xf32>
    %42 = vector.shape_cast %41 : vector<1x8x8x128xf32> to vector<8x8x128xf32>
    %43 = vector.shape_cast %42 : vector<8x8x128xf32> to vector<64x128xf32>
    %44 = arith.truncf %43 : vector<64x128xf32> to vector<64x128xbf16>
    %c5 = arith.constant 5 : index
    %c0_39 = arith.constant 0 : index
    %c0_40 = arith.constant 0 : index
    %45 = vector.load %arg2[%c5, %c0_39, %c0_40] : memref<9x128x128xbf16, #tpu.memory_space<vmem>>, vector<1x128x128xbf16>
    %46 = vector.shape_cast %45 : vector<1x128x128xbf16> to vector<128x128xbf16>
    %cst_41 = arith.constant dense<0.000000e+00> : vector<64x128xf32>
    %47 = tpu.matmul %44, %46, %cst_41 {dimension_numbers = #tpu.dot_dimension_numbers<[1], [0], [0], [1], [0, 0, 1, 1], [], []>} : vector<64x128xbf16>, vector<128x128xbf16>, vector<64x128xf32> -> vector<64x128xf32>
    %48 = arith.addf %40, %47 : vector<64x128xf32>
    %c0_42 = arith.constant 0 : index
    %c2_43 = arith.constant 2 : index
    %c0_44 = arith.constant 0 : index
    %c0_45 = arith.constant 0 : index
    %49 = vector.load %arg1[%c0_42, %c2_43, %c0_44, %c0_45] : memref<1x10x10x128xf32, #tpu.memory_space<vmem>>, vector<1x8x8x128xf32>
    %50 = vector.shape_cast %49 : vector<1x8x8x128xf32> to vector<8x8x128xf32>
    %51 = vector.shape_cast %50 : vector<8x8x128xf32> to vector<64x128xf32>
    %52 = arith.truncf %51 : vector<64x128xf32> to vector<64x128xbf16>
    %c6 = arith.constant 6 : index
    %c0_46 = arith.constant 0 : index
    %c0_47 = arith.constant 0 : index
    %53 = vector.load %arg2[%c6, %c0_46, %c0_47] : memref<9x128x128xbf16, #tpu.memory_space<vmem>>, vector<1x128x128xbf16>
    %54 = vector.shape_cast %53 : vector<1x128x128xbf16> to vector<128x128xbf16>
    %cst_48 = arith.constant dense<0.000000e+00> : vector<64x128xf32>
    %55 = tpu.matmul %52, %54, %cst_48 {dimension_numbers = #tpu.dot_dimension_numbers<[1], [0], [0], [1], [0, 0, 1, 1], [], []>} : vector<64x128xbf16>, vector<128x128xbf16>, vector<64x128xf32> -> vector<64x128xf32>
    %56 = arith.addf %48, %55 : vector<64x128xf32>
    %c0_49 = arith.constant 0 : index
    %c2_50 = arith.constant 2 : index
    %c1_51 = arith.constant 1 : index
    %c0_52 = arith.constant 0 : index
    %57 = vector.load %arg1[%c0_49, %c2_50, %c1_51, %c0_52] : memref<1x10x10x128xf32, #tpu.memory_space<vmem>>, vector<1x8x8x128xf32>
    %58 = vector.shape_cast %57 : vector<1x8x8x128xf32> to vector<8x8x128xf32>
    %59 = vector.shape_cast %58 : vector<8x8x128xf32> to vector<64x128xf32>
    %60 = arith.truncf %59 : vector<64x128xf32> to vector<64x128xbf16>
    %c7 = arith.constant 7 : index
    %c0_53 = arith.constant 0 : index
    %c0_54 = arith.constant 0 : index
    %61 = vector.load %arg2[%c7, %c0_53, %c0_54] : memref<9x128x128xbf16, #tpu.memory_space<vmem>>, vector<1x128x128xbf16>
    %62 = vector.shape_cast %61 : vector<1x128x128xbf16> to vector<128x128xbf16>
    %cst_55 = arith.constant dense<0.000000e+00> : vector<64x128xf32>
    %63 = tpu.matmul %60, %62, %cst_55 {dimension_numbers = #tpu.dot_dimension_numbers<[1], [0], [0], [1], [0, 0, 1, 1], [], []>} : vector<64x128xbf16>, vector<128x128xbf16>, vector<64x128xf32> -> vector<64x128xf32>
    %64 = arith.addf %56, %63 : vector<64x128xf32>
    %c0_56 = arith.constant 0 : index
    %c2_57 = arith.constant 2 : index
    %c2_58 = arith.constant 2 : index
    %c0_59 = arith.constant 0 : index
    %65 = vector.load %arg1[%c0_56, %c2_57, %c2_58, %c0_59] : memref<1x10x10x128xf32, #tpu.memory_space<vmem>>, vector<1x8x8x128xf32>
    %66 = vector.shape_cast %65 : vector<1x8x8x128xf32> to vector<8x8x128xf32>
    %67 = vector.shape_cast %66 : vector<8x8x128xf32> to vector<64x128xf32>
    %68 = arith.truncf %67 : vector<64x128xf32> to vector<64x128xbf16>
    %c8 = arith.constant 8 : index
    %c0_60 = arith.constant 0 : index
    %c0_61 = arith.constant 0 : index
    %69 = vector.load %arg2[%c8, %c0_60, %c0_61] : memref<9x128x128xbf16, #tpu.memory_space<vmem>>, vector<1x128x128xbf16>
    %70 = vector.shape_cast %69 : vector<1x128x128xbf16> to vector<128x128xbf16>
    %cst_62 = arith.constant dense<0.000000e+00> : vector<64x128xf32>
    %71 = tpu.matmul %68, %70, %cst_62 {dimension_numbers = #tpu.dot_dimension_numbers<[1], [0], [0], [1], [0, 0, 1, 1], [], []>} : vector<64x128xbf16>, vector<128x128xbf16>, vector<64x128xf32> -> vector<64x128xf32>
    %72 = arith.addf %64, %71 : vector<64x128xf32>
    %cst_63 = arith.constant 0.000000e+00 : f32
    %73 = vector.broadcast %cst_63 : f32 to vector<64x128xf32>
    %74 = arith.maximumf %72, %73 : vector<64x128xf32>
    %cst_64 = arith.constant 0.000000e+00 : bf16
    %75 = vector.broadcast %cst_64 : bf16 to vector<10x10x128xbf16>
    %c0_65 = arith.constant 0 : index
    %c0_66 = arith.constant 0 : index
    %c0_67 = arith.constant 0 : index
    %76 = vector.load %arg5[%c0_65, %c0_66, %c0_67] : memref<10x10x128xbf16, #tpu.memory_space<vmem>>, vector<10x10x128xbf16>
    tpu.vector_store %arg5[%c0_65, %c0_66, %c0_67], %75 {strides = array<i32>} : memref<10x10x128xbf16, #tpu.memory_space<vmem>>, vector<10x10x128xbf16>,
    %77 = vector.shape_cast %74 : vector<64x128xf32> to vector<8x8x128xf32>
    %78 = arith.truncf %77 : vector<8x8x128xf32> to vector<8x8x128xbf16>
    %c1_68 = arith.constant 1 : index
    %c1_69 = arith.constant 1 : index
    %c0_70 = arith.constant 0 : index
    %79 = vector.load %arg5[%c1_68, %c1_69, %c0_70] : memref<10x10x128xbf16, #tpu.memory_space<vmem>>, vector<8x8x128xbf16>
    tpu.vector_store %arg5[%c1_68, %c1_69, %c0_70], %78 {strides = array<i32>} : memref<10x10x128xbf16, #tpu.memory_space<vmem>>, vector<8x8x128xbf16>,
    %cst_71 = arith.constant 0.000000e+00 : f32
    %80 = vector.broadcast %cst_71 : f32 to vector<64x128xf32>
    %c0_72 = arith.constant 0 : index
    %c0_73 = arith.constant 0 : index
    %c0_74 = arith.constant 0 : index
    %81 = vector.load %arg5[%c0_72, %c0_73, %c0_74] : memref<10x10x128xbf16, #tpu.memory_space<vmem>>, vector<8x8x128xbf16>
    %82 = vector.shape_cast %81 : vector<8x8x128xbf16> to vector<64x128xbf16>
    %c0_75 = arith.constant 0 : index
    %c0_76 = arith.constant 0 : index
    %c0_77 = arith.constant 0 : index
    %83 = vector.load %arg3[%c0_75, %c0_76, %c0_77] : memref<9x128x128xbf16, #tpu.memory_space<vmem>>, vector<1x128x128xbf16>
    %84 = vector.shape_cast %83 : vector<1x128x128xbf16> to vector<128x128xbf16>
    %cst_78 = arith.constant dense<0.000000e+00> : vector<64x128xf32>
    %85 = tpu.matmul %82, %84, %cst_78 {dimension_numbers = #tpu.dot_dimension_numbers<[1], [0], [0], [1], [0, 0, 1, 1], [], []>} : vector<64x128xbf16>, vector<128x128xbf16>, vector<64x128xf32> -> vector<64x128xf32>
    %86 = arith.addf %80, %85 : vector<64x128xf32>
    %c0_79 = arith.constant 0 : index
    %c1_80 = arith.constant 1 : index
    %c0_81 = arith.constant 0 : index
    %87 = vector.load %arg5[%c0_79, %c1_80, %c0_81] : memref<10x10x128xbf16, #tpu.memory_space<vmem>>, vector<8x8x128xbf16>
    %88 = vector.shape_cast %87 : vector<8x8x128xbf16> to vector<64x128xbf16>
    %c1_82 = arith.constant 1 : index
    %c0_83 = arith.constant 0 : index
    %c0_84 = arith.constant 0 : index
    %89 = vector.load %arg3[%c1_82, %c0_83, %c0_84] : memref<9x128x128xbf16, #tpu.memory_space<vmem>>, vector<1x128x128xbf16>
    %90 = vector.shape_cast %89 : vector<1x128x128xbf16> to vector<128x128xbf16>
    %cst_85 = arith.constant dense<0.000000e+00> : vector<64x128xf32>
    %91 = tpu.matmul %88, %90, %cst_85 {dimension_numbers = #tpu.dot_dimension_numbers<[1], [0], [0], [1], [0, 0, 1, 1], [], []>} : vector<64x128xbf16>, vector<128x128xbf16>, vector<64x128xf32> -> vector<64x128xf32>
    %92 = arith.addf %86, %91 : vector<64x128xf32>
    %c0_86 = arith.constant 0 : index
    %c2_87 = arith.constant 2 : index
    %c0_88 = arith.constant 0 : index
    %93 = vector.load %arg5[%c0_86, %c2_87, %c0_88] : memref<10x10x128xbf16, #tpu.memory_space<vmem>>, vector<8x8x128xbf16>
    %94 = vector.shape_cast %93 : vector<8x8x128xbf16> to vector<64x128xbf16>
    %c2_89 = arith.constant 2 : index
    %c0_90 = arith.constant 0 : index
    %c0_91 = arith.constant 0 : index
    %95 = vector.load %arg3[%c2_89, %c0_90, %c0_91] : memref<9x128x128xbf16, #tpu.memory_space<vmem>>, vector<1x128x128xbf16>
    %96 = vector.shape_cast %95 : vector<1x128x128xbf16> to vector<128x128xbf16>
    %cst_92 = arith.constant dense<0.000000e+00> : vector<64x128xf32>
    %97 = tpu.matmul %94, %96, %cst_92 {dimension_numbers = #tpu.dot_dimension_numbers<[1], [0], [0], [1], [0, 0, 1, 1], [], []>} : vector<64x128xbf16>, vector<128x128xbf16>, vector<64x128xf32> -> vector<64x128xf32>
    %98 = arith.addf %92, %97 : vector<64x128xf32>
    %c1_93 = arith.constant 1 : index
    %c0_94 = arith.constant 0 : index
    %c0_95 = arith.constant 0 : index
    %99 = vector.load %arg5[%c1_93, %c0_94, %c0_95] : memref<10x10x128xbf16, #tpu.memory_space<vmem>>, vector<8x8x128xbf16>
    %100 = vector.shape_cast %99 : vector<8x8x128xbf16> to vector<64x128xbf16>
    %c3_96 = arith.constant 3 : index
    %c0_97 = arith.constant 0 : index
    %c0_98 = arith.constant 0 : index
    %101 = vector.load %arg3[%c3_96, %c0_97, %c0_98] : memref<9x128x128xbf16, #tpu.memory_space<vmem>>, vector<1x128x128xbf16>
    %102 = vector.shape_cast %101 : vector<1x128x128xbf16> to vector<128x128xbf16>
    %cst_99 = arith.constant dense<0.000000e+00> : vector<64x128xf32>
    %103 = tpu.matmul %100, %102, %cst_99 {dimension_numbers = #tpu.dot_dimension_numbers<[1], [0], [0], [1], [0, 0, 1, 1], [], []>} : vector<64x128xbf16>, vector<128x128xbf16>, vector<64x128xf32> -> vector<64x128xf32>
    %104 = arith.addf %98, %103 : vector<64x128xf32>
    %c1_100 = arith.constant 1 : index
    %c1_101 = arith.constant 1 : index
    %c0_102 = arith.constant 0 : index
    %105 = vector.load %arg5[%c1_100, %c1_101, %c0_102] : memref<10x10x128xbf16, #tpu.memory_space<vmem>>, vector<8x8x128xbf16>
    %106 = vector.shape_cast %105 : vector<8x8x128xbf16> to vector<64x128xbf16>
    %c4_103 = arith.constant 4 : index
    %c0_104 = arith.constant 0 : index
    %c0_105 = arith.constant 0 : index
    %107 = vector.load %arg3[%c4_103, %c0_104, %c0_105] : memref<9x128x128xbf16, #tpu.memory_space<vmem>>, vector<1x128x128xbf16>
    %108 = vector.shape_cast %107 : vector<1x128x128xbf16> to vector<128x128xbf16>
    %cst_106 = arith.constant dense<0.000000e+00> : vector<64x128xf32>
    %109 = tpu.matmul %106, %108, %cst_106 {dimension_numbers = #tpu.dot_dimension_numbers<[1], [0], [0], [1], [0, 0, 1, 1], [], []>} : vector<64x128xbf16>, vector<128x128xbf16>, vector<64x128xf32> -> vector<64x128xf32>
    %110 = arith.addf %104, %109 : vector<64x128xf32>
    %c1_107 = arith.constant 1 : index
    %c2_108 = arith.constant 2 : index
    %c0_109 = arith.constant 0 : index
    %111 = vector.load %arg5[%c1_107, %c2_108, %c0_109] : memref<10x10x128xbf16, #tpu.memory_space<vmem>>, vector<8x8x128xbf16>
    %112 = vector.shape_cast %111 : vector<8x8x128xbf16> to vector<64x128xbf16>
    %c5_110 = arith.constant 5 : index
    %c0_111 = arith.constant 0 : index
    %c0_112 = arith.constant 0 : index
    %113 = vector.load %arg3[%c5_110, %c0_111, %c0_112] : memref<9x128x128xbf16, #tpu.memory_space<vmem>>, vector<1x128x128xbf16>
    %114 = vector.shape_cast %113 : vector<1x128x128xbf16> to vector<128x128xbf16>
    %cst_113 = arith.constant dense<0.000000e+00> : vector<64x128xf32>
    %115 = tpu.matmul %112, %114, %cst_113 {dimension_numbers = #tpu.dot_dimension_numbers<[1], [0], [0], [1], [0, 0, 1, 1], [], []>} : vector<64x128xbf16>, vector<128x128xbf16>, vector<64x128xf32> -> vector<64x128xf32>
    %116 = arith.addf %110, %115 : vector<64x128xf32>
    %c2_114 = arith.constant 2 : index
    %c0_115 = arith.constant 0 : index
    %c0_116 = arith.constant 0 : index
    %117 = vector.load %arg5[%c2_114, %c0_115, %c0_116] : memref<10x10x128xbf16, #tpu.memory_space<vmem>>, vector<8x8x128xbf16>
    %118 = vector.shape_cast %117 : vector<8x8x128xbf16> to vector<64x128xbf16>
    %c6_117 = arith.constant 6 : index
    %c0_118 = arith.constant 0 : index
    %c0_119 = arith.constant 0 : index
    %119 = vector.load %arg3[%c6_117, %c0_118, %c0_119] : memref<9x128x128xbf16, #tpu.memory_space<vmem>>, vector<1x128x128xbf16>
    %120 = vector.shape_cast %119 : vector<1x128x128xbf16> to vector<128x128xbf16>
    %cst_120 = arith.constant dense<0.000000e+00> : vector<64x128xf32>
    %121 = tpu.matmul %118, %120, %cst_120 {dimension_numbers = #tpu.dot_dimension_numbers<[1], [0], [0], [1], [0, 0, 1, 1], [], []>} : vector<64x128xbf16>, vector<128x128xbf16>, vector<64x128xf32> -> vector<64x128xf32>
    %122 = arith.addf %116, %121 : vector<64x128xf32>
    %c2_121 = arith.constant 2 : index
    %c1_122 = arith.constant 1 : index
    %c0_123 = arith.constant 0 : index
    %123 = vector.load %arg5[%c2_121, %c1_122, %c0_123] : memref<10x10x128xbf16, #tpu.memory_space<vmem>>, vector<8x8x128xbf16>
    %124 = vector.shape_cast %123 : vector<8x8x128xbf16> to vector<64x128xbf16>
    %c7_124 = arith.constant 7 : index
    %c0_125 = arith.constant 0 : index
    %c0_126 = arith.constant 0 : index
    %125 = vector.load %arg3[%c7_124, %c0_125, %c0_126] : memref<9x128x128xbf16, #tpu.memory_space<vmem>>, vector<1x128x128xbf16>
    %126 = vector.shape_cast %125 : vector<1x128x128xbf16> to vector<128x128xbf16>
    %cst_127 = arith.constant dense<0.000000e+00> : vector<64x128xf32>
    %127 = tpu.matmul %124, %126, %cst_127 {dimension_numbers = #tpu.dot_dimension_numbers<[1], [0], [0], [1], [0, 0, 1, 1], [], []>} : vector<64x128xbf16>, vector<128x128xbf16>, vector<64x128xf32> -> vector<64x128xf32>
    %128 = arith.addf %122, %127 : vector<64x128xf32>
    %c2_128 = arith.constant 2 : index
    %c2_129 = arith.constant 2 : index
    %c0_130 = arith.constant 0 : index
    %129 = vector.load %arg5[%c2_128, %c2_129, %c0_130] : memref<10x10x128xbf16, #tpu.memory_space<vmem>>, vector<8x8x128xbf16>
    %130 = vector.shape_cast %129 : vector<8x8x128xbf16> to vector<64x128xbf16>
    %c8_131 = arith.constant 8 : index
    %c0_132 = arith.constant 0 : index
    %c0_133 = arith.constant 0 : index
    %131 = vector.load %arg3[%c8_131, %c0_132, %c0_133] : memref<9x128x128xbf16, #tpu.memory_space<vmem>>, vector<1x128x128xbf16>
    %132 = vector.shape_cast %131 : vector<1x128x128xbf16> to vector<128x128xbf16>
    %cst_134 = arith.constant dense<0.000000e+00> : vector<64x128xf32>
    %133 = tpu.matmul %130, %132, %cst_134 {dimension_numbers = #tpu.dot_dimension_numbers<[1], [0], [0], [1], [0, 0, 1, 1], [], []>} : vector<64x128xbf16>, vector<128x128xbf16>, vector<64x128xf32> -> vector<64x128xf32>
    %134 = arith.addf %128, %133 : vector<64x128xf32>
    %c0_135 = arith.constant 0 : index
    %c1_136 = arith.constant 1 : index
    %c1_137 = arith.constant 1 : index
    %c0_138 = arith.constant 0 : index
    %135 = vector.load %arg1[%c0_135, %c1_136, %c1_137, %c0_138] : memref<1x10x10x128xf32, #tpu.memory_space<vmem>>, vector<1x8x8x128xf32>
    %136 = vector.shape_cast %135 : vector<1x8x8x128xf32> to vector<8x8x128xf32>
    %137 = vector.shape_cast %136 : vector<8x8x128xf32> to vector<64x128xf32>
    %138 = arith.addf %134, %137 : vector<64x128xf32>
    %cst_139 = arith.constant 0.000000e+00 : f32
    %139 = vector.broadcast %cst_139 : f32 to vector<64x128xf32>
    %140 = arith.maximumf %138, %139 : vector<64x128xf32>
    %141 = vector.shape_cast %140 : vector<64x128xf32> to vector<8x8x128xf32>
    %c0_140 = arith.constant 0 : index
    %c0_141 = arith.constant 0 : index
    %c0_142 = arith.constant 0 : index
    %c0_143 = arith.constant 0 : index
    %142 = vector.load %arg4[%c0_140, %c0_141, %c0_142, %c0_143] : memref<1x8x8x128xf32, #tpu.memory_space<vmem>>, vector<1x8x8x128xf32>
    %143 = vector.shape_cast %142 : vector<1x8x8x128xf32> to vector<8x8x128xf32>
    %144 = vector.shape_cast %141 : vector<8x8x128xf32> to vector<1x8x8x128xf32>
    tpu.vector_store %arg4[%c0_140, %c0_141, %c0_142, %c0_143], %144 {strides = array<i32>} : memref<1x8x8x128xf32, #tpu.memory_space<vmem>>, vector<1x8x8x128xf32>,
    return
  }
  func.func @transform_0(%arg0: i32) -> (i32, i32, i32, i32) {
    %c0_i32 = arith.constant 0 : i32
    %c0_i32_0 = arith.constant 0 : i32
    %c0_i32_1 = arith.constant 0 : i32
    %c0_i32_2 = arith.constant 0 : i32
    return %arg0, %c0_i32, %c0_i32_0, %c0_i32_1 : i32, i32, i32, i32
  }
  func.func @transform_1(%arg0: i32) -> (i32, i32, i32) {
    %c0_i32 = arith.constant 0 : i32
    %c0_i32_0 = arith.constant 0 : i32
    %c0_i32_1 = arith.constant 0 : i32
    %c0_i32_2 = arith.constant 0 : i32
    return %c0_i32, %c0_i32_0, %c0_i32_1 : i32, i32, i32
  }
  func.func @transform_2(%arg0: i32) -> (i32, i32, i32) {
    %c0_i32 = arith.constant 0 : i32
    %c0_i32_0 = arith.constant 0 : i32
    %c0_i32_1 = arith.constant 0 : i32
    %c0_i32_2 = arith.constant 0 : i32
    return %c0_i32, %c0_i32_0, %c0_i32_1 : i32, i32, i32
  }
  func.func @transform_3(%arg0: i32) -> (i32, i32, i32, i32) {
    %c0_i32 = arith.constant 0 : i32
    %c0_i32_0 = arith.constant 0 : i32
    %c0_i32_1 = arith.constant 0 : i32
    %c0_i32_2 = arith.constant 0 : i32
    return %arg0, %c0_i32, %c0_i32_0, %c0_i32_1 : i32, i32, i32, i32
  }
}

module attributes {stable_mosaic.version = 11 : i64} {
  func.func @kernel(%arg0: i32, %arg1: memref<1x4x5x5x128xf32, #tpu.memory_space<vmem>>, %arg2: memref<9x128x32xbf16, #tpu.memory_space<vmem>>, %arg3: memref<9x32x32xbf16, #tpu.memory_space<vmem>>, %arg4: memref<128x32xbf16, #tpu.memory_space<vmem>>, %arg5: memref<1x4x4x32xf32, #tpu.memory_space<vmem>>, %arg6: memref<6x6x32xbf16, #tpu.memory_space<vmem>>) attributes {dimension_semantics = [#tpu.dimension_semantics<parallel>], iteration_bounds = array<i64: 4>, scalar_prefetch = 0 : i64, scratch_operands = 1 : i64, tpu.core_type = #tpu.core_type<tc>, window_params = [{transform_indices = @transform_0, window_bounds = array<i64: 1, 4, 5, 5, 128>}, {pipeline_mode = #tpu.pipeline_mode<synchronous>, transform_indices = @transform_1, window_bounds = array<i64: 9, 128, 32>}, {pipeline_mode = #tpu.pipeline_mode<synchronous>, transform_indices = @transform_2, window_bounds = array<i64: 9, 32, 32>}, {pipeline_mode = #tpu.pipeline_mode<synchronous>, transform_indices = @transform_3, window_bounds = array<i64: 128, 32>}, {transform_indices = @transform_4, window_bounds = array<i64: 1, 4, 4, 32>}]} {
    %cst = arith.constant 0.000000e+00 : f32
    %0 = vector.broadcast %cst : f32 to vector<16x32xf32>
    %c0 = arith.constant 0 : index
    %c0_0 = arith.constant 0 : index
    %c0_1 = arith.constant 0 : index
    %c0_2 = arith.constant 0 : index
    %c0_3 = arith.constant 0 : index
    %1 = vector.load %arg1[%c0, %c0_0, %c0_1, %c0_2, %c0_3] : memref<1x4x5x5x128xf32, #tpu.memory_space<vmem>>, vector<1x1x4x4x128xf32>
    %2 = vector.shape_cast %1 : vector<1x1x4x4x128xf32> to vector<4x4x128xf32>
    %3 = vector.shape_cast %2 : vector<4x4x128xf32> to vector<16x128xf32>
    %4 = arith.truncf %3 : vector<16x128xf32> to vector<16x128xbf16>
    %c0_4 = arith.constant 0 : index
    %c0_5 = arith.constant 0 : index
    %c0_6 = arith.constant 0 : index
    %5 = vector.load %arg2[%c0_4, %c0_5, %c0_6] : memref<9x128x32xbf16, #tpu.memory_space<vmem>>, vector<1x128x32xbf16>
    %6 = vector.shape_cast %5 : vector<1x128x32xbf16> to vector<128x32xbf16>
    %cst_7 = arith.constant dense<0.000000e+00> : vector<16x32xf32>
    %7 = tpu.matmul %4, %6, %cst_7 {dimension_numbers = #tpu.dot_dimension_numbers<[1], [0], [0], [1], [0, 0, 1, 1], [], []>} : vector<16x128xbf16>, vector<128x32xbf16>, vector<16x32xf32> -> vector<16x32xf32>
    %8 = arith.addf %0, %7 : vector<16x32xf32>
    %c0_8 = arith.constant 0 : index
    %c1 = arith.constant 1 : index
    %c0_9 = arith.constant 0 : index
    %c0_10 = arith.constant 0 : index
    %c0_11 = arith.constant 0 : index
    %9 = vector.load %arg1[%c0_8, %c1, %c0_9, %c0_10, %c0_11] : memref<1x4x5x5x128xf32, #tpu.memory_space<vmem>>, vector<1x1x4x4x128xf32>
    %10 = vector.shape_cast %9 : vector<1x1x4x4x128xf32> to vector<4x4x128xf32>
    %11 = vector.shape_cast %10 : vector<4x4x128xf32> to vector<16x128xf32>
    %12 = arith.truncf %11 : vector<16x128xf32> to vector<16x128xbf16>
    %c1_12 = arith.constant 1 : index
    %c0_13 = arith.constant 0 : index
    %c0_14 = arith.constant 0 : index
    %13 = vector.load %arg2[%c1_12, %c0_13, %c0_14] : memref<9x128x32xbf16, #tpu.memory_space<vmem>>, vector<1x128x32xbf16>
    %14 = vector.shape_cast %13 : vector<1x128x32xbf16> to vector<128x32xbf16>
    %cst_15 = arith.constant dense<0.000000e+00> : vector<16x32xf32>
    %15 = tpu.matmul %12, %14, %cst_15 {dimension_numbers = #tpu.dot_dimension_numbers<[1], [0], [0], [1], [0, 0, 1, 1], [], []>} : vector<16x128xbf16>, vector<128x32xbf16>, vector<16x32xf32> -> vector<16x32xf32>
    %16 = arith.addf %8, %15 : vector<16x32xf32>
    %c0_16 = arith.constant 0 : index
    %c0_17 = arith.constant 0 : index
    %c0_18 = arith.constant 0 : index
    %c1_19 = arith.constant 1 : index
    %c0_20 = arith.constant 0 : index
    %17 = vector.load %arg1[%c0_16, %c0_17, %c0_18, %c1_19, %c0_20] : memref<1x4x5x5x128xf32, #tpu.memory_space<vmem>>, vector<1x1x4x4x128xf32>
    %18 = vector.shape_cast %17 : vector<1x1x4x4x128xf32> to vector<4x4x128xf32>
    %19 = vector.shape_cast %18 : vector<4x4x128xf32> to vector<16x128xf32>
    %20 = arith.truncf %19 : vector<16x128xf32> to vector<16x128xbf16>
    %c2 = arith.constant 2 : index
    %c0_21 = arith.constant 0 : index
    %c0_22 = arith.constant 0 : index
    %21 = vector.load %arg2[%c2, %c0_21, %c0_22] : memref<9x128x32xbf16, #tpu.memory_space<vmem>>, vector<1x128x32xbf16>
    %22 = vector.shape_cast %21 : vector<1x128x32xbf16> to vector<128x32xbf16>
    %cst_23 = arith.constant dense<0.000000e+00> : vector<16x32xf32>
    %23 = tpu.matmul %20, %22, %cst_23 {dimension_numbers = #tpu.dot_dimension_numbers<[1], [0], [0], [1], [0, 0, 1, 1], [], []>} : vector<16x128xbf16>, vector<128x32xbf16>, vector<16x32xf32> -> vector<16x32xf32>
    %24 = arith.addf %16, %23 : vector<16x32xf32>
    %c0_24 = arith.constant 0 : index
    %c2_25 = arith.constant 2 : index
    %c0_26 = arith.constant 0 : index
    %c0_27 = arith.constant 0 : index
    %c0_28 = arith.constant 0 : index
    %25 = vector.load %arg1[%c0_24, %c2_25, %c0_26, %c0_27, %c0_28] : memref<1x4x5x5x128xf32, #tpu.memory_space<vmem>>, vector<1x1x4x4x128xf32>
    %26 = vector.shape_cast %25 : vector<1x1x4x4x128xf32> to vector<4x4x128xf32>
    %27 = vector.shape_cast %26 : vector<4x4x128xf32> to vector<16x128xf32>
    %28 = arith.truncf %27 : vector<16x128xf32> to vector<16x128xbf16>
    %c3 = arith.constant 3 : index
    %c0_29 = arith.constant 0 : index
    %c0_30 = arith.constant 0 : index
    %29 = vector.load %arg2[%c3, %c0_29, %c0_30] : memref<9x128x32xbf16, #tpu.memory_space<vmem>>, vector<1x128x32xbf16>
    %30 = vector.shape_cast %29 : vector<1x128x32xbf16> to vector<128x32xbf16>
    %cst_31 = arith.constant dense<0.000000e+00> : vector<16x32xf32>
    %31 = tpu.matmul %28, %30, %cst_31 {dimension_numbers = #tpu.dot_dimension_numbers<[1], [0], [0], [1], [0, 0, 1, 1], [], []>} : vector<16x128xbf16>, vector<128x32xbf16>, vector<16x32xf32> -> vector<16x32xf32>
    %32 = arith.addf %24, %31 : vector<16x32xf32>
    %c0_32 = arith.constant 0 : index
    %c3_33 = arith.constant 3 : index
    %c0_34 = arith.constant 0 : index
    %c0_35 = arith.constant 0 : index
    %c0_36 = arith.constant 0 : index
    %33 = vector.load %arg1[%c0_32, %c3_33, %c0_34, %c0_35, %c0_36] : memref<1x4x5x5x128xf32, #tpu.memory_space<vmem>>, vector<1x1x4x4x128xf32>
    %34 = vector.shape_cast %33 : vector<1x1x4x4x128xf32> to vector<4x4x128xf32>
    %35 = vector.shape_cast %34 : vector<4x4x128xf32> to vector<16x128xf32>
    %36 = arith.truncf %35 : vector<16x128xf32> to vector<16x128xbf16>
    %c4 = arith.constant 4 : index
    %c0_37 = arith.constant 0 : index
    %c0_38 = arith.constant 0 : index
    %37 = vector.load %arg2[%c4, %c0_37, %c0_38] : memref<9x128x32xbf16, #tpu.memory_space<vmem>>, vector<1x128x32xbf16>
    %38 = vector.shape_cast %37 : vector<1x128x32xbf16> to vector<128x32xbf16>
    %cst_39 = arith.constant dense<0.000000e+00> : vector<16x32xf32>
    %39 = tpu.matmul %36, %38, %cst_39 {dimension_numbers = #tpu.dot_dimension_numbers<[1], [0], [0], [1], [0, 0, 1, 1], [], []>} : vector<16x128xbf16>, vector<128x32xbf16>, vector<16x32xf32> -> vector<16x32xf32>
    %40 = arith.addf %32, %39 : vector<16x32xf32>
    %c0_40 = arith.constant 0 : index
    %c2_41 = arith.constant 2 : index
    %c0_42 = arith.constant 0 : index
    %c1_43 = arith.constant 1 : index
    %c0_44 = arith.constant 0 : index
    %41 = vector.load %arg1[%c0_40, %c2_41, %c0_42, %c1_43, %c0_44] : memref<1x4x5x5x128xf32, #tpu.memory_space<vmem>>, vector<1x1x4x4x128xf32>
    %42 = vector.shape_cast %41 : vector<1x1x4x4x128xf32> to vector<4x4x128xf32>
    %43 = vector.shape_cast %42 : vector<4x4x128xf32> to vector<16x128xf32>
    %44 = arith.truncf %43 : vector<16x128xf32> to vector<16x128xbf16>
    %c5 = arith.constant 5 : index
    %c0_45 = arith.constant 0 : index
    %c0_46 = arith.constant 0 : index
    %45 = vector.load %arg2[%c5, %c0_45, %c0_46] : memref<9x128x32xbf16, #tpu.memory_space<vmem>>, vector<1x128x32xbf16>
    %46 = vector.shape_cast %45 : vector<1x128x32xbf16> to vector<128x32xbf16>
    %cst_47 = arith.constant dense<0.000000e+00> : vector<16x32xf32>
    %47 = tpu.matmul %44, %46, %cst_47 {dimension_numbers = #tpu.dot_dimension_numbers<[1], [0], [0], [1], [0, 0, 1, 1], [], []>} : vector<16x128xbf16>, vector<128x32xbf16>, vector<16x32xf32> -> vector<16x32xf32>
    %48 = arith.addf %40, %47 : vector<16x32xf32>
    %c0_48 = arith.constant 0 : index
    %c0_49 = arith.constant 0 : index
    %c1_50 = arith.constant 1 : index
    %c0_51 = arith.constant 0 : index
    %c0_52 = arith.constant 0 : index
    %49 = vector.load %arg1[%c0_48, %c0_49, %c1_50, %c0_51, %c0_52] : memref<1x4x5x5x128xf32, #tpu.memory_space<vmem>>, vector<1x1x4x4x128xf32>
    %50 = vector.shape_cast %49 : vector<1x1x4x4x128xf32> to vector<4x4x128xf32>
    %51 = vector.shape_cast %50 : vector<4x4x128xf32> to vector<16x128xf32>
    %52 = arith.truncf %51 : vector<16x128xf32> to vector<16x128xbf16>
    %c6 = arith.constant 6 : index
    %c0_53 = arith.constant 0 : index
    %c0_54 = arith.constant 0 : index
    %53 = vector.load %arg2[%c6, %c0_53, %c0_54] : memref<9x128x32xbf16, #tpu.memory_space<vmem>>, vector<1x128x32xbf16>
    %54 = vector.shape_cast %53 : vector<1x128x32xbf16> to vector<128x32xbf16>
    %cst_55 = arith.constant dense<0.000000e+00> : vector<16x32xf32>
    %55 = tpu.matmul %52, %54, %cst_55 {dimension_numbers = #tpu.dot_dimension_numbers<[1], [0], [0], [1], [0, 0, 1, 1], [], []>} : vector<16x128xbf16>, vector<128x32xbf16>, vector<16x32xf32> -> vector<16x32xf32>
    %56 = arith.addf %48, %55 : vector<16x32xf32>
    %c0_56 = arith.constant 0 : index
    %c1_57 = arith.constant 1 : index
    %c1_58 = arith.constant 1 : index
    %c0_59 = arith.constant 0 : index
    %c0_60 = arith.constant 0 : index
    %57 = vector.load %arg1[%c0_56, %c1_57, %c1_58, %c0_59, %c0_60] : memref<1x4x5x5x128xf32, #tpu.memory_space<vmem>>, vector<1x1x4x4x128xf32>
    %58 = vector.shape_cast %57 : vector<1x1x4x4x128xf32> to vector<4x4x128xf32>
    %59 = vector.shape_cast %58 : vector<4x4x128xf32> to vector<16x128xf32>
    %60 = arith.truncf %59 : vector<16x128xf32> to vector<16x128xbf16>
    %c7 = arith.constant 7 : index
    %c0_61 = arith.constant 0 : index
    %c0_62 = arith.constant 0 : index
    %61 = vector.load %arg2[%c7, %c0_61, %c0_62] : memref<9x128x32xbf16, #tpu.memory_space<vmem>>, vector<1x128x32xbf16>
    %62 = vector.shape_cast %61 : vector<1x128x32xbf16> to vector<128x32xbf16>
    %cst_63 = arith.constant dense<0.000000e+00> : vector<16x32xf32>
    %63 = tpu.matmul %60, %62, %cst_63 {dimension_numbers = #tpu.dot_dimension_numbers<[1], [0], [0], [1], [0, 0, 1, 1], [], []>} : vector<16x128xbf16>, vector<128x32xbf16>, vector<16x32xf32> -> vector<16x32xf32>
    %64 = arith.addf %56, %63 : vector<16x32xf32>
    %c0_64 = arith.constant 0 : index
    %c0_65 = arith.constant 0 : index
    %c1_66 = arith.constant 1 : index
    %c1_67 = arith.constant 1 : index
    %c0_68 = arith.constant 0 : index
    %65 = vector.load %arg1[%c0_64, %c0_65, %c1_66, %c1_67, %c0_68] : memref<1x4x5x5x128xf32, #tpu.memory_space<vmem>>, vector<1x1x4x4x128xf32>
    %66 = vector.shape_cast %65 : vector<1x1x4x4x128xf32> to vector<4x4x128xf32>
    %67 = vector.shape_cast %66 : vector<4x4x128xf32> to vector<16x128xf32>
    %68 = arith.truncf %67 : vector<16x128xf32> to vector<16x128xbf16>
    %c8 = arith.constant 8 : index
    %c0_69 = arith.constant 0 : index
    %c0_70 = arith.constant 0 : index
    %69 = vector.load %arg2[%c8, %c0_69, %c0_70] : memref<9x128x32xbf16, #tpu.memory_space<vmem>>, vector<1x128x32xbf16>
    %70 = vector.shape_cast %69 : vector<1x128x32xbf16> to vector<128x32xbf16>
    %cst_71 = arith.constant dense<0.000000e+00> : vector<16x32xf32>
    %71 = tpu.matmul %68, %70, %cst_71 {dimension_numbers = #tpu.dot_dimension_numbers<[1], [0], [0], [1], [0, 0, 1, 1], [], []>} : vector<16x128xbf16>, vector<128x32xbf16>, vector<16x32xf32> -> vector<16x32xf32>
    %72 = arith.addf %64, %71 : vector<16x32xf32>
    %cst_72 = arith.constant 0.000000e+00 : f32
    %73 = vector.broadcast %cst_72 : f32 to vector<16x32xf32>
    %74 = arith.maximumf %72, %73 : vector<16x32xf32>
    %cst_73 = arith.constant 0.000000e+00 : bf16
    %75 = vector.broadcast %cst_73 : bf16 to vector<6x6x32xbf16>
    %c0_74 = arith.constant 0 : index
    %c0_75 = arith.constant 0 : index
    %c0_76 = arith.constant 0 : index
    %76 = vector.load %arg6[%c0_74, %c0_75, %c0_76] : memref<6x6x32xbf16, #tpu.memory_space<vmem>>, vector<6x6x32xbf16>
    tpu.vector_store %arg6[%c0_74, %c0_75, %c0_76], %75 {strides = array<i32>} : memref<6x6x32xbf16, #tpu.memory_space<vmem>>, vector<6x6x32xbf16>,
    %77 = vector.shape_cast %74 : vector<16x32xf32> to vector<4x4x32xf32>
    %78 = arith.truncf %77 : vector<4x4x32xf32> to vector<4x4x32xbf16>
    %c1_77 = arith.constant 1 : index
    %c1_78 = arith.constant 1 : index
    %c0_79 = arith.constant 0 : index
    %79 = vector.load %arg6[%c1_77, %c1_78, %c0_79] : memref<6x6x32xbf16, #tpu.memory_space<vmem>>, vector<4x4x32xbf16>
    tpu.vector_store %arg6[%c1_77, %c1_78, %c0_79], %78 {strides = array<i32>} : memref<6x6x32xbf16, #tpu.memory_space<vmem>>, vector<4x4x32xbf16>,
    %cst_80 = arith.constant 0.000000e+00 : f32
    %80 = vector.broadcast %cst_80 : f32 to vector<16x32xf32>
    %c0_81 = arith.constant 0 : index
    %c0_82 = arith.constant 0 : index
    %c0_83 = arith.constant 0 : index
    %81 = vector.load %arg6[%c0_81, %c0_82, %c0_83] : memref<6x6x32xbf16, #tpu.memory_space<vmem>>, vector<4x4x32xbf16>
    %82 = vector.shape_cast %81 : vector<4x4x32xbf16> to vector<16x32xbf16>
    %c0_84 = arith.constant 0 : index
    %c0_85 = arith.constant 0 : index
    %c0_86 = arith.constant 0 : index
    %83 = vector.load %arg3[%c0_84, %c0_85, %c0_86] : memref<9x32x32xbf16, #tpu.memory_space<vmem>>, vector<1x32x32xbf16>
    %84 = vector.shape_cast %83 : vector<1x32x32xbf16> to vector<32x32xbf16>
    %cst_87 = arith.constant dense<0.000000e+00> : vector<16x32xf32>
    %85 = tpu.matmul %82, %84, %cst_87 {dimension_numbers = #tpu.dot_dimension_numbers<[1], [0], [0], [1], [0, 0, 1, 1], [], []>} : vector<16x32xbf16>, vector<32x32xbf16>, vector<16x32xf32> -> vector<16x32xf32>
    %86 = arith.addf %80, %85 : vector<16x32xf32>
    %c0_88 = arith.constant 0 : index
    %c1_89 = arith.constant 1 : index
    %c0_90 = arith.constant 0 : index
    %87 = vector.load %arg6[%c0_88, %c1_89, %c0_90] : memref<6x6x32xbf16, #tpu.memory_space<vmem>>, vector<4x4x32xbf16>
    %88 = vector.shape_cast %87 : vector<4x4x32xbf16> to vector<16x32xbf16>
    %c1_91 = arith.constant 1 : index
    %c0_92 = arith.constant 0 : index
    %c0_93 = arith.constant 0 : index
    %89 = vector.load %arg3[%c1_91, %c0_92, %c0_93] : memref<9x32x32xbf16, #tpu.memory_space<vmem>>, vector<1x32x32xbf16>
    %90 = vector.shape_cast %89 : vector<1x32x32xbf16> to vector<32x32xbf16>
    %cst_94 = arith.constant dense<0.000000e+00> : vector<16x32xf32>
    %91 = tpu.matmul %88, %90, %cst_94 {dimension_numbers = #tpu.dot_dimension_numbers<[1], [0], [0], [1], [0, 0, 1, 1], [], []>} : vector<16x32xbf16>, vector<32x32xbf16>, vector<16x32xf32> -> vector<16x32xf32>
    %92 = arith.addf %86, %91 : vector<16x32xf32>
    %c0_95 = arith.constant 0 : index
    %c2_96 = arith.constant 2 : index
    %c0_97 = arith.constant 0 : index
    %93 = vector.load %arg6[%c0_95, %c2_96, %c0_97] : memref<6x6x32xbf16, #tpu.memory_space<vmem>>, vector<4x4x32xbf16>
    %94 = vector.shape_cast %93 : vector<4x4x32xbf16> to vector<16x32xbf16>
    %c2_98 = arith.constant 2 : index
    %c0_99 = arith.constant 0 : index
    %c0_100 = arith.constant 0 : index
    %95 = vector.load %arg3[%c2_98, %c0_99, %c0_100] : memref<9x32x32xbf16, #tpu.memory_space<vmem>>, vector<1x32x32xbf16>
    %96 = vector.shape_cast %95 : vector<1x32x32xbf16> to vector<32x32xbf16>
    %cst_101 = arith.constant dense<0.000000e+00> : vector<16x32xf32>
    %97 = tpu.matmul %94, %96, %cst_101 {dimension_numbers = #tpu.dot_dimension_numbers<[1], [0], [0], [1], [0, 0, 1, 1], [], []>} : vector<16x32xbf16>, vector<32x32xbf16>, vector<16x32xf32> -> vector<16x32xf32>
    %98 = arith.addf %92, %97 : vector<16x32xf32>
    %c1_102 = arith.constant 1 : index
    %c0_103 = arith.constant 0 : index
    %c0_104 = arith.constant 0 : index
    %99 = vector.load %arg6[%c1_102, %c0_103, %c0_104] : memref<6x6x32xbf16, #tpu.memory_space<vmem>>, vector<4x4x32xbf16>
    %100 = vector.shape_cast %99 : vector<4x4x32xbf16> to vector<16x32xbf16>
    %c3_105 = arith.constant 3 : index
    %c0_106 = arith.constant 0 : index
    %c0_107 = arith.constant 0 : index
    %101 = vector.load %arg3[%c3_105, %c0_106, %c0_107] : memref<9x32x32xbf16, #tpu.memory_space<vmem>>, vector<1x32x32xbf16>
    %102 = vector.shape_cast %101 : vector<1x32x32xbf16> to vector<32x32xbf16>
    %cst_108 = arith.constant dense<0.000000e+00> : vector<16x32xf32>
    %103 = tpu.matmul %100, %102, %cst_108 {dimension_numbers = #tpu.dot_dimension_numbers<[1], [0], [0], [1], [0, 0, 1, 1], [], []>} : vector<16x32xbf16>, vector<32x32xbf16>, vector<16x32xf32> -> vector<16x32xf32>
    %104 = arith.addf %98, %103 : vector<16x32xf32>
    %c1_109 = arith.constant 1 : index
    %c1_110 = arith.constant 1 : index
    %c0_111 = arith.constant 0 : index
    %105 = vector.load %arg6[%c1_109, %c1_110, %c0_111] : memref<6x6x32xbf16, #tpu.memory_space<vmem>>, vector<4x4x32xbf16>
    %106 = vector.shape_cast %105 : vector<4x4x32xbf16> to vector<16x32xbf16>
    %c4_112 = arith.constant 4 : index
    %c0_113 = arith.constant 0 : index
    %c0_114 = arith.constant 0 : index
    %107 = vector.load %arg3[%c4_112, %c0_113, %c0_114] : memref<9x32x32xbf16, #tpu.memory_space<vmem>>, vector<1x32x32xbf16>
    %108 = vector.shape_cast %107 : vector<1x32x32xbf16> to vector<32x32xbf16>
    %cst_115 = arith.constant dense<0.000000e+00> : vector<16x32xf32>
    %109 = tpu.matmul %106, %108, %cst_115 {dimension_numbers = #tpu.dot_dimension_numbers<[1], [0], [0], [1], [0, 0, 1, 1], [], []>} : vector<16x32xbf16>, vector<32x32xbf16>, vector<16x32xf32> -> vector<16x32xf32>
    %110 = arith.addf %104, %109 : vector<16x32xf32>
    %c1_116 = arith.constant 1 : index
    %c2_117 = arith.constant 2 : index
    %c0_118 = arith.constant 0 : index
    %111 = vector.load %arg6[%c1_116, %c2_117, %c0_118] : memref<6x6x32xbf16, #tpu.memory_space<vmem>>, vector<4x4x32xbf16>
    %112 = vector.shape_cast %111 : vector<4x4x32xbf16> to vector<16x32xbf16>
    %c5_119 = arith.constant 5 : index
    %c0_120 = arith.constant 0 : index
    %c0_121 = arith.constant 0 : index
    %113 = vector.load %arg3[%c5_119, %c0_120, %c0_121] : memref<9x32x32xbf16, #tpu.memory_space<vmem>>, vector<1x32x32xbf16>
    %114 = vector.shape_cast %113 : vector<1x32x32xbf16> to vector<32x32xbf16>
    %cst_122 = arith.constant dense<0.000000e+00> : vector<16x32xf32>
    %115 = tpu.matmul %112, %114, %cst_122 {dimension_numbers = #tpu.dot_dimension_numbers<[1], [0], [0], [1], [0, 0, 1, 1], [], []>} : vector<16x32xbf16>, vector<32x32xbf16>, vector<16x32xf32> -> vector<16x32xf32>
    %116 = arith.addf %110, %115 : vector<16x32xf32>
    %c2_123 = arith.constant 2 : index
    %c0_124 = arith.constant 0 : index
    %c0_125 = arith.constant 0 : index
    %117 = vector.load %arg6[%c2_123, %c0_124, %c0_125] : memref<6x6x32xbf16, #tpu.memory_space<vmem>>, vector<4x4x32xbf16>
    %118 = vector.shape_cast %117 : vector<4x4x32xbf16> to vector<16x32xbf16>
    %c6_126 = arith.constant 6 : index
    %c0_127 = arith.constant 0 : index
    %c0_128 = arith.constant 0 : index
    %119 = vector.load %arg3[%c6_126, %c0_127, %c0_128] : memref<9x32x32xbf16, #tpu.memory_space<vmem>>, vector<1x32x32xbf16>
    %120 = vector.shape_cast %119 : vector<1x32x32xbf16> to vector<32x32xbf16>
    %cst_129 = arith.constant dense<0.000000e+00> : vector<16x32xf32>
    %121 = tpu.matmul %118, %120, %cst_129 {dimension_numbers = #tpu.dot_dimension_numbers<[1], [0], [0], [1], [0, 0, 1, 1], [], []>} : vector<16x32xbf16>, vector<32x32xbf16>, vector<16x32xf32> -> vector<16x32xf32>
    %122 = arith.addf %116, %121 : vector<16x32xf32>
    %c2_130 = arith.constant 2 : index
    %c1_131 = arith.constant 1 : index
    %c0_132 = arith.constant 0 : index
    %123 = vector.load %arg6[%c2_130, %c1_131, %c0_132] : memref<6x6x32xbf16, #tpu.memory_space<vmem>>, vector<4x4x32xbf16>
    %124 = vector.shape_cast %123 : vector<4x4x32xbf16> to vector<16x32xbf16>
    %c7_133 = arith.constant 7 : index
    %c0_134 = arith.constant 0 : index
    %c0_135 = arith.constant 0 : index
    %125 = vector.load %arg3[%c7_133, %c0_134, %c0_135] : memref<9x32x32xbf16, #tpu.memory_space<vmem>>, vector<1x32x32xbf16>
    %126 = vector.shape_cast %125 : vector<1x32x32xbf16> to vector<32x32xbf16>
    %cst_136 = arith.constant dense<0.000000e+00> : vector<16x32xf32>
    %127 = tpu.matmul %124, %126, %cst_136 {dimension_numbers = #tpu.dot_dimension_numbers<[1], [0], [0], [1], [0, 0, 1, 1], [], []>} : vector<16x32xbf16>, vector<32x32xbf16>, vector<16x32xf32> -> vector<16x32xf32>
    %128 = arith.addf %122, %127 : vector<16x32xf32>
    %c2_137 = arith.constant 2 : index
    %c2_138 = arith.constant 2 : index
    %c0_139 = arith.constant 0 : index
    %129 = vector.load %arg6[%c2_137, %c2_138, %c0_139] : memref<6x6x32xbf16, #tpu.memory_space<vmem>>, vector<4x4x32xbf16>
    %130 = vector.shape_cast %129 : vector<4x4x32xbf16> to vector<16x32xbf16>
    %c8_140 = arith.constant 8 : index
    %c0_141 = arith.constant 0 : index
    %c0_142 = arith.constant 0 : index
    %131 = vector.load %arg3[%c8_140, %c0_141, %c0_142] : memref<9x32x32xbf16, #tpu.memory_space<vmem>>, vector<1x32x32xbf16>
    %132 = vector.shape_cast %131 : vector<1x32x32xbf16> to vector<32x32xbf16>
    %cst_143 = arith.constant dense<0.000000e+00> : vector<16x32xf32>
    %133 = tpu.matmul %130, %132, %cst_143 {dimension_numbers = #tpu.dot_dimension_numbers<[1], [0], [0], [1], [0, 0, 1, 1], [], []>} : vector<16x32xbf16>, vector<32x32xbf16>, vector<16x32xf32> -> vector<16x32xf32>
    %134 = arith.addf %128, %133 : vector<16x32xf32>
    %c0_144 = arith.constant 0 : index
    %c3_145 = arith.constant 3 : index
    %c0_146 = arith.constant 0 : index
    %c0_147 = arith.constant 0 : index
    %c0_148 = arith.constant 0 : index
    %135 = vector.load %arg1[%c0_144, %c3_145, %c0_146, %c0_147, %c0_148] : memref<1x4x5x5x128xf32, #tpu.memory_space<vmem>>, vector<1x1x4x4x128xf32>
    %136 = vector.shape_cast %135 : vector<1x1x4x4x128xf32> to vector<4x4x128xf32>
    %137 = vector.shape_cast %136 : vector<4x4x128xf32> to vector<16x128xf32>
    %138 = arith.truncf %137 : vector<16x128xf32> to vector<16x128xbf16>
    %c0_149 = arith.constant 0 : index
    %c0_150 = arith.constant 0 : index
    %139 = vector.load %arg4[%c0_149, %c0_150] : memref<128x32xbf16, #tpu.memory_space<vmem>>, vector<128x32xbf16>
    %cst_151 = arith.constant dense<0.000000e+00> : vector<16x32xf32>
    %140 = tpu.matmul %138, %139, %cst_151 {dimension_numbers = #tpu.dot_dimension_numbers<[1], [0], [0], [1], [0, 0, 1, 1], [], []>} : vector<16x128xbf16>, vector<128x32xbf16>, vector<16x32xf32> -> vector<16x32xf32>
    %141 = arith.addf %134, %140 : vector<16x32xf32>
    %cst_152 = arith.constant 0.000000e+00 : f32
    %142 = vector.broadcast %cst_152 : f32 to vector<16x32xf32>
    %143 = arith.maximumf %141, %142 : vector<16x32xf32>
    %144 = vector.shape_cast %143 : vector<16x32xf32> to vector<4x4x32xf32>
    %c0_153 = arith.constant 0 : index
    %c0_154 = arith.constant 0 : index
    %c0_155 = arith.constant 0 : index
    %c0_156 = arith.constant 0 : index
    %145 = vector.load %arg5[%c0_153, %c0_154, %c0_155, %c0_156] : memref<1x4x4x32xf32, #tpu.memory_space<vmem>>, vector<1x4x4x32xf32>
    %146 = vector.shape_cast %145 : vector<1x4x4x32xf32> to vector<4x4x32xf32>
    %147 = vector.shape_cast %144 : vector<4x4x32xf32> to vector<1x4x4x32xf32>
    tpu.vector_store %arg5[%c0_153, %c0_154, %c0_155, %c0_156], %147 {strides = array<i32>} : memref<1x4x4x32xf32, #tpu.memory_space<vmem>>, vector<1x4x4x32xf32>,
    return
  }
  func.func @transform_0(%arg0: i32) -> (i32, i32, i32, i32, i32) {
    %c0_i32 = arith.constant 0 : i32
    %c0_i32_0 = arith.constant 0 : i32
    %c0_i32_1 = arith.constant 0 : i32
    %c0_i32_2 = arith.constant 0 : i32
    %c0_i32_3 = arith.constant 0 : i32
    return %arg0, %c0_i32, %c0_i32_0, %c0_i32_1, %c0_i32_2 : i32, i32, i32, i32, i32
  }
  func.func @transform_1(%arg0: i32) -> (i32, i32, i32) {
    %c0_i32 = arith.constant 0 : i32
    %c0_i32_0 = arith.constant 0 : i32
    %c0_i32_1 = arith.constant 0 : i32
    %c0_i32_2 = arith.constant 0 : i32
    return %c0_i32, %c0_i32_0, %c0_i32_1 : i32, i32, i32
  }
  func.func @transform_2(%arg0: i32) -> (i32, i32, i32) {
    %c0_i32 = arith.constant 0 : i32
    %c0_i32_0 = arith.constant 0 : i32
    %c0_i32_1 = arith.constant 0 : i32
    %c0_i32_2 = arith.constant 0 : i32
    return %c0_i32, %c0_i32_0, %c0_i32_1 : i32, i32, i32
  }
  func.func @transform_3(%arg0: i32) -> (i32, i32) {
    %c0_i32 = arith.constant 0 : i32
    %c0_i32_0 = arith.constant 0 : i32
    %c0_i32_1 = arith.constant 0 : i32
    return %c0_i32, %c0_i32_0 : i32, i32
  }
  func.func @transform_4(%arg0: i32) -> (i32, i32, i32, i32) {
    %c0_i32 = arith.constant 0 : i32
    %c0_i32_0 = arith.constant 0 : i32
    %c0_i32_1 = arith.constant 0 : i32
    %c0_i32_2 = arith.constant 0 : i32
    return %arg0, %c0_i32, %c0_i32_0, %c0_i32_1 : i32, i32, i32, i32
  }
}

module attributes {stable_mosaic.version = 11 : i64} {
  func.func @_upsample_kernel(%arg0: i32, %arg1: memref<1x32x16xf32, #tpu.memory_space<vmem>>, %arg2: memref<16x256xf32, #tpu.memory_space<vmem>>, %arg3: memref<1x32x256xf32, #tpu.memory_space<vmem>>) attributes {dimension_semantics = [#tpu.dimension_semantics<parallel>], iteration_bounds = array<i64: 4>, scalar_prefetch = 0 : i64, scratch_operands = 0 : i64, tpu.core_type = #tpu.core_type<tc>, window_params = [{transform_indices = @transform_0, window_bounds = array<i64: 1, 32, 16>}, {pipeline_mode = #tpu.pipeline_mode<synchronous>, transform_indices = @transform_1, window_bounds = array<i64: 16, 256>}, {transform_indices = @transform_2, window_bounds = array<i64: 1, 32, 256>}]} {
    %c0 = arith.constant 0 : index
    %c0_0 = arith.constant 0 : index
    %c0_1 = arith.constant 0 : index
    %0 = vector.load %arg1[%c0, %c0_0, %c0_1] : memref<1x32x16xf32, #tpu.memory_space<vmem>>, vector<1x32x16xf32>
    %1 = vector.shape_cast %0 : vector<1x32x16xf32> to vector<32x16xf32>
    %c0_2 = arith.constant 0 : index
    %c0_3 = arith.constant 0 : index
    %2 = vector.load %arg2[%c0_2, %c0_3] : memref<16x256xf32, #tpu.memory_space<vmem>>, vector<16x256xf32>
    %cst = arith.constant dense<0.000000e+00> : vector<32x256xf32>
    %3 = tpu.matmul %1, %2, %cst {dimension_numbers = #tpu.dot_dimension_numbers<[1], [0], [0], [1], [0, 0, 1, 1], [], []>} : vector<32x16xf32>, vector<16x256xf32>, vector<32x256xf32> -> vector<32x256xf32>
    %c0_4 = arith.constant 0 : index
    %c0_5 = arith.constant 0 : index
    %c0_6 = arith.constant 0 : index
    %4 = vector.load %arg3[%c0_4, %c0_5, %c0_6] : memref<1x32x256xf32, #tpu.memory_space<vmem>>, vector<1x32x256xf32>
    %5 = vector.shape_cast %4 : vector<1x32x256xf32> to vector<32x256xf32>
    %6 = vector.shape_cast %3 : vector<32x256xf32> to vector<1x32x256xf32>
    tpu.vector_store %arg3[%c0_4, %c0_5, %c0_6], %6 {strides = array<i32>} : memref<1x32x256xf32, #tpu.memory_space<vmem>>, vector<1x32x256xf32>,
    return
  }
  func.func @transform_0(%arg0: i32) -> (i32, i32, i32) {
    %c0_i32 = arith.constant 0 : i32
    %c0_i32_0 = arith.constant 0 : i32
    %c0_i32_1 = arith.constant 0 : i32
    return %arg0, %c0_i32, %c0_i32_0 : i32, i32, i32
  }
  func.func @transform_1(%arg0: i32) -> (i32, i32) {
    %c0_i32 = arith.constant 0 : i32
    %c0_i32_0 = arith.constant 0 : i32
    %c0_i32_1 = arith.constant 0 : i32
    return %c0_i32, %c0_i32_0 : i32, i32
  }
  func.func @transform_2(%arg0: i32) -> (i32, i32, i32) {
    %c0_i32 = arith.constant 0 : i32
    %c0_i32_0 = arith.constant 0 : i32
    %c0_i32_1 = arith.constant 0 : i32
    return %arg0, %c0_i32, %c0_i32_0 : i32, i32, i32
  }
}

</mosaic_0001>

<bundles_post_ra>
// kernel: volume_encoder_forward.4
= control target key start
LH: loop header
LB: loop body
LE: loop exit
PB: predicated region body
PF: predicated region fallthrough
CT: control target
= control target key end

     0   :  { %s1223_s1 = inlined_call_operand.vmem [shape: bf16[256,128], index: 1, kind: input, shape index: {}]   ;;  %s1224_s0 = inlined_call_operand.vmem [shape: bf16[256,256], index: 0, kind: input, shape index: {}]   ;;  %s1225_s2 = inlined_call_operand.vmem [shape: f32[256,128], index: 2, kind: output, shape index: {}]  }
   0x1   :  { %v904_v0 = vld [vmem:[%s1223_s1 + $0x78] sm:$0xff]   ;;  %v906_v2 = vld [vmem:[%s1223_s1 + $0x70] sm:$0xff]   ;;  %v908_v4 = vld [vmem:[%s1223_s1 + $0x68] sm:$0xff]  }
   0x2   :  { %v905_v1 = vld [vmem:[%s1223_s1 + $0x38] sm:$0xff]   ;;  %776 = vmatprep.subr.bf16.mxu0 %v904_v0  ;;  %888 = vmatprep.subr.bf16.mxu1 %v904_v0  ;;  %v907_v3 = vld [vmem:[%s1223_s1 + $0x30] sm:$0xff]   ;;  %v909_v5 = vld [vmem:[%s1223_s1 + $0x28] sm:$0xff]  }
   0x3   :  { %777 = vmatpush3.bf16.msra.mxu0 %v905_v1  ;;  %896 = vmatpush3.bf16.msra.mxu1 %v905_v1  ;;  %v910_v6 = vld [vmem:[%s1223_s1 + $0x60] sm:$0xff]   ;;  %v912_v8 = vld [vmem:[%s1223_s1 + $0x58] sm:$0xff]   ;;  %v914_v10 = vld [vmem:[%s1223_s1 + $0x50] sm:$0xff]  }
   0x4   :  { %778 = vmatprep.subr.bf16.mxu0 %v906_v2  ;;  %889 = vmatprep.subr.bf16.mxu1 %v906_v2  ;;  %v911_v7 = vld [vmem:[%s1223_s1 + $0x20] sm:$0xff]   ;;  %v913_v9 = vld [vmem:[%s1223_s1 + $0x18] sm:$0xff]   ;;  %v915_v13 = vld [vmem:[%s1223_s1 + $0x10] sm:$0xff]  }
   0x5   :  { %v922_v11 = vld [vmem:[%s1224_s0 + $0x4] ss:$8 sps:$4 sm:$0xff]   ;;  %v920_v18 = vld [vmem:[%s1224_s0] ss:$8 sps:$4 sm:$0xff]   ;;  %v926_v20 = vld [vmem:[%s1224_s0 + $0x14] ss:$8 sps:$4 sm:$0xff]  }
   0x6   :  { %v925_v12 = vld [vmem:[%s1224_s0 + $0x84] ss:$8 sps:$4 sm:$0xff]   ;;  %432 = vmatprep.mubr.bf16.mxu0 %v922_v11  ;;  %v923_v19 = vld [vmem:[%s1224_s0 + $0x80] ss:$8 sps:$4 sm:$0xff]   ;;  %v928_v21 = vld [vmem:[%s1224_s0 + $0x94] ss:$8 sps:$4 sm:$0xff]  }
   0x7   :  { %779 = vmatpush3.bf16.msra.mxu0 %v907_v3  ;;  %897 = vmatpush3.bf16.msra.mxu1 %v907_v3  ;;  %v916_v14 = vld [vmem:[%s1223_s1 + $0x48] sm:$0xff]   ;;  %v918_v16 = vld [vmem:[%s1223_s1 + $0x40] sm:$0xff]   ;;  %v930_v22 = vld [vmem:[%s1224_s0 + $0x10] ss:$8 sps:$4 sm:$0xff]  }
   0x8   :  { %780 = vmatprep.subr.bf16.mxu0 %v908_v4  ;;  %890 = vmatprep.subr.bf16.mxu1 %v908_v4  ;;  %v917_v15 = vld [vmem:[%s1223_s1 + $0x8] sm:$0xff]   ;;  %v919_v17 = vld [vmem:[%s1223_s1] sm:$0xff]   ;;  %v931_v23 = vld [vmem:[%s1224_s0 + $0x90] ss:$8 sps:$4 sm:$0xff]  }
   0x9   :  { %496 = vmatprep.mubr.bf16.mxu1 %v925_v12  ;;  %v932_v24 = vld [vmem:[%s1224_s0 + $0x24] ss:$8 sps:$4 sm:$0xff]   ;;  %v936_v26 = vld [vmem:[%s1224_s0 + $0x20] ss:$8 sps:$4 sm:$0xff]   ;;  %v938_v28 = vld [vmem:[%s1224_s0 + $0x34] ss:$8 sps:$4 sm:$0xff]  }
   0xa   :  { %v934_v25 = vld [vmem:[%s1224_s0 + $0xa4] ss:$8 sps:$4 sm:$0xff]   ;;  %v937_v27 = vld [vmem:[%s1224_s0 + $0xa0] ss:$8 sps:$4 sm:$0xff]   ;;  %v940_v29 = vld [vmem:[%s1224_s0 + $0xb4] ss:$8 sps:$4 sm:$0xff]  }
   0xb   :  { %781 = vmatpush3.bf16.msra.mxu0 %v909_v5  ;;  %898 = vmatpush3.bf16.msra.mxu1 %v909_v5  ;;  %v942_v30 = vld [vmem:[%s1224_s0 + $0x30] ss:$8 sps:$4 sm:$0xff]   ;;  %v944_v32 = vld [vmem:[%s1224_s0 + $0x44] ss:$8 sps:$4 sm:$0xff]   ;;  %v948_v34 = vld [vmem:[%s1224_s0 + $0x40] ss:$8 sps:$4 sm:$0xff]  }
   0xc   :  { %782 = vmatprep.subr.bf16.mxu0 %v910_v6  ;;  %891 = vmatprep.subr.bf16.mxu1 %v910_v6  ;;  %v943_v31 = vld [vmem:[%s1224_s0 + $0xb0] ss:$8 sps:$4 sm:$0xff]   ;;  %v946_v33 = vld [vmem:[%s1224_s0 + $0xc4] ss:$8 sps:$4 sm:$0xff]   ;;  %v949_v35 = vld [vmem:[%s1224_s0 + $0xc0] ss:$8 sps:$4 sm:$0xff]  }
   0xd   :  { %v950_v36 = vld [vmem:[%s1224_s0 + $0x54] ss:$8 sps:$4 sm:$0xff]   ;;  %v954_v38 = vld [vmem:[%s1224_s0 + $0x50] ss:$8 sps:$4 sm:$0xff]   ;;  %v956_v40 = vld [vmem:[%s1224_s0 + $0x64] ss:$8 sps:$4 sm:$0xff]  }
   0xe   :  { %v952_v37 = vld [vmem:[%s1224_s0 + $0xd4] ss:$8 sps:$4 sm:$0xff]   ;;  %v955_v39 = vld [vmem:[%s1224_s0 + $0xd0] ss:$8 sps:$4 sm:$0xff]   ;;  %v958_v41 = vld [vmem:[%s1224_s0 + $0xe4] ss:$8 sps:$4 sm:$0xff]  }
   0xf   :  { %783 = vmatpush3.bf16.msra.mxu0 %v911_v7  ;;  %899 = vmatpush3.bf16.msra.mxu1 %v911_v7  ;;  %v960_v42 = vld [vmem:[%s1224_s0 + $0x60] ss:$8 sps:$4 sm:$0xff]   ;;  %v962_v44 = vld [vmem:[%s1224_s0 + $0x74] ss:$8 sps:$4 sm:$0xff]   ;;  %v966_v46 = vld [vmem:[%s1224_s0 + $0x70] ss:$8 sps:$4 sm:$0xff]  }
  0x10   :  { %784 = vmatprep.subr.bf16.mxu0 %v912_v8  ;;  %892 = vmatprep.subr.bf16.mxu1 %v912_v8  ;;  %v961_v43 = vld [vmem:[%s1224_s0 + $0xe0] ss:$8 sps:$4 sm:$0xff]   ;;  %v964_v45 = vld [vmem:[%s1224_s0 + $0xf4] ss:$8 sps:$4 sm:$0xff]   ;;  %v967_v47 = vld [vmem:[%s1224_s0 + $0xf0] ss:$8 sps:$4 sm:$0xff]  }
  0x13   :  { %785 = vmatpush3.bf16.msra.mxu0 %v913_v9  ;;  %900 = vmatpush3.bf16.msra.mxu1 %v913_v9 }
  0x14   :  { %786 = vmatprep.subr.bf16.mxu0 %v914_v10  ;;  %893 = vmatprep.subr.bf16.mxu1 %v914_v10 }
  0x17   :  { %787 = vmatpush3.bf16.msra.mxu0 %v915_v13  ;;  %901 = vmatpush3.bf16.msra.mxu1 %v915_v13 }
  0x18   :  { %788 = vmatprep.subr.bf16.mxu0 %v916_v14  ;;  %894 = vmatprep.subr.bf16.mxu1 %v916_v14 }
  0x1b   :  { %789 = vmatpush3.bf16.msra.mxu0 %v917_v15  ;;  %902 = vmatpush3.bf16.msra.mxu1 %v917_v15 }
  0x1c   :  { %790 = vmatprep.subr.bf16.mxu0 %v918_v16  ;;  %895 = vmatprep.subr.bf16.mxu1 %v918_v16 }
  0x1f   :  { %791 = vmatpush3.bf16.msra.mxu0 %v919_v17  ;;  %903 = vmatpush3.bf16.msra.mxu1 %v919_v17 }
  0x22   :  { %433 = vmatmul.mubr.bf16.vlgmr.msra.gmra.mxu0 %v920_v18  ;;  %497 = vmatmul.mubr.bf16.vlgmr.msra.gmra.mxu1 %v923_v19 }
  0x23   :  { %440 = vmatprep.mubr.bf16.mxu0 %v926_v20  ;;  %504 = vmatprep.mubr.bf16.mxu1 %v928_v21 }
  0x2a   :  { %441 = vmatmul.mubr.bf16.gmra.mxu0 %v930_v22  ;;  %505 = vmatmul.mubr.bf16.gmra.mxu1 %v931_v23 }
  0x2b   :  { %448 = vmatprep.mubr.bf16.mxu0 %v932_v24  ;;  %512 = vmatprep.mubr.bf16.mxu1 %v934_v25 }
  0x32   :  { %449 = vmatmul.mubr.bf16.gmra.mxu0 %v936_v26  ;;  %513 = vmatmul.mubr.bf16.gmra.mxu1 %v937_v27 }
  0x33   :  { %456 = vmatprep.mubr.bf16.mxu0 %v938_v28  ;;  %520 = vmatprep.mubr.bf16.mxu1 %v940_v29 }
  0x3a   :  { %457 = vmatmul.mubr.bf16.gmra.mxu0 %v942_v30  ;;  %521 = vmatmul.mubr.bf16.gmra.mxu1 %v943_v31 }
  0x3b   :  { %464 = vmatprep.mubr.bf16.mxu0 %v944_v32  ;;  %528 = vmatprep.mubr.bf16.mxu1 %v946_v33 }
  0x42   :  { %465 = vmatmul.mubr.bf16.gmra.mxu0 %v948_v34  ;;  %529 = vmatmul.mubr.bf16.gmra.mxu1 %v949_v35 }
  0x43   :  { %472 = vmatprep.mubr.bf16.mxu0 %v950_v36  ;;  %536 = vmatprep.mubr.bf16.mxu1 %v952_v37 }
  0x4a   :  { %473 = vmatmul.mubr.bf16.gmra.mxu0 %v954_v38  ;;  %537 = vmatmul.mubr.bf16.gmra.mxu1 %v955_v39 }
  0x4b   :  { %480 = vmatprep.mubr.bf16.mxu0 %v956_v40  ;;  %544 = vmatprep.mubr.bf16.mxu1 %v958_v41 }
  0x52   :  { %481 = vmatmul.mubr.bf16.gmra.mxu0 %v960_v42  ;;  %545 = vmatmul.mubr.bf16.gmra.mxu1 %v961_v43 }
  0x53   :  { %488 = vmatprep.mubr.bf16.mxu0 %v962_v44  ;;  %552 = vmatprep.mubr.bf16.mxu1 %v964_v45 }
  0x5a   :  { %489 = vmatmul.mubr.bf16.gmra.mxu0 %v966_v46  ;;  %553 = vmatmul.mubr.bf16.gmra.mxu1 %v967_v47 }
  0xe2   :  { %v792_v48 = vpop.f32.mrf.mxu0  ;;  %v840_v49 = vpop.f32.mrf.mxu1 }
  0xe4   :  { %v793_v50 = vpop.f32.mrf.mxu0  ;;  %v841_v51 = vpop.f32.mrf.mxu1 }
  0xe5   :  { %v794_v52 = vadd.f32 %v793_v50, %v792_v48  ;;  %v842_v53 = vadd.f32 %v841_v51, %v840_v49 }
  0xe6   :  { %v795_v54 = vpop.f32.mrf.mxu0  ;;  %v843_v55 = vpop.f32.mrf.mxu1 }
  0xe7   :  { %v660_v56 = vmax.f32 %v794_v52, 0.0  ;;  %v676_v57 = vmax.f32 %v842_v53, 0.0 }
  0xe8   :  { %v796_v58 = vpop.f32.mrf.mxu0  ;;  %v844_v59 = vpop.f32.mrf.mxu1 }
  0xe9   :  { %692 = vst [vmem:[%s1225_s2] sm:$0xff] %v660_v56  ;;  %708 = vst [vmem:[%s1225_s2 + $0x80] sm:$0xff] %v676_v57  ;;  %v797_v60 = vadd.f32 %v796_v58, %v795_v54  ;;  %v845_v61 = vadd.f32 %v844_v59, %v843_v55 }
  0xea   :  { %v798_v62 = vpop.f32.mrf.mxu0  ;;  %v846_v63 = vpop.f32.mrf.mxu1 }
  0xeb   :  { %v661_v0 = vmax.f32 %v797_v60, 0.0  ;;  %v677_v1 = vmax.f32 %v845_v61, 0.0 }
  0xec   :  { %v799_v2 = vpop.f32.mrf.mxu0  ;;  %v847_v3 = vpop.f32.mrf.mxu1 }
  0xed   :  { %693 = vst [vmem:[%s1225_s2 + $0x8] sm:$0xff] %v661_v0  ;;  %709 = vst [vmem:[%s1225_s2 + $0x88] sm:$0xff] %v677_v1  ;;  %v800_v4 = vadd.f32 %v799_v2, %v798_v62  ;;  %v848_v5 = vadd.f32 %v847_v3, %v846_v63 }
  0xee   :  { %v801_v6 = vpop.f32.mrf.mxu0  ;;  %v849_v7 = vpop.f32.mrf.mxu1 }
  0xef   :  { %v662_v8 = vmax.f32 %v800_v4, 0.0  ;;  %v678_v9 = vmax.f32 %v848_v5, 0.0 }
  0xf0   :  { %v802_v10 = vpop.f32.mrf.mxu0  ;;  %v850_v11 = vpop.f32.mrf.mxu1 }
  0xf1   :  { %694 = vst [vmem:[%s1225_s2 + $0x10] sm:$0xff] %v662_v8  ;;  %710 = vst [vmem:[%s1225_s2 + $0x90] sm:$0xff] %v678_v9  ;;  %v803_v12 = vadd.f32 %v802_v10, %v801_v6  ;;  %v851_v13 = vadd.f32 %v850_v11, %v849_v7 }
  0xf2   :  { %v804_v14 = vpop.f32.mrf.mxu0  ;;  %v852_v15 = vpop.f32.mrf.mxu1 }
  0xf3   :  { %v663_v16 = vmax.f32 %v803_v12, 0.0  ;;  %v679_v17 = vmax.f32 %v851_v13, 0.0 }
  0xf4   :  { %v805_v18 = vpop.f32.mrf.mxu0  ;;  %v853_v19 = vpop.f32.mrf.mxu1 }
  0xf5   :  { %695 = vst [vmem:[%s1225_s2 + $0x18] sm:$0xff] %v663_v16  ;;  %711 = vst [vmem:[%s1225_s2 + $0x98] sm:$0xff] %v679_v17  ;;  %v806_v20 = vadd.f32 %v805_v18, %v804_v14  ;;  %v854_v21 = vadd.f32 %v853_v19, %v852_v15 }
  0xf6   :  { %v807_v22 = vpop.f32.mrf.mxu0  ;;  %v855_v23 = vpop.f32.mrf.mxu1 }
  0xf7   :  { %v664_v24 = vmax.f32 %v806_v20, 0.0  ;;  %v680_v25 = vmax.f32 %v854_v21, 0.0 }
  0xf8   :  { %v808_v26 = vpop.f32.mrf.mxu0  ;;  %v856_v27 = vpop.f32.mrf.mxu1 }
  0xf9   :  { %696 = vst [vmem:[%s1225_s2 + $0x20] sm:$0xff] %v664_v24  ;;  %712 = vst [vmem:[%s1225_s2 + $0xa0] sm:$0xff] %v680_v25  ;;  %v809_v28 = vadd.f32 %v808_v26, %v807_v22  ;;  %v857_v29 = vadd.f32 %v856_v27, %v855_v23 }
  0xfa   :  { %v810_v30 = vpop.f32.mrf.mxu0  ;;  %v858_v31 = vpop.f32.mrf.mxu1 }
  0xfb   :  { %v665_v32 = vmax.f32 %v809_v28, 0.0  ;;  %v681_v33 = vmax.f32 %v857_v29, 0.0 }
  0xfc   :  { %v811_v34 = vpop.f32.mrf.mxu0  ;;  %v859_v35 = vpop.f32.mrf.mxu1 }
  0xfd   :  { %697 = vst [vmem:[%s1225_s2 + $0x28] sm:$0xff] %v665_v32  ;;  %713 = vst [vmem:[%s1225_s2 + $0xa8] sm:$0xff] %v681_v33  ;;  %v812_v36 = vadd.f32 %v811_v34, %v810_v30  ;;  %v860_v37 = vadd.f32 %v859_v35, %v858_v31 }
  0xfe   :  { %v813_v38 = vpop.f32.mrf.mxu0  ;;  %v861_v39 = vpop.f32.mrf.mxu1 }
  0xff   :  { %v666_v40 = vmax.f32 %v812_v36, 0.0  ;;  %v682_v41 = vmax.f32 %v860_v37, 0.0 }
 0x100   :  { %v814_v42 = vpop.f32.mrf.mxu0  ;;  %v862_v43 = vpop.f32.mrf.mxu1 }
 0x101   :  { %698 = vst [vmem:[%s1225_s2 + $0x30] sm:$0xff] %v666_v40  ;;  %714 = vst [vmem:[%s1225_s2 + $0xb0] sm:$0xff] %v682_v41  ;;  %v815_v44 = vadd.f32 %v814_v42, %v813_v38  ;;  %v863_v45 = vadd.f32 %v862_v43, %v861_v39 }
 0x102   :  { %v816_v46 = vpop.f32.mrf.mxu0  ;;  %v864_v47 = vpop.f32.mrf.mxu1 }
 0x103   :  { %v667_v48 = vmax.f32 %v815_v44, 0.0  ;;  %v683_v49 = vmax.f32 %v863_v45, 0.0 }
 0x104   :  { %v817_v50 = vpop.f32.mrf.mxu0  ;;  %v865_v51 = vpop.f32.mrf.mxu1 }
 0x105   :  { %699 = vst [vmem:[%s1225_s2 + $0x38] sm:$0xff] %v667_v48  ;;  %715 = vst [vmem:[%s1225_s2 + $0xb8] sm:$0xff] %v683_v49  ;;  %v818_v52 = vadd.f32 %v817_v50, %v816_v46  ;;  %v866_v53 = vadd.f32 %v865_v51, %v864_v47 }
 0x106   :  { %v819_v54 = vpop.f32.mrf.mxu0  ;;  %v867_v55 = vpop.f32.mrf.mxu1 }
 0x107   :  { %v668_v56 = vmax.f32 %v818_v52, 0.0  ;;  %v684_v57 = vmax.f32 %v866_v53, 0.0 }
 0x108   :  { %v820_v58 = vpop.f32.mrf.mxu0  ;;  %v868_v59 = vpop.f32.mrf.mxu1 }
 0x109   :  { %700 = vst [vmem:[%s1225_s2 + $0x40] sm:$0xff] %v668_v56  ;;  %716 = vst [vmem:[%s1225_s2 + $0xc0] sm:$0xff] %v684_v57  ;;  %v821_v60 = vadd.f32 %v820_v58, %v819_v54  ;;  %v869_v61 = vadd.f32 %v868_v59, %v867_v55 }
 0x10a   :  { %v822_v62 = vpop.f32.mrf.mxu0  ;;  %v870_v63 = vpop.f32.mrf.mxu1 }
 0x10b   :  { %v669_v0 = vmax.f32 %v821_v60, 0.0  ;;  %v685_v1 = vmax.f32 %v869_v61, 0.0 }
 0x10c   :  { %v823_v2 = vpop.f32.mrf.mxu0  ;;  %v871_v3 = vpop.f32.mrf.mxu1 }
 0x10d   :  { %701 = vst [vmem:[%s1225_s2 + $0x48] sm:$0xff] %v669_v0  ;;  %717 = vst [vmem:[%s1225_s2 + $0xc8] sm:$0xff] %v685_v1  ;;  %v824_v4 = vadd.f32 %v823_v2, %v822_v62  ;;  %v872_v5 = vadd.f32 %v871_v3, %v870_v63 }
 0x10e   :  { %v825_v6 = vpop.f32.mrf.mxu0  ;;  %v873_v7 = vpop.f32.mrf.mxu1 }
 0x10f   :  { %v670_v8 = vmax.f32 %v824_v4, 0.0  ;;  %v686_v9 = vmax.f32 %v872_v5, 0.0 }
 0x110   :  { %v826_v10 = vpop.f32.mrf.mxu0  ;;  %v874_v11 = vpop.f32.mrf.mxu1 }
 0x111   :  { %702 = vst [vmem:[%s1225_s2 + $0x50] sm:$0xff] %v670_v8  ;;  %718 = vst [vmem:[%s1225_s2 + $0xd0] sm:$0xff] %v686_v9  ;;  %v827_v12 = vadd.f32 %v826_v10, %v825_v6  ;;  %v875_v13 = vadd.f32 %v874_v11, %v873_v7 }
 0x112   :  { %v828_v14 = vpop.f32.mrf.mxu0  ;;  %v876_v15 = vpop.f32.mrf.mxu1 }
 0x113   :  { %v671_v16 = vmax.f32 %v827_v12, 0.0  ;;  %v687_v17 = vmax.f32 %v875_v13, 0.0 }
 0x114   :  { %v829_v18 = vpop.f32.mrf.mxu0  ;;  %v877_v19 = vpop.f32.mrf.mxu1 }
 0x115   :  { %703 = vst [vmem:[%s1225_s2 + $0x58] sm:$0xff] %v671_v16  ;;  %719 = vst [vmem:[%s1225_s2 + $0xd8] sm:$0xff] %v687_v17  ;;  %v830_v20 = vadd.f32 %v829_v18, %v828_v14  ;;  %v878_v21 = vadd.f32 %v877_v19, %v876_v15 }
 0x116   :  { %v831_v22 = vpop.f32.mrf.mxu0  ;;  %v879_v23 = vpop.f32.mrf.mxu1 }
 0x117   :  { %v672_v24 = vmax.f32 %v830_v20, 0.0  ;;  %v688_v25 = vmax.f32 %v878_v21, 0.0 }
 0x118   :  { %v832_v26 = vpop.f32.mrf.mxu0  ;;  %v880_v27 = vpop.f32.mrf.mxu1 }
 0x119   :  { %704 = vst [vmem:[%s1225_s2 + $0x60] sm:$0xff] %v672_v24  ;;  %720 = vst [vmem:[%s1225_s2 + $0xe0] sm:$0xff] %v688_v25  ;;  %v833_v28 = vadd.f32 %v832_v26, %v831_v22  ;;  %v881_v29 = vadd.f32 %v880_v27, %v879_v23 }
 0x11a   :  { %v834_v30 = vpop.f32.mrf.mxu0  ;;  %v882_v31 = vpop.f32.mrf.mxu1 }
 0x11b   :  { %v673_v32 = vmax.f32 %v833_v28, 0.0  ;;  %v689_v33 = vmax.f32 %v881_v29, 0.0 }
 0x11c   :  { %v835_v34 = vpop.f32.mrf.mxu0  ;;  %v883_v35 = vpop.f32.mrf.mxu1 }
 0x11d   :  { %705 = vst [vmem:[%s1225_s2 + $0x68] sm:$0xff] %v673_v32  ;;  %721 = vst [vmem:[%s1225_s2 + $0xe8] sm:$0xff] %v689_v33  ;;  %v836_v36 = vadd.f32 %v835_v34, %v834_v30  ;;  %v884_v37 = vadd.f32 %v883_v35, %v882_v31 }
 0x11e   :  { %v837_v38 = vpop.f32.mrf.mxu0  ;;  %v885_v39 = vpop.f32.mrf.mxu1 }
 0x11f   :  { %v674_v40 = vmax.f32 %v836_v36, 0.0  ;;  %v690_v41 = vmax.f32 %v884_v37, 0.0 }
 0x120   :  { %v838_v42 = vpop.f32.mrf.mxu0  ;;  %v886_v43 = vpop.f32.mrf.mxu1 }
 0x121   :  { %706 = vst [vmem:[%s1225_s2 + $0x70] sm:$0xff] %v674_v40  ;;  %722 = vst [vmem:[%s1225_s2 + $0xf0] sm:$0xff] %v690_v41  ;;  %v839_v44 = vadd.f32 %v838_v42, %v837_v38  ;;  %v887_v45 = vadd.f32 %v886_v43, %v885_v39 }
 0x123   :  { %v675_v46 = vmax.f32 %v839_v44, 0.0  ;;  %v691_v47 = vmax.f32 %v887_v45, 0.0 }
 0x125   :  { %707 = vst [vmem:[%s1225_s2 + $0x78] sm:$0xff] %v675_v46  ;;  %723 = vst [vmem:[%s1225_s2 + $0xf8] sm:$0xff] %v691_v47 }

// kernel: volume_encoder_forward.5
= control target key start
LH: loop header
LB: loop body
LE: loop exit
PB: predicated region body
PF: predicated region fallthrough
CT: control target
= control target key end

     0   :  { %s5143_s12 = smov 0   ;;  %s6140_s0 = inlined_call_operand.vmem [shape: f32[4,10,10,128], index: 0, kind: input, shape index: {}]   ;;  %s6141_s1 = inlined_call_operand.vmem [shape: bf16[9,128,128], index: 1, kind: input, shape index: {}]   ;;  %s6142_s2 = inlined_call_operand.vmem [shape: bf16[9,128,128], index: 2, kind: input, shape index: {}]   ;;  %s6143_s3 = inlined_call_operand.vmem [shape: f32[4,8,8,128], index: 3, kind: output, shape index: {}]  }
   0x1 LB: > { %s3757_s13 = sadd.s32 4294967295, %s5120_s12   ;;  %p3761_p0 = scmp.ge.s32.totalorder %s5120_s12, 1  ;;  %s5120_s12 = sphi %s5143_s12, %s13_s12  }
   0x2   : > { %p137_p1 = scmp.lt.s32.totalorder %s5120_s12, 5 }
   0x4   : > { %p138_p2 = pnand %p3761_p0, %p137_p1 }
   0x6   : > { %141 = sbr.rel (%p138_p2) target bundleno = 751 (0x2ef), region = 32 }
   0xb   : > { %v4958_v0 = vld [vmem:[%s6141_s1 + $0x78] sm:$0xff]   ;;  %p161_p3 = scmp.lt.s32.totalorder %s3757_s13, 3  ;;  %v4960_v2 = vld [vmem:[%s6141_s1 + $0x70] sm:$0xff]   ;;  %v4962_v4 = vld [vmem:[%s6141_s1 + $0x68] sm:$0xff]   ;;  %vm1648_vm0 = vcmask 1043456   ;;  %vm1654_vm2 = vcmask 1040384  }
   0xc   : > { %v4959_v1 = vld [vmem:[%s6141_s1 + $0x38] sm:$0xff]   ;;  %4516 = vmatprep.subr.bf16.mxu0 %v4958_v0  ;;  %v4961_v3 = vld [vmem:[%s6141_s1 + $0x30] sm:$0xff]   ;;  %v4963_v5 = vld [vmem:[%s6141_s1 + $0x28] sm:$0xff]   ;;  %vm1649_vm1 = vsmask.f32 7938  ;;  %vm2156_vm9 = vcmask 1042432  }
   0xd   : > { %4540 = vmatprep.subr.bf16.mxu1 %v4959_v1  ;;  %4517 = vmatpush3.bf16.msra.mxu0 %v4958_v0  ;;  %s6173_s13 = smov (!%p161_p3, %s3757_s13), 3  ;;  %v4964_v6 = vld [vmem:[%s6141_s1 + $0x60] sm:$0xff]   ;;  %v4966_v8 = vld [vmem:[%s6141_s1 + $0x58] sm:$0xff]   ;;  %v4968_v10 = vld [vmem:[%s6141_s1 + $0x50] sm:$0xff]   ;;  %vm1655_vm3 = vsmask.f32 256 }
   0xe   : > { %4541 = vmatpush3.bf16.msra.mxu1 %v4959_v1  ;;  %4518 = vmatprep.subr.bf16.mxu0 %v4960_v2  ;;  %v4965_v7 = vld [vmem:[%s6141_s1 + $0x20] sm:$0xff]   ;;  %s4948_s30 = smul.u32 160, %s6173_s13  ;;  %v4967_v9 = vld [vmem:[%s6141_s1 + $0x18] sm:$0xff]   ;;  %v4969_v14 = vld [vmem:[%s6141_s1 + $0x10] sm:$0xff]   ;;  %vm1734_vm4 = vsmask.f32 3328 }
   0xf   : > { %4542 = vmatprep.subr.bf16.mxu1 %v4961_v3  ;;  %v4970_v18 = vld [vmem:[%s6141_s1 + $0x48] sm:$0xff]   ;;  %v4972_v20 = vld [vmem:[%s6141_s1 + $0x40] sm:$0xff]   ;;  %v4974_v26 = vld [vmem:[%s6141_s1 + $0xb8] sm:$0xff]   ;;  %vm1735_vm5 = vsmask.f32 7440  ;;  %vm2157_vm10 = vcmask 1046532  }
  0x10   : > { %s5187_s10 = scalar_lea.vmem %s6140_s0, %s4948_s30  ;;  %v4971_v19 = vld [vmem:[%s6141_s1 + $0x8] sm:$0xff]   ;;  %v4973_v21 = vld [vmem:[%s6141_s1] sm:$0xff]   ;;  %v4975_v27 = vld [vmem:[%s6141_s1 + $0xf8] sm:$0xff]   ;;  %s4291_s17 = sshll.u32 %s6173_s13, 6 }
  0x11   : > { %4519 = vmatpush3.bf16.msra.mxu0 %v4960_v2  ;;  %v200_v11 = vld [vmem:[%s5187_s10 + $0x1] sm:$0xff]  ;;  %v5194_v12 = vld [vmem:[%s5187_s10 + $0x11] sm:$0xff]  ;;  %vm5665_vm6 = vmand %vm1648_vm0, %vm1649_vm1  ;;  %s6120_s19 = scalar_lea.vmem %s6143_s3, %s4291_s17 }
  0x12   : > { %4543 = vmatpush3.bf16.msra.mxu1 %v4961_v3  ;;  %4520 = vmatprep.subr.bf16.mxu0 %v4962_v4  ;;  %v172_v13 = vld [vmem:[%s5187_s10] sm:$0xff]  ;;  %v208_v15 = vpack.c.bf16 %v5194_v12, %v200_v11  ;;  %v5202_v16 = vld [vmem:[%s5187_s10 + $0x10] sm:$0xff]  ;;  %v4978_v38 = vld [vmem:[%s6141_s1 + $0xa8] sm:$0xff]  }
  0x13   : > { %4544 = vmatprep.subr.bf16.mxu1 %v4963_v5  ;;  %v180_v17 = vpack.c.bf16 %v5202_v16, %v172_v13  ;;  %v5218_v22 = vld [vmem:[%s5187_s10 + $0x21] sm:$0xff]  ;;  %v5221_v23 = vld [vmem:[%s5187_s10 + $0x31] sm:$0xff]  ;;  %vm5671_vm7 = vmand %vm1654_vm2, %vm1655_vm3 }
  0x14   : > { %4532 = vmatprep.mubr.bf16.mxu0 %v208_v15  ;;  %v174_v24 = vld [vmem:[%s5187_s10 + $0x20] sm:$0xff]  ;;  %v5225_v25 = vld [vmem:[%s5187_s10 + $0x30] sm:$0xff]  ;;  %v5235_v28 = vpack.c.bf16 %v5221_v23, %v5218_v22  ;;  %v4979_v43 = vld [vmem:[%s6141_s1 + $0xe8] sm:$0xff]  }
  0x15   : > { %4521 = vmatpush3.bf16.msra.mxu0 %v4962_v4  ;;  %4556 = vmatprep.mubr.bf16.mxu1 %v180_v17  ;;  %v4976_v29 = vld [vmem:[%s6141_s1 + $0xb0] sm:$0xff]   ;;  %v5241_v30 = vld [vmem:[%s5187_s10 + $0x41] sm:$0xff]  ;;  %v5250_v33 = vpack.c.bf16 %v5225_v25, %v174_v24  ;;  %v614_v51 = vpack.c.bf16 %v174_v24, %v5202_v16  ;;  %v4982_v52 = vld [vmem:[%s6141_s1 + $0x98] sm:$0xff]  }
  0x16   : > { %4545 = vmatpush3.bf16.msra.mxu1 %v4963_v5  ;;  %4522 = vmatprep.subr.bf16.mxu0 %v4964_v6  ;;  %v5244_v31 = vld [vmem:[%s5187_s10 + $0x51] sm:$0xff]  ;;  %v5247_v32 = vld [vmem:[%s5187_s10 + $0x40] sm:$0xff]  ;;  %v4986_v56 = vld [vmem:[%s6141_s1 + $0x88] sm:$0xff]  }
  0x17   : > { %4546 = vmatprep.subr.bf16.mxu1 %v4965_v7  ;;  %v5253_v34 = vld [vmem:[%s5187_s10 + $0x50] sm:$0xff]  ;;  %v5260_v36 = vpack.c.bf16 %v5244_v31, %v5241_v30  ;;  %v5263_v37 = vld [vmem:[%s5187_s10 + $0x61] sm:$0xff]  ;;  %v4983_v53 = vld [vmem:[%s6141_s1 + $0xd8] sm:$0xff]   ;;  %v615_v3 = vpack.c.bf16 %v5247_v32, %v5225_v25 }
  0x18   : > { %v4977_v35 = vld [vmem:[%s6141_s1 + $0xf0] sm:$0xff]   ;;  %v5271_v39 = vpack.c.bf16 %v5253_v34, %v5247_v32  ;;  %v5278_v41 = vld [vmem:[%s5187_s10 + $0x60] sm:$0xff]  ;;  %v4987_v57 = vld [vmem:[%s6141_s1 + $0xc8] sm:$0xff]  }
  0x19   : > { %4523 = vmatpush3.bf16.msra.mxu0 %v4964_v6  ;;  %v5274_v40 = vld [vmem:[%s5187_s10 + $0x71] sm:$0xff]  ;;  %v455_v45 = vld [vmem:[%s5187_s10 + $0x2] sm:$0xff]  ;;  %vm5685_vm8 = vmor %vm1734_vm4, %vm1735_vm5 }
  0x1a   : > { %4547 = vmatpush3.bf16.msra.mxu1 %v4965_v7  ;;  %4524 = vmatprep.subr.bf16.mxu0 %v4966_v8  ;;  %v5281_v42 = vld [vmem:[%s5187_s10 + $0x70] sm:$0xff]  ;;  %v5290_v44 = vpack.c.bf16 %v5274_v40, %v5263_v37  ;;  %v4980_v48 = vld [vmem:[%s6141_s1 + $0xa0] sm:$0xff]   ;;  %v4990_v62 = vld [vmem:[%s6141_s1 + $0x138] sm:$0xff]  }
  0x1b   : > { %4548 = vmatprep.subr.bf16.mxu1 %v4967_v9  ;;  %v5294_v46 = vld [vmem:[%s5187_s10 + $0x12] sm:$0xff]  ;;  %v5298_v47 = vpack.c.bf16 %v5281_v42, %v5278_v41  ;;  %v4981_v49 = vld [vmem:[%s6141_s1 + $0xe0] sm:$0xff]   ;;  %v4995_v13 = vld [vmem:[%s6141_s1 + $0x168] sm:$0xff]  }
  0x1c   : > { %v463_v50 = vpack.c.bf16 %v5294_v46, %v455_v45  ;;  %v4984_v54 = vld [vmem:[%s6141_s1 + $0x90] sm:$0xff]   ;;  %v4988_v58 = vld [vmem:[%s6141_s1 + $0x80] sm:$0xff]   ;;  %v4991_v63 = vld [vmem:[%s6141_s1 + $0x178] sm:$0xff]  }
  0x1d   : > { %4525 = vmatpush3.bf16.msra.mxu0 %v4966_v8  ;;  %v4985_v55 = vld [vmem:[%s6141_s1 + $0xd0] sm:$0xff]   ;;  %v4989_v59 = vld [vmem:[%s6141_s1 + $0xc0] sm:$0xff]   ;;  %v5002_v24 = vld [vmem:[%s6141_s1 + $0x108] sm:$0xff]  }
  0x1e   : > { %4549 = vmatpush3.bf16.msra.mxu1 %v4967_v9  ;;  %4526 = vmatprep.subr.bf16.mxu0 %v4968_v10  ;;  %v457_v60 = vld [vmem:[%s5187_s10 + $0x22] sm:$0xff]  ;;  %v5336_v61 = vld [vmem:[%s5187_s10 + $0x32] sm:$0xff]  ;;  %v616_v9 = vpack.c.bf16 %v5278_v41, %v5253_v34  ;;  %v765_v34 = vpack.c.bf16 %v5241_v30, %v5221_v23  ;;  %vm5784_vm11 = vmor %vm2156_vm9, %vm2157_vm10 }
  0x1f   : > { %4550 = vmatprep.subr.bf16.mxu1 %v4969_v14  ;;  %v5345_v0 = vld [vmem:[%s5187_s10 + $0x42] sm:$0xff]  ;;  %v5348_v1 = vpack.c.bf16 %v5336_v61, %v457_v60  ;;  %v5351_v2 = vld [vmem:[%s5187_s10 + $0x52] sm:$0xff] }
  0x20   : > { %v4992_v4 = vld [vmem:[%s6141_s1 + $0x130] sm:$0xff]   ;;  %v5363_v6 = vpack.c.bf16 %v5351_v2, %v5345_v0  ;;  %v5366_v7 = vld [vmem:[%s5187_s10 + $0x62] sm:$0xff]  ;;  %v5007_v32 = vld [vmem:[%s6141_s1 + $0x1f8] sm:$0xff]  }
  0x21   : > { %4527 = vmatpush3.bf16.msra.mxu0 %v4968_v10  ;;  %v4993_v5 = vld [vmem:[%s6141_s1 + $0x170] sm:$0xff]   ;;  %v4994_v10 = vld [vmem:[%s6141_s1 + $0x128] sm:$0xff]   ;;  %v5378_v11 = vld [vmem:[%s5187_s10 + $0x80] sm:$0xff]  ;;  %v916_v30 = vpack.c.bf16 %v5366_v7, %v5351_v2 }
  0x22   : > { %4551 = vmatpush3.bf16.msra.mxu1 %v4969_v14  ;;  %4528 = vmatprep.subr.bf16.mxu0 %v4970_v18  ;;  %v5370_v8 = vld [vmem:[%s5187_s10 + $0x72] sm:$0xff]  ;;  %v617_v15 = vpack.c.bf16 %v5378_v11, %v5281_v42  ;;  %v4996_v16 = vld [vmem:[%s6141_s1 + $0x120] sm:$0xff]   ;;  %v5003_v25 = vld [vmem:[%s6141_s1 + $0x148] sm:$0xff]   ;;  %v766_v42 = vpack.c.bf16 %v5263_v37, %v5244_v31 }
  0x23   : > { %4552 = vmatprep.subr.bf16.mxu1 %v4971_v19  ;;  %v5386_v14 = vpack.c.bf16 %v5370_v8, %v5366_v7  ;;  %v4997_v17 = vld [vmem:[%s6141_s1 + $0x160] sm:$0xff]   ;;  %v5009_v41 = vld [vmem:[%s6141_s1 + $0x1f0] sm:$0xff]   ;;  %v5010_v23 = vld [vmem:[%s6141_s1 + $0x1a8] sm:$0xff]  }
  0x24   : > { %v5451_v45 = vld [vmem:[%s5187_s10 + $0x82] sm:$0xff]  ;;  %v5031_v2 = vld [vmem:[%s6142_s2 + $0x30] sm:$0xff]  }
  0x25   : > { %4529 = vmatpush3.bf16.msra.mxu0 %v4970_v18  ;;  %v764_v18 = vpack.c.bf16 %v5218_v22, %v5194_v12  ;;  %v5000_v12 = vld [vmem:[%s6141_s1 + $0x110] sm:$0xff]   ;;  %v5012_v37 = vld [vmem:[%s6141_s1 + $0x1a0] sm:$0xff]  }
  0x26   : > { %4553 = vmatpush3.bf16.msra.mxu1 %v4971_v19  ;;  %4530 = vmatprep.subr.bf16.mxu0 %v4972_v20  ;;  %v914_v19 = vpack.c.bf16 %v457_v60, %v5294_v46  ;;  %v5001_v22 = vld [vmem:[%s6141_s1 + $0x150] sm:$0xff]   ;;  %v5011_v46 = vld [vmem:[%s6141_s1 + $0x1e8] sm:$0xff]  }
  0x27   : > { %4554 = vmatprep.subr.bf16.mxu1 %v4973_v21 }
  0x29   : > { %4531 = vmatpush3.bf16.msra.mxu0 %v4972_v20  ;;  %v4998_v20 = vld [vmem:[%s6141_s1 + $0x118] sm:$0xff]  }
  0x2a   : > { %4555 = vmatpush3.bf16.msra.mxu1 %v4973_v21  ;;  %4564 = vmatprep.subr.bf16.mxu0 %v4974_v26  ;;  %v4999_v21 = vld [vmem:[%s6141_s1 + $0x158] sm:$0xff]  }
  0x2b   : > { %4588 = vmatprep.subr.bf16.mxu1 %v4975_v27 }
  0x2c   : > { %4533 = vmatmul.mubr.bf16.vlgmr.msra.gmra.mxu0 %v5235_v28 }
  0x2d   : > { %4557 = vmatmul.mubr.bf16.vlgmr.msra.gmra.mxu1 %v5250_v33  ;;  %4565 = vmatpush3.bf16.msra.mxu0 %v4974_v26  ;;  %v5004_v26 = vld [vmem:[%s6141_s1 + $0x100] sm:$0xff]  }
  0x2e   : > { %4589 = vmatpush3.bf16.msra.mxu1 %v4975_v27  ;;  %4566 = vmatprep.subr.bf16.mxu0 %v4976_v29  ;;  %v5005_v27 = vld [vmem:[%s6141_s1 + $0x140] sm:$0xff]  }
  0x2f   : > { %4590 = vmatprep.subr.bf16.mxu1 %v4977_v35  ;;  %4536 = vmatprep.mubr.bf16.mxu0 %v5260_v36 }
  0x30   : > { %4560 = vmatprep.mubr.bf16.mxu1 %v5271_v39 }
  0x31   : > { %4567 = vmatpush3.bf16.msra.mxu0 %v4976_v29  ;;  %v5006_v29 = vld [vmem:[%s6141_s1 + $0x1b8] sm:$0xff]  }
  0x32   : > { %4591 = vmatpush3.bf16.msra.mxu1 %v4977_v35  ;;  %4568 = vmatprep.subr.bf16.mxu0 %v4978_v38  ;;  %v5008_v35 = vld [vmem:[%s6141_s1 + $0x1b0] sm:$0xff]  }
  0x33   : > { %4592 = vmatprep.subr.bf16.mxu1 %v4979_v43 }
  0x34   : > { %4537 = vmatmul.mubr.bf16.gmra.mxu0 %v5290_v44 }
  0x35   : > { %4569 = vmatpush3.bf16.msra.mxu0 %v4978_v38  ;;  %4561 = vmatmul.mubr.bf16.gmra.mxu1 %v5298_v47  ;;  %v915_v38 = vpack.c.bf16 %v5345_v0, %v5336_v61 }
  0x36   : > { %4593 = vmatpush3.bf16.msra.mxu1 %v4979_v43  ;;  %4570 = vmatprep.subr.bf16.mxu0 %v4980_v48  ;;  %v5443_v43 = vld [vmem:[%s5187_s10 + $0x81] sm:$0xff] }
  0x37   : > { %4594 = vmatprep.subr.bf16.mxu1 %v4981_v49  ;;  %4580 = vmatprep.mubr.bf16.mxu0 %v463_v50  ;;  %v767_v31 = vpack.c.bf16 %v5443_v43, %v5274_v40  ;;  %v5014_v40 = vld [vmem:[%s6141_s1 + $0x198] sm:$0xff]  }
  0x38   : > { %4604 = vmatprep.mubr.bf16.mxu1 %v614_v51  ;;  %v5015_v50 = vld [vmem:[%s6141_s1 + $0x1d8] sm:$0xff]   ;;  %v5016_v51 = vld [vmem:[%s6141_s1 + $0x190] sm:$0xff]  }
  0x39   : > { %4571 = vmatpush3.bf16.msra.mxu0 %v4980_v48  ;;  %v917_v48 = vpack.c.bf16 %v5451_v45, %v5370_v8  ;;  %v5035_v8 = vld [vmem:[%s6142_s2 + $0x70] sm:$0xff]  }
  0x3a   : > { %4595 = vmatpush3.bf16.msra.mxu1 %v4981_v49  ;;  %4572 = vmatprep.subr.bf16.mxu0 %v4982_v52  ;;  %v5013_v49 = vld [vmem:[%s6141_s1 + $0x1e0] sm:$0xff]  }
  0x3b   : > { %4596 = vmatprep.subr.bf16.mxu1 %v4983_v53 }
  0x3d   : > { %4573 = vmatpush3.bf16.msra.mxu0 %v4982_v52  ;;  %v5017_v52 = vld [vmem:[%s6141_s1 + $0x1d0] sm:$0xff]  }
  0x3e   : > { %4597 = vmatpush3.bf16.msra.mxu1 %v4983_v53  ;;  %4574 = vmatprep.subr.bf16.mxu0 %v4984_v54  ;;  %v5018_v53 = vld [vmem:[%s6141_s1 + $0x188] sm:$0xff]  }
  0x3f   : > { %4598 = vmatprep.subr.bf16.mxu1 %v4985_v55 }
  0x41   : > { %4575 = vmatpush3.bf16.msra.mxu0 %v4984_v54  ;;  %v5021_v54 = vld [vmem:[%s6141_s1 + $0x1c0] sm:$0xff]  }
  0x42   : > { %4599 = vmatpush3.bf16.msra.mxu1 %v4985_v55  ;;  %4576 = vmatprep.subr.bf16.mxu0 %v4986_v56  ;;  %v5022_v55 = vld [vmem:[%s6141_s1 + $0x238] sm:$0xff]  }
  0x43   : > { %4600 = vmatprep.subr.bf16.mxu1 %v4987_v57 }
  0x45   : > { %4577 = vmatpush3.bf16.msra.mxu0 %v4986_v56  ;;  %v5023_v56 = vld [vmem:[%s6141_s1 + $0x230] sm:$0xff]  }
  0x46   : > { %4601 = vmatpush3.bf16.msra.mxu1 %v4987_v57  ;;  %4578 = vmatprep.subr.bf16.mxu0 %v4988_v58  ;;  %v3924_v57 = vld [vmem:[%s5187_s10 + $0x90] sm:$0xff] }
  0x47   : > { %4602 = vmatprep.subr.bf16.mxu1 %v4989_v59  ;;  %v1068_v60 = vpack.c.bf16 %v3924_v57, %v5378_v11  ;;  %v5037_v11 = vld [vmem:[%s6142_s2 + $0x68] sm:$0xff]  }
  0x49   : > { %4579 = vmatpush3.bf16.msra.mxu0 %v4988_v58  ;;  %v5024_v58 = vld [vmem:[%s6141_s1 + $0x228] sm:$0xff]  }
  0x4a   : > { %4603 = vmatpush3.bf16.msra.mxu1 %v4989_v59  ;;  %4612 = vmatprep.subr.bf16.mxu0 %v4990_v62  ;;  %v3956_v59 = vld [vmem:[%s5187_s10 + $0x91] sm:$0xff] }
  0x4b   : > { %4636 = vmatprep.subr.bf16.mxu1 %v4991_v63  ;;  %v1218_v61 = vpack.c.bf16 %v3956_v59, %v5443_v43 }
  0x4c   : > { %4581 = vmatmul.mubr.bf16.vlgmr.msra.gmra.mxu0 %v5348_v1 }
  0x4d   : > { %4613 = vmatpush3.bf16.msra.mxu0 %v4990_v62  ;;  %4605 = vmatmul.mubr.bf16.vlgmr.msra.gmra.mxu1 %v615_v3  ;;  %v5029_v62 = vld [vmem:[%s6141_s1 + $0x200] sm:$0xff]   ;;  %v5122_v3 = vmov 0  }
  0x4e   : > { %4637 = vmatpush3.bf16.msra.mxu1 %v4991_v63  ;;  %4614 = vmatprep.subr.bf16.mxu0 %v4992_v4  ;;  %v3988_v63 = vld [vmem:[%s5187_s10 + $0x92] sm:$0xff]  ;;  %1521 = vst [vmem:[#allocation2 + $0x18] sm:$0xf] %v5122_v3  ;;  %1522 = vst [vmem:[#allocation2 + $0x1c] sm:$0x1] %v5122_v3 }
  0x4f   : > { %4638 = vmatprep.subr.bf16.mxu1 %v4993_v5  ;;  %4584 = vmatprep.mubr.bf16.mxu0 %v5363_v6  ;;  %v1368_v0 = vpack.c.bf16 %v3988_v63, %v5451_v45  ;;  %1515 = vst [vmem:[#allocation2] sm:$0xf] %v5122_v3  ;;  %1516 = vst [vmem:[#allocation2 + $0x4] sm:$0x1] %v5122_v3 }
  0x50   : > { %4608 = vmatprep.mubr.bf16.mxu1 %v616_v9  ;;  %1517 = vst [vmem:[#allocation2 + $0x8] sm:$0xf] %v5122_v3  ;;  %1518 = vst [vmem:[#allocation2 + $0xc] sm:$0x1] %v5122_v3 }
  0x51   : > { %4615 = vmatpush3.bf16.msra.mxu0 %v4992_v4  ;;  %1519 = vst [vmem:[#allocation2 + $0x10] sm:$0xf] %v5122_v3  ;;  %1520 = vst [vmem:[#allocation2 + $0x14] sm:$0x1] %v5122_v3  ;;  %v5032_v4 = vld [vmem:[%s6142_s2 + $0x28] sm:$0xff]  }
  0x52   : > { %4639 = vmatpush3.bf16.msra.mxu1 %v4993_v5  ;;  %4616 = vmatprep.subr.bf16.mxu0 %v4994_v10  ;;  %1523 = vst [vmem:[#allocation2 + $0x20] sm:$0xf] %v5122_v3  ;;  %1524 = vst [vmem:[#allocation2 + $0x24] sm:$0x1] %v5122_v3  ;;  %v5033_v5 = vld [vmem:[%s6142_s2 + $0x78] sm:$0xff]  }
  0x53   : > { %4640 = vmatprep.subr.bf16.mxu1 %v4995_v13  ;;  %1525 = vst [vmem:[#allocation2 + $0x28] sm:$0xf] %v5122_v3  ;;  %1526 = vst [vmem:[#allocation2 + $0x2c] sm:$0x1] %v5122_v3 }
  0x54   : > { %4585 = vmatmul.mubr.bf16.gmra.mxu0 %v5386_v14  ;;  %1527 = vst [vmem:[#allocation2 + $0x30] sm:$0xf] %v5122_v3  ;;  %1528 = vst [vmem:[#allocation2 + $0x34] sm:$0x1] %v5122_v3 }
  0x55   : > { %4617 = vmatpush3.bf16.msra.mxu0 %v4994_v10  ;;  %4609 = vmatmul.mubr.bf16.gmra.mxu1 %v617_v15  ;;  %1529 = vst [vmem:[#allocation2 + $0x38] sm:$0xf] %v5122_v3  ;;  %1530 = vst [vmem:[#allocation2 + $0x3c] sm:$0x1] %v5122_v3  ;;  %v5036_v10 = vld [vmem:[%s6142_s2 + $0x18] sm:$0xff]  }
  0x56   : > { %4641 = vmatpush3.bf16.msra.mxu1 %v4995_v13  ;;  %4618 = vmatprep.subr.bf16.mxu0 %v4996_v16  ;;  %1531 = vst [vmem:[#allocation2 + $0x40] sm:$0xf] %v5122_v3  ;;  %1532 = vst [vmem:[#allocation2 + $0x44] sm:$0x1] %v5122_v3 }
  0x57   : > { %4642 = vmatprep.subr.bf16.mxu1 %v4997_v17  ;;  %4628 = vmatprep.mubr.bf16.mxu0 %v764_v18  ;;  %1533 = vst [vmem:[#allocation2 + $0x48] sm:$0xf] %v5122_v3  ;;  %1534 = vst [vmem:[#allocation2 + $0x4c] sm:$0x1] %v5122_v3  ;;  %v5040_v18 = vld [vmem:[%s6142_s2 + $0x8] sm:$0xff]  }
  0x58   : > { %4652 = vmatprep.mubr.bf16.mxu1 %v914_v19 }
  0x59   : > { %4619 = vmatpush3.bf16.msra.mxu0 %v4996_v16  ;;  %v5039_v16 = vld [vmem:[%s6142_s2 + $0x60] sm:$0xff]  }
  0x5a   : > { %4643 = vmatpush3.bf16.msra.mxu1 %v4997_v17  ;;  %4620 = vmatprep.subr.bf16.mxu0 %v4998_v20 }
  0x5b   : > { %4644 = vmatprep.subr.bf16.mxu1 %v4999_v21 }
  0x5d   : > { %4621 = vmatpush3.bf16.msra.mxu0 %v4998_v20  ;;  %v5041_v20 = vld [vmem:[%s6142_s2 + $0x58] sm:$0xff]  }
  0x5e   : > { %4645 = vmatpush3.bf16.msra.mxu1 %v4999_v21  ;;  %4622 = vmatprep.subr.bf16.mxu0 %v5000_v12 }
  0x5f   : > { %4646 = vmatprep.subr.bf16.mxu1 %v5001_v22 }
  0x61   : > { %4623 = vmatpush3.bf16.msra.mxu0 %v5000_v12  ;;  %v5042_v12 = vld [vmem:[%s6142_s2] sm:$0xff]  }
  0x62   : > { %4647 = vmatpush3.bf16.msra.mxu1 %v5001_v22  ;;  %4624 = vmatprep.subr.bf16.mxu0 %v5002_v24 }
  0x63   : > { %4648 = vmatprep.subr.bf16.mxu1 %v5003_v25 }
  0x65   : > { %4625 = vmatpush3.bf16.msra.mxu0 %v5002_v24  ;;  %v5043_v24 = vld [vmem:[%s6142_s2 + $0x50] sm:$0xff]  }
  0x66   : > { %4649 = vmatpush3.bf16.msra.mxu1 %v5003_v25  ;;  %4626 = vmatprep.subr.bf16.mxu0 %v5004_v26 }
  0x67   : > { %4650 = vmatprep.subr.bf16.mxu1 %v5005_v27 }
  0x69   : > { %4627 = vmatpush3.bf16.msra.mxu0 %v5004_v26  ;;  %v5592_v26 = vld [vmem:[%s6142_s2 + $0xf8] sm:$0xff]  }
  0x6a   : > { %4651 = vmatpush3.bf16.msra.mxu1 %v5005_v27  ;;  %4660 = vmatprep.subr.bf16.mxu0 %v5006_v29  ;;  %6146 = vst [vmem:[#allocation3_spill] sm:$0xff] %v5592_v26 }
  0x6b   : > { %4684 = vmatprep.subr.bf16.mxu1 %v5007_v32 }
  0x6c   : > { %4629 = vmatmul.mubr.bf16.vlgmr.msra.gmra.mxu0 %v765_v34 }
  0x6d   : > { %4661 = vmatpush3.bf16.msra.mxu0 %v5006_v29  ;;  %4653 = vmatmul.mubr.bf16.vlgmr.msra.gmra.mxu1 %v915_v38  ;;  %v5046_v29 = vld [vmem:[%s6142_s2 + $0x48] sm:$0xff]  }
  0x6e   : > { %4685 = vmatpush3.bf16.msra.mxu1 %v5007_v32  ;;  %4662 = vmatprep.subr.bf16.mxu0 %v5008_v35 }
  0x6f   : > { %4686 = vmatprep.subr.bf16.mxu1 %v5009_v41  ;;  %4632 = vmatprep.mubr.bf16.mxu0 %v766_v42 }
  0x70   : > { %4656 = vmatprep.mubr.bf16.mxu1 %v916_v30 }
  0x71   : > { %4663 = vmatpush3.bf16.msra.mxu0 %v5008_v35  ;;  %v5049_v35 = vld [vmem:[%s6142_s2 + $0x40] sm:$0xff]  }
  0x72   : > { %4687 = vmatpush3.bf16.msra.mxu1 %v5009_v41  ;;  %4664 = vmatprep.subr.bf16.mxu0 %v5010_v23 }
  0x73   : > { %4688 = vmatprep.subr.bf16.mxu1 %v5011_v46 }
  0x74   : > { %4633 = vmatmul.mubr.bf16.gmra.mxu0 %v767_v31 }
  0x75   : > { %4665 = vmatpush3.bf16.msra.mxu0 %v5010_v23  ;;  %4657 = vmatmul.mubr.bf16.gmra.mxu1 %v917_v48  ;;  %v5610_v23 = vld [vmem:[%s6142_s2 + $0xb8] sm:$0xff]  }
  0x76   : > { %4689 = vmatpush3.bf16.msra.mxu1 %v5011_v46  ;;  %4666 = vmatprep.subr.bf16.mxu0 %v5012_v37  ;;  %6147 = vst [vmem:[#allocation4_spill] sm:$0xff] %v5610_v23 }
  0x77   : > { %4690 = vmatprep.subr.bf16.mxu1 %v5013_v49  ;;  %4676 = vmatprep.mubr.bf16.mxu0 %v5250_v33  ;;  %v5019_v33 = vld [vmem:[%s6141_s1 + $0x1c8] sm:$0xff]  }
  0x78   : > { %4700 = vmatprep.mubr.bf16.mxu1 %v5235_v28  ;;  %v5020_v28 = vld [vmem:[%s6141_s1 + $0x180] sm:$0xff]  }
  0x79   : > { %4667 = vmatpush3.bf16.msra.mxu0 %v5012_v37 }
  0x7a   : > { %4691 = vmatpush3.bf16.msra.mxu1 %v5013_v49  ;;  %4668 = vmatprep.subr.bf16.mxu0 %v5014_v40 }
  0x7b   : > { %4692 = vmatprep.subr.bf16.mxu1 %v5015_v50 }
  0x7d   : > { %4669 = vmatpush3.bf16.msra.mxu0 %v5014_v40 }
  0x7e   : > { %4693 = vmatpush3.bf16.msra.mxu1 %v5015_v50  ;;  %4670 = vmatprep.subr.bf16.mxu0 %v5016_v51 }
  0x7f   : > { %4694 = vmatprep.subr.bf16.mxu1 %v5017_v52 }
  0x81   : > { %4671 = vmatpush3.bf16.msra.mxu0 %v5016_v51 }
  0x82   : > { %4695 = vmatpush3.bf16.msra.mxu1 %v5017_v52  ;;  %4672 = vmatprep.subr.bf16.mxu0 %v5018_v53 }
  0x83   : > { %4696 = vmatprep.subr.bf16.mxu1 %v5019_v33 }
  0x85   : > { %4673 = vmatpush3.bf16.msra.mxu0 %v5018_v53 }
  0x86   : > { %4697 = vmatpush3.bf16.msra.mxu1 %v5019_v33  ;;  %4674 = vmatprep.subr.bf16.mxu0 %v5020_v28 }
  0x87   : > { %4698 = vmatprep.subr.bf16.mxu1 %v5021_v54 }
  0x89   : > { %4675 = vmatpush3.bf16.msra.mxu0 %v5020_v28 }
  0x8a   : > { %4699 = vmatpush3.bf16.msra.mxu1 %v5021_v54  ;;  %4708 = vmatprep.subr.bf16.mxu0 %v5022_v55 }
  0x8b   : > { %4732 = vmatprep.subr.bf16.mxu1 %v5033_v5 }
  0x8c   : > { %4677 = vmatmul.mubr.bf16.vlgmr.msra.gmra.mxu0 %v5271_v39  ;;  %v5026_v39 = vld [vmem:[%s6141_s1 + $0x218] sm:$0xff]  }
  0x8d   : > { %4709 = vmatpush3.bf16.msra.mxu0 %v5022_v55  ;;  %4701 = vmatmul.mubr.bf16.vlgmr.msra.gmra.mxu1 %v5260_v36  ;;  %v5025_v36 = vld [vmem:[%s6141_s1 + $0x220] sm:$0xff]  }
  0x8e   : > { %4710 = vmatprep.subr.bf16.mxu0 %v5023_v56  ;;  %4680 = vmatprep.mubr.bf16.mxu0 %v5298_v47  ;;  %v5028_v47 = vld [vmem:[%s6141_s1 + $0x208] sm:$0xff]  }
  0x8f   : > { %4704 = vmatprep.mubr.bf16.mxu1 %v5290_v44  ;;  %v5027_v44 = vld [vmem:[%s6141_s1 + $0x210] sm:$0xff]   ;;  %4733 = vmatpush3.bf16.msra.mxu1 %v5033_v5 }
  0x90   : > { %4734 = vmatprep.subr.bf16.mxu1 %v5035_v8 }
  0x91   : > { %4711 = vmatpush3.bf16.msra.mxu0 %v5023_v56 }
  0x92   : > { %4712 = vmatprep.subr.bf16.mxu0 %v5024_v58 }
  0x93   : > { %4735 = vmatpush3.bf16.msra.mxu1 %v5035_v8 }
  0x94   : > { %4681 = vmatmul.mubr.bf16.gmra.mxu0 %v1068_v60  ;;  %4736 = vmatprep.subr.bf16.mxu1 %v5037_v11 }
  0x95   : > { %4713 = vmatpush3.bf16.msra.mxu0 %v5024_v58  ;;  %4705 = vmatmul.mubr.bf16.gmra.mxu1 %v1218_v61 }
  0x96   : > { %4714 = vmatprep.subr.bf16.mxu0 %v5025_v36  ;;  %4724 = vmatprep.mubr.bf16.mxu0 %v5348_v1  ;;  %v5030_v1 = vld [vmem:[%s6142_s2 + $0x38] sm:$0xff]  }
  0x97   : > { %4737 = vmatpush3.bf16.msra.mxu1 %v5037_v11 }
  0x98   : > { %4738 = vmatprep.subr.bf16.mxu1 %v5039_v16 }
  0x99   : > { %4715 = vmatpush3.bf16.msra.mxu0 %v5025_v36 }
  0x9a   : > { %4716 = vmatprep.subr.bf16.mxu0 %v5026_v39 }
  0x9b   : > { %4739 = vmatpush3.bf16.msra.mxu1 %v5039_v16 }
  0x9c   : > { %4740 = vmatprep.subr.bf16.mxu1 %v5041_v20 }
  0x9d   : > { %4717 = vmatpush3.bf16.msra.mxu0 %v5026_v39 }
  0x9e   : > { %4718 = vmatprep.subr.bf16.mxu0 %v5027_v44 }
  0x9f   : > { %4741 = vmatpush3.bf16.msra.mxu1 %v5041_v20 }
  0xa0   : > { %4742 = vmatprep.subr.bf16.mxu1 %v5043_v24 }
  0xa1   : > { %4719 = vmatpush3.bf16.msra.mxu0 %v5027_v44 }
  0xa2   : > { %4720 = vmatprep.subr.bf16.mxu0 %v5028_v47 }
  0xa3   : > { %4743 = vmatpush3.bf16.msra.mxu1 %v5043_v24 }
  0xa4   : > { %4744 = vmatprep.subr.bf16.mxu1 %v5046_v29 }
  0xa5   : > { %4721 = vmatpush3.bf16.msra.mxu0 %v5028_v47 }
  0xa6   : > { %4722 = vmatprep.subr.bf16.mxu0 %v5029_v62 }
  0xa7   : > { %4745 = vmatpush3.bf16.msra.mxu1 %v5046_v29 }
  0xa8   : > { %4746 = vmatprep.subr.bf16.mxu1 %v5049_v35 }
  0xa9   : > { %4723 = vmatpush3.bf16.msra.mxu0 %v5029_v62 }
  0xaa   : > { %4756 = vmatprep.subr.bf16.mxu0 %v5030_v1 }
  0xab   : > { %4747 = vmatpush3.bf16.msra.mxu1 %v5049_v35 }
  0xac   : > { %4725 = vmatmul.mubr.bf16.vlgmr.msra.gmra.mxu0 %v5363_v6  ;;  %v5034_v6 = vld [vmem:[%s6142_s2 + $0x20] sm:$0xff]   ;;  %4780 = vmatprep.subr.bf16.mxu1 %v5610_v23 }
  0xad   : > { %4728 = vmatprep.mubr.bf16.mxu0 %v5386_v14  ;;  %4757 = vmatpush3.bf16.msra.mxu0 %v5030_v1  ;;  %v5038_v14 = vld [vmem:[%s6142_s2 + $0x10] sm:$0xff]  }
  0xae   : > { %4758 = vmatprep.subr.bf16.mxu0 %v5031_v2 }
  0xb1   : > { %4759 = vmatpush3.bf16.msra.mxu0 %v5031_v2 }
  0xb2   : > { %4760 = vmatprep.subr.bf16.mxu0 %v5032_v4 }
  0xb4   : > { %4729 = vmatmul.mubr.bf16.gmra.mxu0 %v1368_v0 }
  0xb5   : > { %4761 = vmatpush3.bf16.msra.mxu0 %v5032_v4 }
  0xb6   : > { %4762 = vmatprep.subr.bf16.mxu0 %v5034_v6 }
  0xb9   : > { %4763 = vmatpush3.bf16.msra.mxu0 %v5034_v6 }
  0xba   : > { %4764 = vmatprep.subr.bf16.mxu0 %v5036_v10 }
  0xbd   : > { %4765 = vmatpush3.bf16.msra.mxu0 %v5036_v10 }
  0xbe   : > { %4766 = vmatprep.subr.bf16.mxu0 %v5038_v14 }
  0xc1   : > { %4767 = vmatpush3.bf16.msra.mxu0 %v5038_v14 }
  0xc2   : > { %4768 = vmatprep.subr.bf16.mxu0 %v5040_v18 }
  0xc5   : > { %4769 = vmatpush3.bf16.msra.mxu0 %v5040_v18 }
  0xc6   : > { %4770 = vmatprep.subr.bf16.mxu0 %v5042_v12 }
  0xc9   : > { %4771 = vmatpush3.bf16.msra.mxu0 %v5042_v12 }
  0xca   : > { %4804 = vmatprep.subr.bf16.mxu0 %v5592_v26 }
  0xec   : > { %v5544_v7 = vpop.f32.mrf.mxu0 }
  0xed   : > { %v5562_v15 = vpop.f32.mrf.mxu1 }
  0xee   : > { %v5549_v9 = vpop.f32.mrf.mxu0  ;;  %v433_v10 = vadd.f32 %v5562_v15, %v5544_v7 }
  0xef   : > { %v5572_v19 = vpop.f32.mrf.mxu1 }
  0xf0   : > { %v5557_v13 = vpop.f32.mrf.mxu0  ;;  %v425_v14 = vadd.f32 %v5572_v19, %v5549_v9 }
  0xf1   : > { %v5582_v22 = vpop.f32.mrf.mxu1 }
  0xf2   : > { %v5567_v17 = vpop.f32.mrf.mxu0  ;;  %v436_v20 = vadd.f32 %v5582_v22, %v5557_v13  ;;  %v5642_v13 = vld [vmem:[#allocation2] sm:$0xf] }
  0xf3   : > { %v5594_v27 = vpop.f32.mrf.mxu1 }
  0xf4   : > { %v5577_v21 = vpop.f32.mrf.mxu0  ;;  %v428_v26 = vadd.f32 %v5594_v27, %v5567_v17 }
  0xf5   : > { %v4562_v34 = vpop.f32.mrf.mxu1 }
  0xf6   : > { %v5587_v25 = vpop.f32.mrf.mxu0 }
  0xf7   : > { %v440_v41 = vpop.f32.mrf.mxu1 }
  0xf8   : > { %v5599_v32 = vpop.f32.mrf.mxu0  ;;  %v441_v9 = vadd.f32 %v440_v41, %v5587_v25  ;;  %v1741_v25 = vshll.u32 %v5642_v13, 16 }
  0xf9   : > { %v4563_v43 = vpop.f32.mrf.mxu1 }
  0xfa   : > { %v5605_v38 = vpop.f32.mrf.mxu0  ;;  %v452_v19 = vadd.f32 %v4563_v43, %v5599_v32 }
  0xfb   : > { %v443_v45 = vpop.f32.mrf.mxu1 }
 0x10c   : > { %v4582_v42 = vpop.f32.mrf.mxu0 }
 0x10d   : > { %v4606_v31 = vpop.f32.mrf.mxu1  ;;  %v599_v16 = vadd.f32 %v4582_v42, %v433_v10 }
 0x10e   : > { %v566_v30 = vpop.f32.mrf.mxu0 }
 0x10f   : > { %v717_v48 = vpop.f32.mrf.mxu1  ;;  %v597_v12 = vadd.f32 %v566_v30, %v425_v14  ;;  %v750_v29 = vadd.f32 %v4606_v31, %v599_v16 }
 0x110   : > { %v4583_v46 = vpop.f32.mrf.mxu0 }
 0x111   : > { %v4607_v40 = vpop.f32.mrf.mxu1  ;;  %v600_v35 = vadd.f32 %v4583_v46, %v436_v20  ;;  %v748_v7 = vadd.f32 %v717_v48, %v597_v12  ;;  %v444_v46 = vadd.f32 %v443_v45, %v5605_v38 }
 0x112   : > { %v569_v37 = vpop.f32.mrf.mxu0 }
 0x113   : > { %v720_v51 = vpop.f32.mrf.mxu1  ;;  %v598_v42 = vadd.f32 %v569_v37, %v428_v26  ;;  %v751_v22 = vadd.f32 %v4607_v40, %v600_v35 }
 0x114   : > { %v4586_v49 = vpop.f32.mrf.mxu0 }
 0x115   : > { %v4610_v53 = vpop.f32.mrf.mxu1 }
 0x116   : > { %v582_v50 = vpop.f32.mrf.mxu0 }
 0x117   : > { %v733_v28 = vpop.f32.mrf.mxu1  ;;  %v601_v16 = vadd.f32 %v582_v50, %v441_v9  ;;  %v1743_v50 = vrot.slane %v1741_v25, 5 }
 0x118   : > { %v4587_v52 = vpop.f32.mrf.mxu0 }
 0x119   : > { %v4611_v55 = vpop.f32.mrf.mxu1  ;;  %v604_v17 = vadd.f32 %v4587_v52, %v452_v19 }
 0x11a   : > { %v585_v33 = vpop.f32.mrf.mxu0 }
 0x11b   : > { %v5613_v57 = vpop.f32.mrf.mxu1  ;;  %v602_v32 = vadd.f32 %v585_v33, %v444_v46 }
 0x11d   : > { %v753_v52 = vadd.f32 %v5613_v57, %v602_v32 }
 0x12c   : > { %v4630_v54 = vpop.f32.mrf.mxu0 }
 0x12d   : > { %v4654_v59 = vpop.f32.mrf.mxu1  ;;  %v900_v15 = vadd.f32 %v4630_v54, %v750_v29  ;;  %v752_v54 = vadd.f32 %v733_v28, %v601_v16 }
 0x12e   : > { %v867_v56 = vpop.f32.mrf.mxu0 }
 0x12f   : > { %v1017_v61 = vpop.f32.mrf.mxu1  ;;  %v898_v30 = vadd.f32 %v867_v56, %v748_v7  ;;  %v1050_v27 = vadd.f32 %v4654_v59, %v900_v15  ;;  %v755_v56 = vadd.f32 %v4611_v55, %v604_v17 }
 0x130   : > { %v4631_v58 = vpop.f32.mrf.mxu0 }
 0x131   : > { %v4655_v39 = vpop.f32.mrf.mxu1  ;;  %v901_v48 = vadd.f32 %v4631_v58, %v751_v22  ;;  %v1048_v41 = vadd.f32 %v1017_v61, %v898_v30 }
 0x132   : > { %v870_v60 = vpop.f32.mrf.mxu0 }
 0x133   : > { %v5615_v47 = vpop.f32.mrf.mxu1  ;;  %v1051_v38 = vadd.f32 %v4655_v39, %v901_v48 }
 0x134   : > { %v4634_v36 = vpop.f32.mrf.mxu0 }
 0x135   : > { %v5617_v63 = vpop.f32.mrf.mxu1 }
 0x136   : > { %v883_v44 = vpop.f32.mrf.mxu0 }
 0x137   : > { %v5621_v1 = vpop.f32.mrf.mxu1  ;;  %v902_v59 = vadd.f32 %v883_v44, %v752_v54  ;;  %v1669_v54 = vld [vmem:[#allocation2 + $0x1c] sm:$0x1] }
 0x138   : > { %v4635_v62 = vpop.f32.mrf.mxu0 }
 0x139   : > { %v5623_v3 = vpop.f32.mrf.mxu1 }
 0x13a   : > { %v5619_v0 = vpop.f32.mrf.mxu0 }
 0x13b   : > { %v5625_v5 = vpop.f32.mrf.mxu1 }
 0x13c   : > { %6148 = vst [vmem:[#allocation5_spill] sm:$0xff] %v5625_v5  ;;  %v449_v5 = vadd.f32 %v4562_v34, %v5577_v21  ;;  %v1738_v21 = vshrl.u32 %v5642_v13, 16  ;;  %v749_v34 = vadd.f32 %v720_v51, %v598_v42 }
 0x13e   : > { %v603_v14 = vadd.f32 %v4586_v49, %v449_v5  ;;  %v899_v20 = vadd.f32 %v870_v60, %v749_v34  ;;  %v1740_v49 = vrot.slane %v1738_v21, 4  ;;  %v905_v5 = vadd.f32 %v4635_v62, %v755_v56 }
 0x140   : > { %v754_v40 = vadd.f32 %v4610_v53, %v603_v14  ;;  %v1049_v61 = vadd.f32 %v5615_v47, %v899_v20  ;;  %v903_v53 = vadd.f32 %v5619_v0, %v753_v52  ;;  %v1744_v39 = vor.u32 %v1743_v50, %v1740_v49 }
 0x141   : > { %v1055_v44 = vadd.f32 %v5623_v3, %v905_v5  ;;  %v1657_v5 = vld [vmem:[#allocation2 + $0xc] sm:$0x1] }
 0x142   : > { %v904_v58 = vadd.f32 %v4634_v36, %v754_v40  ;;  %v1052_v36 = vadd.f32 %v5621_v1, %v902_v59  ;;  %v1651_v59 = vld [vmem:[#allocation2 + $0x8] sm:$0xf]  ;;  %v6156_v40 = vld [vmem:[#allocation3_spill] sm:$0xff] }
 0x143   : > { %v6149_v35 = vld [vmem:[#allocation5_spill] sm:$0xff] }
 0x144   : > { %v1054_v57 = vadd.f32 %v5617_v63, %v904_v58  ;;  %v1053_v7 = vadd.f32 %v6149_v35, %v903_v53 }
 0x14c   : > { %v4678_v2 = vpop.f32.mrf.mxu0 }
 0x14d   : > { %v4702_v8 = vpop.f32.mrf.mxu1  ;;  %v1201_v43 = vadd.f32 %v4678_v2, %v1050_v27 }
 0x14e   : > { %v1168_v4 = vpop.f32.mrf.mxu0 }
 0x14f   : > { %v1318_v18 = vpop.f32.mrf.mxu1  ;;  %v1199_v45 = vadd.f32 %v1168_v4, %v1048_v41  ;;  %v1351_v51 = vadd.f32 %v4702_v8, %v1201_v43  ;;  %v5654_v4 = vld [vmem:[#allocation2 + $0x4] sm:$0x1] }
 0x150   : > { %v4679_v6 = vpop.f32.mrf.mxu0 }
 0x151   : > { %v4703_v23 = vpop.f32.mrf.mxu1  ;;  %v1202_v33 = vadd.f32 %v4679_v6, %v1051_v38  ;;  %v1349_v55 = vadd.f32 %v1318_v18, %v1199_v45  ;;  %v1747_v18 = vshll.u32 %v5654_v4, 16 }
 0x152   : > { %v5629_v11 = vpop.f32.mrf.mxu0 }
 0x153   : > { %v1321_v31 = vpop.f32.mrf.mxu1  ;;  %v1200_v62 = vadd.f32 %v5629_v11, %v1049_v61  ;;  %v1352_v47 = vadd.f32 %v4703_v23, %v1202_v33  ;;  %v5659_v23 = vrot.slane %v1744_v39, 4  ;;  %v5661_v27 = vrot.slane %v1747_v18, 5 }
 0x154   : > { %v5635_v24 = vpop.f32.mrf.mxu0 }
 0x155   : > { %v4706_v37 = vpop.f32.mrf.mxu1  ;;  %v1205_v15 = vadd.f32 %v5635_v24, %v1054_v57  ;;  %v1350_v11 = vadd.f32 %v1321_v31, %v1200_v62 }
 0x156   : > { %v1184_v10 = vpop.f32.mrf.mxu0 }
 0x157   : > { %v1334_v29 = vpop.f32.mrf.mxu1  ;;  %v1203_v63 = vadd.f32 %v1184_v10, %v1052_v36  ;;  %v1355_v24 = vadd.f32 %v4706_v37, %v1205_v15  ;;  %v1666_v37 = vld [vmem:[#allocation2 + $0x18] sm:$0xf] }
 0x158   : > { %v4683_v26 = vpop.f32.mrf.mxu0 }
 0x159   : > { %v4707_v0 = vpop.f32.mrf.mxu1  ;;  %v1206_v9 = vadd.f32 %v4683_v26, %v1055_v44  ;;  %v1353_v10 = vadd.f32 %v1334_v29, %v1203_v63 }
 0x15a   : > { %v1187_v12 = vpop.f32.mrf.mxu0 }
 0x15b   : > { %v1204_v22 = vadd.f32 %v1187_v12, %v1053_v7  ;;  %v1337_v46 = vpop.f32.mrf.mxu1  ;;  %v1356_v48 = vadd.f32 %v4707_v0, %v1206_v9  ;;  %v1672_v0 = vld [vmem:[#allocation2 + $0x20] sm:$0xf] }
 0x15d   : > { %v1354_v43 = vadd.f32 %v1337_v46, %v1204_v22  ;;  %v1750_v22 = vsel %vm5685_vm8, %v5659_v23, %v5661_v27 }
 0x16c   : > { %v4726_v28 = vpop.f32.mrf.mxu0 }
 0x16d   : > { %v1501_v60 = vadd.f32 %v4726_v28, %v1351_v51 }
 0x16e   : > { %v1468_v2 = vpop.f32.mrf.mxu0 }
 0x16f   : > { %v1509_v6 = vmax.f32 %v1501_v60, 0.0  ;;  %v1499_v8 = vadd.f32 %v1468_v2, %v1349_v55 }
 0x170   : > { %v4727_v1 = vpop.f32.mrf.mxu0 }
 0x171   : > { %v4294_v19 = vpack.c.bf16 %v1509_v6, %v1509_v6  ;;  %v1507_v3 = vmax.f32 %v1499_v8, 0.0  ;;  %v1502_v42 = vadd.f32 %v4727_v1, %v1352_v47  ;;  %v1675_v6 = vld [vmem:[#allocation2 + $0x24] sm:$0x1]  ;;  %v1660_v1 = vld [vmem:[#allocation2 + $0x10] sm:$0xf] }
 0x172   : > { %v1471_v30 = vpop.f32.mrf.mxu0 }
 0x173   : > { %v1584_v14 = vshrl.u32 %v4294_v19, 16  ;;  %v4292_v16 = vpack.c.bf16 %v1507_v3, %v1507_v3  ;;  %v1510_v17 = vmax.f32 %v1502_v42, 0.0  ;;  %v1500_v21 = vadd.f32 %v1471_v30, %v1350_v11 }
 0x174   : > { %v4730_v25 = vpop.f32.mrf.mxu0  ;;  %v1587_v32 = vshll.u32 %v4294_v19, 16  ;;  %v1663_v19 = vld [vmem:[#allocation2 + $0x14] sm:$0x1] }
 0x175   : > { %v1586_v34 = vrot.slane %v1584_v14, 7  ;;  %v1568_v26 = vshrl.u32 %v4292_v16, 16  ;;  %v4295_v41 = vpack.c.bf16 %v1510_v17, %v1510_v17  ;;  %v1571_v56 = vshll.u32 %v4292_v16, 16 }
 0x176   : > { %v1508_v20 = vmax.f32 %v1500_v21, 0.0  ;;  %v1505_v38 = vadd.f32 %v4730_v25, %v1355_v24  ;;  %v1484_v45 = vpop.f32.mrf.mxu0 }
 0x177   : > { %v1589_v49 = vor.u32 %v1587_v32, %v1586_v34  ;;  %v1590_v50 = vrot.slane %v1586_v34, 4  ;;  %v1570_v52 = vrot.slane %v1568_v26, 7  ;;  %v1592_v58 = vshrl.u32 %v4295_v41, 16  ;;  %v1693_v32 = vld [vmem:[#allocation2 + $0x3c] sm:$0x1] }
 0x178   : > { %v1595_v12 = vshll.u32 %v4295_v41, 16  ;;  %v4293_v51 = vpack.c.bf16 %v1508_v20, %v1508_v20  ;;  %v1513_v33 = vmax.f32 %v1505_v38, 0.0  ;;  %v1503_v29 = vadd.f32 %v1484_v45, %v1353_v10  ;;  %v4731_v61 = vpop.f32.mrf.mxu0  ;;  %v1690_v10 = vld [vmem:[#allocation2 + $0x38] sm:$0xf]  ;;  %v1678_v41 = vld [vmem:[#allocation2 + $0x28] sm:$0xf] }
 0x179   : > { %v1667_v53 = vsel %vm5665_vm6, %v1589_v49, %v1666_v37  ;;  %v1670_v28 = vsel %vm5671_vm7, %v1590_v50, %v1669_v54  ;;  %v1573_v55 = vor.u32 %v1571_v56, %v1570_v52  ;;  %v1574_v60 = vrot.slane %v1570_v52, 4  ;;  %v1681_v45 = vld [vmem:[#allocation2 + $0x2c] sm:$0x1] }
 0x17a   : > { %1668 = vst [vmem:[#allocation2 + $0x18] sm:$0xf] %v1667_v53  ;;  %1671 = vst [vmem:[#allocation2 + $0x1c] sm:$0x1] %v1670_v28  ;;  %v1594_v39 = vrot.slane %v1592_v58, 7  ;;  %v1576_v57 = vshrl.u32 %v4293_v51, 16  ;;  %v4298_v44 = vpack.c.bf16 %v1513_v33, %v1513_v33  ;;  %v1487_v62 = vpop.f32.mrf.mxu0  ;;  %v1506_v18 = vadd.f32 %v4731_v61, %v1356_v48 }
 0x17b   : > { %v1579_v36 = vshll.u32 %v4293_v51, 16  ;;  %v1652_v2 = vsel %vm5665_vm6, %v1573_v55, %v1651_v59  ;;  %v1658_v47 = vsel %vm5671_vm7, %v1574_v60, %v1657_v5  ;;  %v1511_v8 = vmax.f32 %v1503_v29, 0.0  ;;  %v1696_v33 = vld [vmem:[#allocation2 + $0x40] sm:$0xf]  ;;  %v1699_v29 = vld [vmem:[#allocation2 + $0x44] sm:$0x1] }
 0x17c   : > { %1653 = vst [vmem:[#allocation2 + $0x8] sm:$0xf] %v1652_v2  ;;  %1659 = vst [vmem:[#allocation2 + $0xc] sm:$0x1] %v1658_v47  ;;  %v1597_v35 = vor.u32 %v1595_v12, %v1594_v39  ;;  %v1598_v7 = vrot.slane %v1594_v39, 4  ;;  %v1578_v15 = vrot.slane %v1576_v57, 7  ;;  %v1504_v11 = vadd.f32 %v1487_v62, %v1354_v43 }
 0x17d   : > { %v1616_v63 = vshrl.u32 %v4298_v44, 16  ;;  %v4296_v3 = vpack.c.bf16 %v1511_v8, %v1511_v8  ;;  %v1514_v42 = vmax.f32 %v1506_v18, 0.0  ;;  %v1619_v24 = vshll.u32 %v4298_v44, 16  ;;  %v1687_v44 = vld [vmem:[#allocation2 + $0x34] sm:$0x1] }
 0x17e   : > { %v1673_v30 = vsel %vm5665_vm6, %v1597_v35, %v1672_v0  ;;  %v1676_v46 = vsel %vm5671_vm7, %v1598_v7, %v1675_v6  ;;  %v1581_v14 = vor.u32 %v1579_v36, %v1578_v15  ;;  %v1582_v16 = vrot.slane %v1578_v15, 4  ;;  %v1684_v36 = vld [vmem:[#allocation2 + $0x30] sm:$0xf] }
 0x17f   : > { %1674 = vst [vmem:[#allocation2 + $0x20] sm:$0xf] %v1673_v30  ;;  %1677 = vst [vmem:[#allocation2 + $0x24] sm:$0x1] %v1676_v46  ;;  %v1618_v17 = vrot.slane %v1616_v63, 7  ;;  %v1600_v48 = vshrl.u32 %v4296_v3, 16  ;;  %v4299_v21 = vpack.c.bf16 %v1514_v42, %v1514_v42 }
 0x180   : > { %v1661_v25 = vsel %vm5665_vm6, %v1581_v14, %v1660_v1  ;;  %v1664_v34 = vsel %vm5671_vm7, %v1582_v16, %v1663_v19  ;;  %v1603_v26 = vshll.u32 %v4296_v3, 16  ;;  %v1512_v43 = vmax.f32 %v1504_v11, 0.0 }
 0x181   : > { %1662 = vst [vmem:[#allocation2 + $0x10] sm:$0xf] %v1661_v25  ;;  %1665 = vst [vmem:[#allocation2 + $0x14] sm:$0x1] %v1664_v34  ;;  %v1621_v37 = vor.u32 %v1619_v24, %v1618_v17  ;;  %v1622_v54 = vrot.slane %v1618_v17, 4  ;;  %v1602_v56 = vrot.slane %v1600_v48, 7 }
 0x182   : > { %v1624_v20 = vshrl.u32 %v4299_v21, 16  ;;  %v1705_v38 = vld [vmem:[#allocation2 + $0x18] sm:$0xf]  ;;  %v1627_v49 = vshll.u32 %v4299_v21, 16  ;;  %v4297_v50 = vpack.c.bf16 %v1512_v43, %v1512_v43  ;;  %v5048_v17 = vld [vmem:[%s6142_s2 + $0xf0] sm:$0xff]  }
 0x183   : > { %v1780_v52 = vshrl.u32 %v1705_v38, 16  ;;  %v1783_v58 = vshll.u32 %v1705_v38, 16  ;;  %v1691_v59 = vsel %vm5665_vm6, %v1621_v37, %v1690_v10  ;;  %v1694_v5 = vsel %vm5671_vm7, %v1622_v54, %v1693_v32  ;;  %v1703_v61 = vld [vmem:[#allocation2 + $0x8] sm:$0xf]  ;;  %v5710_v1 = vld [vmem:[#allocation2 + $0xc] sm:$0x1] }
 0x184   : > { %v1605_v12 = vor.u32 %v1603_v26, %v1602_v56  ;;  %v1606_v51 = vrot.slane %v1602_v56, 4  ;;  %1692 = vst [vmem:[#allocation2 + $0x38] sm:$0xf] %v1691_v59  ;;  %1695 = vst [vmem:[#allocation2 + $0x3c] sm:$0x1] %v1694_v5  ;;  %v1626_v53 = vrot.slane %v1624_v20, 7  ;;  %v4049_v2 = vcombine.low %v5642_v13, %v1703_v61 }
 0x185   : > { %v1608_v28 = vshrl.u32 %v4297_v50, 16  ;;  %v1611_v55 = vshll.u32 %v4297_v50, 16  ;;  %v1752_v60 = vshrl.u32 %v1703_v61, 16  ;;  %v1755_v62 = vshll.u32 %v1703_v61, 16  ;;  %v5731_v37 = vld [vmem:[#allocation2 + $0x1c] sm:$0x1] }
 0x186   : > { %v1679_v39 = vsel %vm5665_vm6, %v1605_v12, %v1678_v41  ;;  %v1682_v57 = vsel %vm5671_vm7, %v1606_v51, %v1681_v45  ;;  %v1629_v47 = vor.u32 %v1627_v49, %v1626_v53  ;;  %v1630_v0 = vrot.slane %v1626_v53, 4  ;;  %v1706_v18 = vld [vmem:[#allocation2 + $0x20] sm:$0xf]  ;;  %4772 = vmatprep.mubr.bf16.mxu0 %v4049_v2  ;;  %v5051_v41 = vld [vmem:[%s6142_s2 + $0xe8] sm:$0xff]   ;;  %v5735_v45 = vld [vmem:[#allocation2 + $0x24] sm:$0x1] }
 0x187   : > { %1680 = vst [vmem:[#allocation2 + $0x28] sm:$0xf] %v1679_v39  ;;  %1683 = vst [vmem:[#allocation2 + $0x2c] sm:$0x1] %v1682_v57  ;;  %v1610_v6 = vrot.slane %v1608_v28, 7  ;;  %v1754_v8 = vrot.slane %v1752_v60, 4 }
 0x188   : > { %v1757_v35 = vrot.slane %v1755_v62, 5  ;;  %v1782_v7 = vrot.slane %v1780_v52, 4  ;;  %v1785_v15 = vrot.slane %v1783_v58, 5  ;;  %v1794_v63 = vshrl.u32 %v1706_v18, 16  ;;  %v1704_v11 = vld [vmem:[#allocation2 + $0x10] sm:$0xf] }
 0x189   : > { %v1697_v19 = vsel %vm5665_vm6, %v1629_v47, %v1696_v33  ;;  %v1700_v13 = vsel %vm5671_vm7, %v1630_v0, %v1699_v29  ;;  %v1613_v3 = vor.u32 %v1611_v55, %v1610_v6  ;;  %v1614_v42 = vrot.slane %v1610_v6, 4  ;;  %v5716_v30 = vld [vmem:[#allocation2 + $0x14] sm:$0x1]  ;;  %v5055_v2 = vld [vmem:[%s6142_s2 + $0xe0] sm:$0xff]  }
 0x18a   : > { %1698 = vst [vmem:[#allocation2 + $0x40] sm:$0xf] %v1697_v19  ;;  %1701 = vst [vmem:[#allocation2 + $0x44] sm:$0x1] %v1700_v13  ;;  %v1766_v46 = vshrl.u32 %v1704_v11, 16  ;;  %v1769_v14 = vshll.u32 %v1704_v11, 16  ;;  %v4050_v16 = vcombine.low %v1704_v11, %v1705_v38  ;;  %v1758_v25 = vor.u32 %v1757_v35, %v1754_v8 }
 0x18b   : > { %v5721_v24 = vrot.slane %v1794_v63, 4  ;;  %v1685_v10 = vsel %vm5665_vm6, %v1613_v3, %v1684_v36  ;;  %v1688_v48 = vsel %vm5671_vm7, %v1614_v42, %v1687_v44  ;;  %v1797_v21 = vshll.u32 %v1706_v18, 16  ;;  %v1709_v43 = vld [vmem:[#allocation2 + $0x38] sm:$0xf]  ;;  %v5737_v5 = vld [vmem:[#allocation2 + $0x3c] sm:$0x1] }
 0x18c   : > { %1686 = vst [vmem:[#allocation2 + $0x30] sm:$0xf] %v1685_v10  ;;  %1689 = vst [vmem:[#allocation2 + $0x34] sm:$0x1] %v1688_v48  ;;  %v1768_v34 = vrot.slane %v1766_v46, 4  ;;  %v1771_v32 = vrot.slane %v1769_v14, 5  ;;  %4773 = vmatmul.mubr.bf16.vlgmr.msra.gmra.mxu0 %v4050_v16  ;;  %v1786_v59 = vor.u32 %v1785_v15, %v1782_v7 }
 0x18d   : > { %v1761_v26 = vshll.u32 %v5710_v1, 16  ;;  %v1775_v31 = vshll.u32 %v5716_v30, 16  ;;  %4805 = vmatpush3.bf16.msra.mxu0 %v6156_v40  ;;  %v1799_v54 = vrot.slane %v1797_v21, 5  ;;  %v1759_v56 = vrot.slane %v1758_v25, 4  ;;  %v2132_v8 = vld [vmem:[#allocation2] sm:$0xe] }
 0x18e   : > { %v1836_v20 = vshrl.u32 %v1709_v43, 16  ;;  %v1839_v38 = vshll.u32 %v1709_v43, 16  ;;  %4806 = vmatprep.subr.bf16.mxu0 %v5048_v17  ;;  %v1707_v49 = vld [vmem:[#allocation2 + $0x28] sm:$0xf]  ;;  %v1772_v52 = vor.u32 %v1771_v32, %v1768_v34  ;;  %v5739_v61 = vld [vmem:[#allocation2 + $0x2c] sm:$0x1] }
 0x18f   : > { %v1763_v50 = vrot.slane %v1761_v26, 5  ;;  %v1777_v58 = vrot.slane %v1775_v31, 5  ;;  %v1808_v12 = vshrl.u32 %v1707_v49, 16  ;;  %v1811_v51 = vshll.u32 %v1707_v49, 16  ;;  %v2133_v15 = vld [vmem:[#allocation2 + $0x8] sm:$0xe] }
 0x190   : > { %v4051_v33 = vcombine.low %v1706_v18, %v1707_v49  ;;  %v1838_v29 = vrot.slane %v1836_v20, 4  ;;  %v1841_v28 = vrot.slane %v1839_v38, 5  ;;  %v1773_v55 = vrot.slane %v1772_v52, 4  ;;  %v5054_v11 = vld [vmem:[#allocation2 + $0x8] ss:$8 sps:$4 sm:$0xff]   ;;  %v5057_v32 = vld [vmem:[%s6142_s2 + $0xd8] sm:$0xff]  }
 0x191   : > { %v1764_v53 = vsel %vm5685_vm8, %v1759_v56, %v1763_v50  ;;  %v1787_v60 = vrot.slane %v1786_v59, 4  ;;  %v1810_v39 = vrot.slane %v1808_v12, 4  ;;  %v1813_v57 = vrot.slane %v1811_v51, 5  ;;  %4807 = vmatpush3.bf16.msra.mxu0 %v5048_v17  ;;  %v5056_v48 = vld [vmem:[%s6142_s2 + $0xb0] sm:$0xff]   ;;  %v6157_v56 = vld [vmem:[#allocation4_spill] sm:$0xff]  ;;  %v5058_v38 = vld [vmem:[%s6142_s2 + $0xa8] sm:$0xff]  }
 0x192   : > { %4776 = vmatprep.mubr.bf16.mxu0 %v4051_v33  ;;  %v4037_v36 = vcombine.low %v1750_v22, %v1764_v53  ;;  %v1789_v44 = vshll.u32 %v5731_v37, 16  ;;  %4808 = vmatprep.subr.bf16.mxu0 %v5051_v41  ;;  %v1778_v62 = vsel %vm5685_vm8, %v1773_v55, %v1777_v58  ;;  %v1800_v47 = vor.u32 %v1799_v54, %v5721_v24  ;;  %v5062_v55 = vld [vmem:[%s6142_s2 + $0x98] sm:$0xff]  }
 0x193   : > { %v1803_v0 = vshll.u32 %v5735_v45, 16  ;;  %v1817_v6 = vshll.u32 %v5739_v61, 16  ;;  %v1708_v23 = vld [vmem:[#allocation2 + $0x30] sm:$0xf]  ;;  %v1814_v22 = vor.u32 %v1813_v57, %v1810_v39  ;;  %v5757_v18 = vld [vmem:[#allocation2 + $0x34] sm:$0x1]  ;;  %v1842_v35 = vor.u32 %v1841_v28, %v1838_v29 }
 0x194   : > { %4748 = vmatprep.mubr.bf16.mxu1 %v4037_v36  ;;  %v1791_v27 = vrot.slane %v1789_v44, 5  ;;  %v1845_v7 = vshll.u32 %v5737_v5, 16  ;;  %v1822_v63 = vshrl.u32 %v1708_v23, 16  ;;  %v1825_v19 = vshll.u32 %v1708_v23, 16  ;;  %v5060_v29 = vld [vmem:[%s6142_s2 + $0xa0] sm:$0xff]   ;;  %v5061_v28 = vld [vmem:[%s6142_s2 + $0xc8] sm:$0xff]  }
 0x195   : > { %v4052_v13 = vcombine.low %v1708_v23, %v1709_v43  ;;  %v1801_v3 = vrot.slane %v1800_v47, 4  ;;  %4809 = vmatpush3.bf16.msra.mxu0 %v5051_v41  ;;  %v1805_v46 = vrot.slane %v1803_v0, 5  ;;  %v1815_v14 = vrot.slane %v1814_v22, 4  ;;  %v5064_v39 = vld [vmem:[%s6142_s2 + $0x90] sm:$0xff]   ;;  %v5066_v57 = vld [vmem:[%s6142_s2 + $0x178] sm:$0xff]   ;;  %v5067_v36 = vld [vmem:[%s6142_s2 + $0x88] sm:$0xff]  }
 0x196   : > { %v1792_v42 = vsel %vm5685_vm8, %v1787_v60, %v1791_v27  ;;  %v1819_v16 = vrot.slane %v1817_v6, 5  ;;  %v1824_v17 = vrot.slane %v1822_v63, 4  ;;  %v1827_v24 = vrot.slane %v1825_v19, 5  ;;  %4810 = vmatprep.subr.bf16.mxu0 %v5055_v2  ;;  %v5063_v60 = vld [vmem:[%s6142_s2 + $0xc0] sm:$0xff]   ;;  %v5068_v47 = vld [vmem:[#allocation2 + $0x28] ss:$8 sps:$4 sm:$0xff]  }
 0x197   : > { %4777 = vmatmul.mubr.bf16.gmra.mxu0 %v4052_v13  ;;  %v4038_v10 = vcombine.low %v1778_v62, %v1792_v42  ;;  %v1831_v21 = vshll.u32 %v5757_v18, 16  ;;  %v1806_v25 = vsel %vm5685_vm8, %v1801_v3, %v1805_v46  ;;  %v4061_v26 = vrot.slane %v2132_v8, 9  ;;  %v5065_v44 = vld [vmem:[#allocation2 + $0x18] ss:$8 sps:$4 sm:$0xff]   ;;  %v2134_v62 = vld [vmem:[#allocation2 + $0x10] sm:$0xe] }
 0x198   : > { %4820 = vmatprep.mubr.bf16.mxu0 %v5054_v11  ;;  %v1820_v34 = vsel %vm5685_vm8, %v1815_v14, %v1819_v16  ;;  %v2161_v41 = vrot.slane %v5654_v4, 5  ;;  %v1828_v31 = vor.u32 %v1827_v24, %v1824_v17  ;;  %v1843_v40 = vrot.slane %v1842_v35, 4  ;;  %v5059_v4 = vld [vmem:[%s6142_s2 + $0xd0] sm:$0xff]   ;;  %v2135_v6 = vld [vmem:[#allocation2 + $0x18] sm:$0xe]  ;;  %v5070_v11 = vld [vmem:[%s6142_s2 + $0x80] sm:$0xff]  }
 0x199   : > { %4749 = vmatmul.mubr.bf16.vlgmr.msra.gmra.mxu1 %v4038_v10  ;;  %v4039_v43 = vcombine.low %v1806_v25, %v1820_v34  ;;  %v4062_v54 = vrot.slane %v2133_v15, 9  ;;  %4811 = vmatpush3.bf16.msra.mxu0 %v5055_v2  ;;  %v2165_v20 = vrot.slane %v5710_v1, 5  ;;  %v1833_v50 = vrot.slane %v1831_v21, 5  ;;  %v2517_v2 = vld [vmem:[#allocation2 + $0x10] sm:$0xf] }
 0x19a   : > { %4781 = vmatpush3.bf16.msra.mxu1 %v6157_v56  ;;  %v1829_v49 = vrot.slane %v1828_v31, 4  ;;  %v1847_v52 = vrot.slane %v1845_v7, 5  ;;  %4812 = vmatprep.subr.bf16.mxu0 %v5057_v32  ;;  %v2162_v12 = vsel %vm5784_vm11, %v4061_v26, %v2161_v41  ;;  %v5069_v0 = vld [vmem:[%s6142_s2 + $0x170] sm:$0xff]   ;;  %v5822_v27 = vld [vmem:[#allocation2 + $0xc] sm:$0x1]  ;;  %v4063_v7 = vrot.slane %v2134_v62, 9 }
 0x19b   : > { %4782 = vmatprep.subr.bf16.mxu1 %v5056_v48  ;;  %4752 = vmatprep.mubr.bf16.mxu1 %v4039_v43  ;;  %v2166_v51 = vsel %vm5784_vm11, %v4062_v54, %v2165_v20  ;;  %v5820_v8 = vld [vmem:[#allocation2 + $0x14] sm:$0x1]  ;;  %v2798_v23 = vld [vmem:[#allocation2 + $0x10] sm:$0xe]  ;;  %v2797_v22 = vld [vmem:[#allocation2 + $0x8] sm:$0xe] }
 0x19c   : > { %v1834_v1 = vsel %vm5685_vm8, %v1829_v49, %v1833_v50  ;;  %v1848_v59 = vsel %vm5685_vm8, %v1843_v40, %v1847_v52  ;;  %v4085_v53 = vcombine.low %v2162_v12, %v2166_v51  ;;  %v2515_v35 = vld [vmem:[#allocation2 + $0x8] sm:$0xf]  ;;  %v2169_v15 = vrot.slane %v5716_v30, 5  ;;  %v2136_v10 = vld [vmem:[#allocation2 + $0x20] sm:$0xe]  ;;  %v5075_v51 = vld [vmem:[%s6142_s2 + $0x130] sm:$0xff]  }
 0x19d   : > { %4813 = vmatpush3.bf16.msra.mxu0 %v5057_v32  ;;  %v4040_v33 = vcombine.low %v1834_v1, %v1848_v59  ;;  %v2546_v63 = vshrl.u32 %v2517_v2, 16  ;;  %v2549_v19 = vshll.u32 %v2517_v2, 16  ;;  %v4154_v13 = vrot.slane %v2798_v23, 9  ;;  %v2137_v42 = vld [vmem:[#allocation2 + $0x28] sm:$0xe] }
 0x19e   : > { %4783 = vmatpush3.bf16.msra.mxu1 %v5056_v48  ;;  %4814 = vmatprep.subr.bf16.mxu0 %v5059_v4  ;;  %v2827_v3 = vrot.slane %v5820_v8, 5  ;;  %v2532_v46 = vshrl.u32 %v2515_v35, 16  ;;  %v2535_v14 = vshll.u32 %v2515_v35, 16  ;;  %v4064_v16 = vrot.slane %v2135_v6, 9  ;;  %v5072_v48 = vld [vmem:[%s6142_s2 + $0x168] sm:$0xff]  }
 0x19f   : > { %4784 = vmatprep.subr.bf16.mxu1 %v5058_v38  ;;  %v2173_v30 = vrot.slane %v5731_v37, 5  ;;  %v4153_v17 = vrot.slane %v2797_v22, 9  ;;  %v2823_v24 = vrot.slane %v5822_v27, 5  ;;  %v4066_v21 = vrot.slane %v2137_v42, 9  ;;  %v5073_v37 = vld [vmem:[%s6142_s2 + $0x138] sm:$0xff]   ;;  %v5078_v22 = vld [vmem:[%s6142_s2 + $0x150] sm:$0xff]  }
 0x1a0   : > { %v2181_v25 = vrot.slane %v5739_v61, 5  ;;  %v2548_v34 = vrot.slane %v2546_v63, 4  ;;  %v2551_v32 = vrot.slane %v2549_v19, 5  ;;  %v2170_v26 = vsel %vm5784_vm11, %v4063_v7, %v2169_v15  ;;  %v2138_v40 = vld [vmem:[#allocation2 + $0x30] sm:$0xe]  ;;  %v5079_v19 = vld [vmem:[%s6142_s2 + $0x120] sm:$0xff]  }
 0x1a1   : > { %4753 = vmatmul.mubr.bf16.gmra.mxu1 %v4040_v33  ;;  %4815 = vmatpush3.bf16.msra.mxu0 %v5059_v4  ;;  %v2828_v41 = vsel %vm5784_vm11, %v4154_v13, %v2827_v3  ;;  %v4065_v43 = vrot.slane %v2136_v10, 9  ;;  %v2177_v31 = vrot.slane %v5735_v45, 5  ;;  %v2534_v54 = vrot.slane %v2532_v46, 4  ;;  %v5071_v56 = vld [vmem:[#allocation2 + $0x38] ss:$8 sps:$4 sm:$0xff]  }
 0x1a2   : > { %4785 = vmatpush3.bf16.msra.mxu1 %v5058_v38  ;;  %4796 = vmatprep.mubr.bf16.mxu1 %v4085_v53  ;;  %v2537_v61 = vrot.slane %v2535_v14, 5  ;;  %v2824_v20 = vsel %vm5784_vm11, %v4153_v17, %v2823_v24  ;;  %v2174_v38 = vsel %vm5784_vm11, %v4064_v16, %v2173_v30  ;;  %v2182_v50 = vsel %vm5784_vm11, %v4066_v21, %v2181_v25  ;;  %v5074_v45 = vld [vmem:[%s6142_s2 + $0x160] sm:$0xff]   ;;  %v2139_v1 = vld [vmem:[#allocation2 + $0x38] sm:$0xe]  ;;  %v5880_v15 = vld [vmem:[#allocation2 + $0x2c] sm:$0x1] }
 0x1a3   : > { %4786 = vmatprep.subr.bf16.mxu1 %v5060_v29  ;;  %4816 = vmatprep.subr.bf16.mxu0 %v5061_v28  ;;  %v4177_v49 = vcombine.low %v2824_v20, %v2828_v41  ;;  %v2552_v52 = vor.u32 %v2551_v32, %v2548_v34  ;;  %v4086_v4 = vcombine.low %v2170_v26, %v2174_v38  ;;  %v4067_v59 = vrot.slane %v2138_v40, 9  ;;  %v2800_v6 = vld [vmem:[#allocation2 + $0x20] sm:$0xe]  ;;  %v5080_v14 = vld [vmem:[%s6142_s2 + $0x148] sm:$0xff]   ;;  %v3178_v16 = vld [vmem:[#allocation2 + $0x10] sm:$0xf] }
 0x1a4   : > { %v2178_v12 = vsel %vm5784_vm11, %v4065_v43, %v2177_v31  ;;  %v2185_v33 = vrot.slane %v5757_v18, 5  ;;  %v2555_v53 = vshll.u32 %v5820_v8, 16  ;;  %v5077_v18 = vld [vmem:[%s6142_s2 + $0x128] sm:$0xff]   ;;  %v4156_v3 = vrot.slane %v2800_v6, 9  ;;  %v5892_v30 = vld [vmem:[#allocation2 + $0x34] sm:$0x1] }
 0x1a5   : > { %4817 = vmatpush3.bf16.msra.mxu0 %v5061_v28  ;;  %v4087_v28 = vcombine.low %v2178_v12, %v2182_v50  ;;  %v2802_v17 = vld [vmem:[#allocation2 + $0x30] sm:$0xe]  ;;  %v2521_v24 = vld [vmem:[#allocation2 + $0x20] sm:$0xf]  ;;  %v3180_v21 = vld [vmem:[#allocation2 + $0x18] sm:$0xf] }
 0x1a6   : > { %4787 = vmatpush3.bf16.msra.mxu1 %v5060_v29  ;;  %4818 = vmatprep.subr.bf16.mxu0 %v5063_v60  ;;  %v2538_v29 = vor.u32 %v2537_v61, %v2534_v54  ;;  %v2186_v62 = vsel %vm5784_vm11, %v4067_v59, %v2185_v33  ;;  %v2525_v25 = vld [vmem:[#allocation2 + $0x30] sm:$0xf]  ;;  %v5081_v34 = vld [vmem:[%s6142_s2 + $0x118] sm:$0xff]   ;;  %v5082_v32 = vld [vmem:[%s6142_s2 + $0x140] sm:$0xff]   ;;  %v3195_v43 = vshrl.u32 %v3178_v16, 16  ;;  %v3198_v31 = vshll.u32 %v3178_v16, 16 }
 0x1a7   : > { %4788 = vmatprep.subr.bf16.mxu1 %v5062_v55  ;;  %v2519_v41 = vld [vmem:[#allocation2 + $0x18] sm:$0xf]  ;;  %v4158_v40 = vrot.slane %v2802_v17, 9  ;;  %v2843_v54 = vrot.slane %v5892_v30, 5  ;;  %v2574_v61 = vshrl.u32 %v2521_v24, 16  ;;  %v3212_v50 = vshll.u32 %v3180_v21, 16 }
 0x1a8   : > { %v2539_v2 = vrot.slane %v2538_v29, 4  ;;  %v2523_v20 = vld [vmem:[#allocation2 + $0x28] sm:$0xf]  ;;  %v5910_v38 = vld [vmem:[#allocation2 + $0x38] sm:$0xe]  ;;  %v2563_v33 = vshll.u32 %v2519_v41, 16 }
 0x1a9   : > { %4819 = vmatpush3.bf16.msra.mxu0 %v5063_v60  ;;  %v4068_v60 = vrot.slane %v2139_v1, 9  ;;  %v5919_v12 = vld [vmem:[#allocation2 + $0x3c] sm:$0x1]  ;;  %v2804_v29 = vld [vmem:[#allocation2 + $0x40] sm:$0xe] }
 0x1aa   : > { %4789 = vmatpush3.bf16.msra.mxu1 %v5062_v55  ;;  %4852 = vmatprep.subr.bf16.mxu0 %v5066_v57  ;;  %v5076_v55 = vld [vmem:[%s6142_s2 + $0x158] sm:$0xff]  }
 0x1ab   : > { %4790 = vmatprep.subr.bf16.mxu1 %v5064_v39  ;;  %v5936_v17 = vld [vmem:[#allocation2 + $0x1c] sm:$0x1] }
 0x1ac   : > { %4821 = vmatmul.mubr.bf16.vlgmr.msra.gmra.mxu0 %v5065_v44  ;;  %v5867_v44 = vld [vmem:[#allocation2 + $0x1c] sm:$0x1] }
 0x1ad   : > { %4824 = vmatprep.mubr.bf16.mxu0 %v5068_v47  ;;  %4853 = vmatpush3.bf16.msra.mxu0 %v5066_v57  ;;  %v2541_v57 = vshll.u32 %v5822_v27, 16  ;;  %v2557_v47 = vrot.slane %v2555_v53, 5  ;;  %v2831_v13 = vrot.slane %v5867_v44, 5  ;;  %v3197_v53 = vrot.slane %v3195_v43, 4 }
 0x1ae   : > { %4791 = vmatpush3.bf16.msra.mxu1 %v5064_v39  ;;  %4854 = vmatprep.subr.bf16.mxu0 %v5069_v0  ;;  %v2189_v39 = vrot.slane %v5737_v5, 5  ;;  %v2799_v5 = vld [vmem:[#allocation2 + $0x18] sm:$0xe] }
 0x1af   : > { %4792 = vmatprep.subr.bf16.mxu1 %v5067_v36  ;;  %v2543_v23 = vrot.slane %v2541_v57, 5  ;;  %v4155_v7 = vrot.slane %v2799_v5, 9  ;;  %v2844_v57 = vsel %vm5784_vm11, %v4158_v40, %v2843_v54  ;;  %v3214_v5 = vrot.slane %v3212_v50, 5  ;;  %v5088_v50 = vld [vmem:[%s6142_s2 + $0x1e8] sm:$0xff]  }
 0x1b0   : > { %v2190_v8 = vsel %vm5784_vm11, %v4068_v60, %v2189_v39  ;;  %v2591_v60 = vshll.u32 %v2523_v20, 16  ;;  %v5084_v39 = vld [vmem:[%s6142_s2 + $0x1f8] sm:$0xff]   ;;  %v3218_v54 = vshll.u32 %v5936_v17, 16 }
 0x1b1   : > { %4855 = vmatpush3.bf16.msra.mxu0 %v5069_v0  ;;  %v5871_v0 = vld [vmem:[#allocation2 + $0x24] sm:$0x1]  ;;  %v4088_v35 = vcombine.low %v2186_v62, %v2190_v8  ;;  %v2544_v63 = vsel %vm5685_vm8, %v2539_v2, %v2543_v23  ;;  %v5903_v26 = vsel %vm5784_vm11, %v4155_v7, %v2831_v13  ;;  %v2576_v62 = vrot.slane %v2574_v61, 4  ;;  %v2529_v23 = vld [vmem:[#allocation2 + $0x40] sm:$0xf] }
 0x1b2   : > { %4793 = vmatpush3.bf16.msra.mxu1 %v5067_v36  ;;  %4856 = vmatprep.subr.bf16.mxu0 %v5072_v48  ;;  %v2553_v36 = vrot.slane %v2552_v52, 4  ;;  %v2835_v42 = vrot.slane %v5871_v0, 5  ;;  %v2605_v52 = vshll.u32 %v2525_v25, 16  ;;  %v2565_v7 = vrot.slane %v2563_v33, 5 }
 0x1b3   : > { %4794 = vmatprep.subr.bf16.mxu1 %v5070_v11  ;;  %v2611_v61 = vshll.u32 %v5892_v30, 16 }
 0x1b4   : > { %4825 = vmatmul.mubr.bf16.gmra.mxu0 %v5071_v56  ;;  %v2558_v27 = vsel %vm5685_vm8, %v2553_v36, %v2557_v47  ;;  %v2577_v56 = vshll.u32 %v2521_v24, 16  ;;  %v5926_v36 = vld [vmem:[#allocation2 + $0x44] sm:$0x1]  ;;  %v2607_v8 = vrot.slane %v2605_v52, 5  ;;  %v2630_v24 = vshrl.u32 %v2529_v23, 16 }
 0x1b5   : > { %4868 = vmatprep.mubr.bf16.mxu0 %v4177_v49  ;;  %4857 = vmatpush3.bf16.msra.mxu0 %v5072_v48  ;;  %v4141_v46 = vcombine.low %v2544_v63, %v2558_v27  ;;  %v2839_v48 = vrot.slane %v5880_v15, 5  ;;  %v3209_v49 = vshrl.u32 %v3180_v21, 16  ;;  %v2847_v27 = vrot.slane %v5919_v12, 5  ;;  %v5930_v63 = vld [vmem:[#allocation2 + $0x14] sm:$0x1] }
 0x1b6   : > { %4795 = vmatpush3.bf16.msra.mxu1 %v5070_v11  ;;  %4858 = vmatprep.subr.bf16.mxu0 %v5074_v45  ;;  %v2801_v11 = vld [vmem:[#allocation2 + $0x28] sm:$0xe]  ;;  %v2579_v2 = vrot.slane %v2577_v56, 5  ;;  %v2569_v21 = vshll.u32 %v5867_v44, 16 }
 0x1b7   : > { %4828 = vmatprep.subr.bf16.mxu1 %v5073_v37  ;;  %v4157_v10 = vrot.slane %v2801_v11, 9  ;;  %v3211_v47 = vrot.slane %v3209_v49, 4  ;;  %v2593_v11 = vrot.slane %v2591_v60, 5  ;;  %v2613_v60 = vrot.slane %v2611_v61, 5 }
 0x1b8   : > { %v2580_v16 = vor.u32 %v2579_v2, %v2576_v62 }
 0x1b9   : > { %4797 = vmatmul.mubr.bf16.vlgmr.msra.gmra.mxu1 %v4086_v4  ;;  %4859 = vmatpush3.bf16.msra.mxu0 %v5074_v45  ;;  %v2602_v45 = vshrl.u32 %v2525_v25, 16  ;;  %v5083_v4 = vld [vmem:[%s6142_s2 + $0x110] sm:$0xff]   ;;  %v2840_v59 = vsel %vm5784_vm11, %v4157_v10, %v2839_v48  ;;  %v2633_v10 = vshll.u32 %v2529_v23, 16  ;;  %v3204_v25 = vshll.u32 %v5930_v63, 16 }
 0x1ba   : > { %4800 = vmatprep.mubr.bf16.mxu1 %v4087_v28  ;;  %4829 = vmatpush3.bf16.msra.mxu1 %v5073_v37  ;;  %v5907_v37 = vsel %vm5784_vm11, %v4156_v3, %v2835_v42  ;;  %v3200_v28 = vrot.slane %v3198_v31, 5  ;;  %v4179_v13 = vcombine.low %v2840_v59, %v2844_v57  ;;  %v5086_v48 = vld [vmem:[%s6142_s2 + $0x1f0] sm:$0xff]   ;;  %v5087_v31 = vld [vmem:[%s6142_s2 + $0x100] sm:$0xff]  }
 0x1bb   : > { %4830 = vmatprep.subr.bf16.mxu1 %v5075_v51  ;;  %4860 = vmatprep.subr.bf16.mxu0 %v5076_v55  ;;  %v4178_v1 = vcombine.low %v5903_v26, %v5907_v37  ;;  %v2604_v6 = vrot.slane %v2602_v45, 4  ;;  %v2583_v37 = vshll.u32 %v5871_v0, 16  ;;  %v2581_v0 = vrot.slane %v2580_v16, 4 }
 0x1bc   : > { %v3201_v3 = vor.u32 %v3200_v28, %v3197_v53  ;;  %v2635_v49 = vrot.slane %v2633_v10, 5  ;;  %v3206_v45 = vrot.slane %v3204_v25, 5  ;;  %v3220_v28 = vrot.slane %v3218_v54, 5 }
 0x1bd   : > { %4861 = vmatpush3.bf16.msra.mxu0 %v5076_v55  ;;  %v2588_v55 = vshrl.u32 %v2523_v20, 16  ;;  %v2608_v26 = vor.u32 %v2607_v8, %v2604_v6  ;;  %v2632_v20 = vrot.slane %v2630_v24, 4  ;;  %v2585_v59 = vrot.slane %v2583_v37, 5 }
 0x1be   : > { %4831 = vmatpush3.bf16.msra.mxu1 %v5075_v51  ;;  %4862 = vmatprep.subr.bf16.mxu0 %v5078_v22  ;;  %v2560_v51 = vshrl.u32 %v2519_v41, 16  ;;  %v3202_v40 = vrot.slane %v3201_v3, 4  ;;  %v2625_v3 = vshll.u32 %v5919_v12, 16  ;;  %v5093_v12 = vld [vmem:[%s6142_s2 + $0x1a8] sm:$0xff]  }
 0x1bf   : > { %4832 = vmatprep.subr.bf16.mxu1 %v5077_v18  ;;  %v2590_v42 = vrot.slane %v2588_v55, 4  ;;  %v2586_v57 = vsel %vm5685_vm8, %v2581_v0, %v2585_v59  ;;  %v2636_v62 = vor.u32 %v2635_v49, %v2632_v20  ;;  %v5096_v0 = vld [vmem:[%s6142_s2 + $0x1a0] sm:$0xff]   ;;  %v6001_v59 = vld [vmem:[#allocation2 + $0x2c] sm:$0x1] }
 0x1c0   : > { %v3207_v53 = vsel %vm5685_vm8, %v3202_v40, %v3206_v45  ;;  %v3192_v40 = vld [vmem:[#allocation2 + $0x48] sm:$0xf]  ;;  %v5094_v45 = vld [vmem:[#allocation2 + $0x10] ss:$8 sps:$4 sm:$0xff]  }
 0x1c1   : > { %4801 = vmatmul.mubr.bf16.gmra.mxu1 %v4088_v35  ;;  %4863 = vmatpush3.bf16.msra.mxu0 %v5078_v22  ;;  %v4160_v22 = vrot.slane %v2804_v29, 9  ;;  %v2562_v35 = vrot.slane %v2560_v51, 4  ;;  %v2594_v44 = vor.u32 %v2593_v11, %v2590_v42  ;;  %v5089_v29 = vld [vmem:[%s6142_s2 + $0x1b8] sm:$0xff]   ;;  %v2637_v42 = vrot.slane %v2636_v62, 4  ;;  %v3186_v11 = vld [vmem:[#allocation2 + $0x30] sm:$0xf] }
 0x1c2   : > { %4833 = vmatpush3.bf16.msra.mxu1 %v5077_v18  ;;  %4844 = vmatprep.mubr.bf16.mxu1 %v4141_v46  ;;  %v4159_v18 = vrot.slane %v5910_v38, 9  ;;  %v2527_v46 = vld [vmem:[#allocation2 + $0x38] sm:$0xf]  ;;  %v5090_v38 = vld [vmem:[%s6142_s2 + $0x1e0] sm:$0xff]   ;;  %v3254_v25 = vshll.u32 %v3186_v11, 16 }
 0x1c3   : > { %4834 = vmatprep.subr.bf16.mxu1 %v5079_v19  ;;  %4864 = vmatprep.subr.bf16.mxu0 %v5080_v14  ;;  %v2616_v41 = vshrl.u32 %v2527_v46, 16  ;;  %v2619_v43 = vshll.u32 %v2527_v46, 16  ;;  %v2595_v55 = vrot.slane %v2594_v44, 4  ;;  %v3182_v46 = vld [vmem:[#allocation2 + $0x20] sm:$0xf] }
 0x1c4   : > { %v3226_v37 = vshll.u32 %v3182_v46, 16  ;;  %v3256_v49 = vrot.slane %v3254_v25, 5 }
 0x1c5   : > { %4865 = vmatpush3.bf16.msra.mxu0 %v5080_v14  ;;  %v2851_v14 = vrot.slane %v5926_v36, 5  ;;  %v2618_v51 = vrot.slane %v2616_v41, 4  ;;  %v2621_v33 = vrot.slane %v2619_v43, 5  ;;  %v5095_v41 = vld [vmem:[%s6142_s2 + $0x1d0] sm:$0xff]  }
 0x1c6   : > { %4835 = vmatpush3.bf16.msra.mxu1 %v5079_v19  ;;  %4866 = vmatprep.subr.bf16.mxu0 %v5082_v32  ;;  %v5085_v19 = vld [vmem:[%s6142_s2 + $0x108] sm:$0xff]  }
 0x1c7   : > { %4836 = vmatprep.subr.bf16.mxu1 %v5081_v34  ;;  %v2852_v56 = vsel %vm5784_vm11, %v4160_v22, %v2851_v14  ;;  %v2622_v23 = vor.u32 %v2621_v33, %v2618_v51 }
 0x1c9   : > { %4867 = vmatpush3.bf16.msra.mxu0 %v5082_v32  ;;  %v2566_v32 = vor.u32 %v2565_v7, %v2562_v35  ;;  %v5091_v7 = vld [vmem:[%s6142_s2 + $0x1b0] sm:$0xff]   ;;  %v2623_v14 = vrot.slane %v2622_v23, 4 }
 0x1ca   : > { %4837 = vmatpush3.bf16.msra.mxu1 %v5081_v34  ;;  %4900 = vmatprep.subr.bf16.mxu0 %v5084_v39  ;;  %v3215_v34 = vor.u32 %v3214_v5, %v3211_v47 }
 0x1cb   : > { %4838 = vmatprep.subr.bf16.mxu1 %v5083_v4  ;;  %v2567_v30 = vrot.slane %v2566_v32, 4  ;;  %v3223_v32 = vshrl.u32 %v3182_v46, 16  ;;  %v6022_v46 = vld [vmem:[#allocation2 + $0x44] sm:$0x1] }
 0x1cc   : > { %4869 = vmatmul.mubr.bf16.vlgmr.msra.gmra.mxu0 %v4178_v1  ;;  %v3216_v52 = vrot.slane %v3215_v34, 4  ;;  %v2609_v1 = vrot.slane %v2608_v26, 4  ;;  %v2627_v34 = vrot.slane %v2625_v3, 5 }
 0x1cd   : > { %4872 = vmatprep.mubr.bf16.mxu0 %v4179_v13  ;;  %4901 = vmatpush3.bf16.msra.mxu0 %v5084_v39  ;;  %v2571_v39 = vrot.slane %v2569_v21, 5  ;;  %v3251_v21 = vshrl.u32 %v3186_v11, 16 }
 0x1ce   : > { %4839 = vmatpush3.bf16.msra.mxu1 %v5083_v4  ;;  %4902 = vmatprep.subr.bf16.mxu0 %v5086_v48  ;;  %v2597_v4 = vshll.u32 %v5880_v15, 16  ;;  %v2848_v15 = vsel %vm5784_vm11, %v4159_v18, %v2847_v27  ;;  %v3221_v47 = vsel %vm5685_vm8, %v3216_v52, %v3220_v28  ;;  %v2614_v6 = vsel %vm5685_vm8, %v2609_v1, %v2613_v60  ;;  %v6003_v28 = vld [vmem:[#allocation2 + $0x34] sm:$0x1] }
 0x1cf   : > { %4840 = vmatprep.subr.bf16.mxu1 %v5085_v19  ;;  %v4180_v2 = vcombine.low %v2848_v15, %v2852_v56  ;;  %v2572_v18 = vsel %vm5685_vm8, %v2567_v30, %v2571_v39  ;;  %v4233_v8 = vcombine.low %v3207_v53, %v3221_v47  ;;  %v2639_v27 = vshll.u32 %v5926_v36, 16  ;;  %v5092_v36 = vld [vmem:[%s6142_s2 + $0x1d8] sm:$0xff]   ;;  %v5097_v30 = vld [vmem:[%s6142_s2 + $0x1c8] sm:$0xff]   ;;  %v6008_v39 = vld [vmem:[#allocation2 + $0x24] sm:$0x1] }
 0x1d0   : > { %v2599_v5 = vrot.slane %v2597_v4, 5  ;;  %v4142_v22 = vcombine.low %v2572_v18, %v2586_v57  ;;  %v2628_v54 = vsel %vm5685_vm8, %v2623_v14, %v2627_v34  ;;  %v3253_v20 = vrot.slane %v3251_v21, 4  ;;  %v5098_v15 = vld [vmem:[%s6142_s2 + $0x198] sm:$0xff]   ;;  %v6024_v14 = vld [vmem:[#allocation2 + $0x4c] sm:$0x1] }
 0x1d1   : > { %4903 = vmatpush3.bf16.msra.mxu0 %v5086_v48  ;;  %v2641_v16 = vrot.slane %v2639_v27, 5  ;;  %v3188_v48 = vld [vmem:[#allocation2 + $0x38] sm:$0xf]  ;;  %v3225_v52 = vrot.slane %v3223_v32, 4  ;;  %v3228_v4 = vrot.slane %v3226_v37, 5  ;;  %v3293_v1 = vshrl.u32 %v3192_v40, 16 }
 0x1d2   : > { %4841 = vmatpush3.bf16.msra.mxu1 %v5085_v19  ;;  %4904 = vmatprep.subr.bf16.mxu0 %v5088_v50  ;;  %v2600_v35 = vsel %vm5685_vm8, %v2595_v55, %v2599_v5  ;;  %v3184_v19 = vld [vmem:[#allocation2 + $0x28] sm:$0xf]  ;;  %v3265_v43 = vshrl.u32 %v3188_v48, 16  ;;  %v3257_v57 = vor.u32 %v3256_v49, %v3253_v20  ;;  %v6011_v47 = vld [vmem:[#allocation2 + $0x3c] sm:$0x1]  ;;  %v5099_v5 = vld [vmem:[%s6142_s2 + $0x1c0] sm:$0xff]  }
 0x1d3   : > { %4842 = vmatprep.subr.bf16.mxu1 %v5087_v31  ;;  %v4143_v13 = vcombine.low %v2600_v35, %v2614_v6  ;;  %v3237_v24 = vshrl.u32 %v3184_v19, 16  ;;  %v3240_v10 = vshll.u32 %v3184_v19, 16  ;;  %v2642_v26 = vsel %vm5685_vm8, %v2637_v42, %v2641_v16  ;;  %v5101_v21 = vld [vmem:[%s6142_s2 + $0x188] sm:$0xff]   ;;  %v5104_v20 = vld [vmem:[%s6142_s2 + $0x238] sm:$0xff]  }
 0x1d4   : > { %4873 = vmatmul.mubr.bf16.gmra.mxu0 %v4180_v2  ;;  %v4144_v56 = vcombine.low %v2628_v54, %v2642_v26  ;;  %v3267_v51 = vrot.slane %v3265_v43, 4  ;;  %v3229_v62 = vor.u32 %v3228_v4, %v3225_v52  ;;  %v3246_v2 = vshll.u32 %v6001_v59, 16  ;;  %v5106_v52 = vld [vmem:[%s6142_s2 + $0x230] sm:$0xff]  }
 0x1d5   : > { %4905 = vmatpush3.bf16.msra.mxu0 %v5088_v50  ;;  %4916 = vmatprep.mubr.bf16.mxu0 %v4233_v8  ;;  %v3239_v44 = vrot.slane %v3237_v24, 4  ;;  %v3242_v61 = vrot.slane %v3240_v10, 5  ;;  %v3190_v50 = vld [vmem:[#allocation2 + $0x40] sm:$0xf]  ;;  %v3260_v6 = vshll.u32 %v6003_v28, 16  ;;  %v3295_v18 = vrot.slane %v3293_v1, 4 }
 0x1d6   : > { %4843 = vmatpush3.bf16.msra.mxu1 %v5087_v31  ;;  %4906 = vmatprep.subr.bf16.mxu0 %v5090_v38  ;;  %v3268_v31 = vshll.u32 %v3188_v48, 16  ;;  %v3279_v55 = vshrl.u32 %v3190_v50, 16  ;;  %v3282_v60 = vshll.u32 %v3190_v50, 16  ;;  %v3232_v23 = vshll.u32 %v6008_v39, 16  ;;  %v3460_v50 = vld [vmem:[#allocation2 + $0x10] sm:$0xe] }
 0x1d7   : > { %4876 = vmatprep.subr.bf16.mxu1 %v5089_v29  ;;  %v3243_v53 = vor.u32 %v3242_v61, %v3239_v44  ;;  %v3258_v19 = vrot.slane %v3257_v57, 4  ;;  %v3230_v3 = vrot.slane %v3229_v62, 4  ;;  %v3248_v42 = vrot.slane %v3246_v2, 5  ;;  %v5102_v44 = vld [vmem:[%s6142_s2 + $0x180] sm:$0xff]   ;;  %v5105_v4 = vld [vmem:[#allocation2 + $0x30] ss:$8 sps:$4 sm:$0xff]  }
 0x1d8   : > { %v3270_v33 = vrot.slane %v3268_v31, 5  ;;  %v3284_v35 = vrot.slane %v3282_v60, 5  ;;  %v3262_v11 = vrot.slane %v3260_v6, 5  ;;  %v3234_v24 = vrot.slane %v3232_v23, 5  ;;  %v3461_v1 = vld [vmem:[#allocation2 + $0x18] sm:$0xe] }
 0x1d9   : > { %4845 = vmatmul.mubr.bf16.vlgmr.msra.gmra.mxu1 %v4142_v22  ;;  %4907 = vmatpush3.bf16.msra.mxu0 %v5090_v38  ;;  %v3244_v27 = vrot.slane %v3243_v53, 4  ;;  %v3281_v22 = vrot.slane %v3279_v55, 4  ;;  %v3288_v32 = vshll.u32 %v6022_v46, 16  ;;  %v4245_v9 = vrot.slane %v3460_v50, 9  ;;  %v5107_v55 = vld [vmem:[#allocation2 + $0x40] ss:$8 sps:$4 sm:$0xff]  }
 0x1da   : > { %4848 = vmatprep.mubr.bf16.mxu1 %v4143_v13  ;;  %4877 = vmatpush3.bf16.msra.mxu1 %v5089_v29  ;;  %v3296_v29 = vshll.u32 %v3192_v40, 16  ;;  %v3271_v38 = vor.u32 %v3270_v33, %v3267_v51  ;;  %v3274_v13 = vshll.u32 %v6011_v47, 16  ;;  %v3263_v25 = vsel %vm5685_vm8, %v3258_v19, %v3262_v11  ;;  %v5108_v51 = vld [vmem:[%s6142_s2 + $0x228] sm:$0xff]   ;;  %v5111_v57 = vld [vmem:[%s6142_s2 + $0x210] sm:$0xff]   ;;  %v5113_v6 = vld [vmem:[%s6142_s2 + $0x200] sm:$0xff]  }
 0x1db   : > { %4878 = vmatprep.subr.bf16.mxu1 %v5091_v7  ;;  %4908 = vmatprep.subr.bf16.mxu0 %v5092_v36  ;;  %v3249_v10 = vsel %vm5685_vm8, %v3244_v27, %v3248_v42  ;;  %v3285_v48 = vor.u32 %v3284_v35, %v3281_v22  ;;  %v3235_v26 = vsel %vm5685_vm8, %v3230_v3, %v3234_v24  ;;  %v3290_v61 = vrot.slane %v3288_v32, 5  ;;  %v5112_v62 = vld [vmem:[%s6142_s2 + $0x208] sm:$0xff]   ;;  %v3465_v23 = vld [vmem:[#allocation2 + $0x38] sm:$0xe] }
 0x1dc   : > { %v3298_v8 = vrot.slane %v3296_v29, 5  ;;  %v3276_v34 = vrot.slane %v3274_v13, 5  ;;  %v4234_v37 = vcombine.low %v3235_v26, %v3249_v10  ;;  %v4246_v33 = vrot.slane %v3461_v1, 9  ;;  %v3463_v2 = vld [vmem:[#allocation2 + $0x28] sm:$0xe] }
 0x1dd   : > { %4909 = vmatpush3.bf16.msra.mxu0 %v5092_v36  ;;  %v3272_v36 = vrot.slane %v3271_v38, 4  ;;  %v3286_v31 = vrot.slane %v3285_v48, 4  ;;  %v3490_v29 = vrot.slane %v5936_v17, 5  ;;  %v5110_v17 = vld [vmem:[%s6142_s2 + $0x218] sm:$0xff]   ;;  %v3462_v38 = vld [vmem:[#allocation2 + $0x20] sm:$0xe] }
 0x1de   : > { %4879 = vmatpush3.bf16.msra.mxu1 %v5091_v7  ;;  %4910 = vmatprep.subr.bf16.mxu0 %v5095_v41  ;;  %v5100_v7 = vld [vmem:[%s6142_s2 + $0x190] sm:$0xff]   ;;  %v3299_v16 = vor.u32 %v3298_v8, %v3295_v18  ;;  %v4248_v18 = vrot.slane %v3463_v2, 9  ;;  %v3498_v8 = vrot.slane %v6001_v59, 5  ;;  %v3502_v22 = vrot.slane %v6003_v28, 5  ;;  %v3467_v42 = vld [vmem:[#allocation2 + $0x48] sm:$0xe] }
 0x1df   : > { %4880 = vmatprep.subr.bf16.mxu1 %v5093_v12  ;;  %v3491_v60 = vsel %vm5784_vm11, %v4246_v33, %v3490_v29  ;;  %v4247_v35 = vrot.slane %v3462_v38, 9  ;;  %v4250_v19 = vrot.slane %v3465_v23, 9  ;;  %v3506_v13 = vrot.slane %v6011_v47, 5  ;;  %v3466_v59 = vld [vmem:[#allocation2 + $0x40] sm:$0xe] }
 0x1e0   : > { %v3300_v40 = vrot.slane %v3299_v16, 4  ;;  %v3499_v3 = vsel %vm5784_vm11, %v4248_v18, %v3498_v8  ;;  %v4252_v16 = vrot.slane %v3467_v42, 9  ;;  %v4251_v10 = vrot.slane %v3466_v59, 9 }
 0x1e1   : > { %4849 = vmatmul.mubr.bf16.gmra.mxu1 %v4144_v56  ;;  %4911 = vmatpush3.bf16.msra.mxu0 %v5095_v41  ;;  %v3277_v41 = vsel %vm5685_vm8, %v3272_v36, %v3276_v34  ;;  %v3291_v56 = vsel %vm5685_vm8, %v3286_v31, %v3290_v61  ;;  %v3510_v47 = vrot.slane %v6022_v46, 5  ;;  %v3514_v48 = vrot.slane %v6024_v14, 5 }
 0x1e2   : > { %4881 = vmatpush3.bf16.msra.mxu1 %v5093_v12  ;;  %4892 = vmatprep.mubr.bf16.mxu1 %v5094_v45  ;;  %v3302_v12 = vshll.u32 %v6024_v14, 16  ;;  %v4235_v43 = vcombine.low %v3263_v25, %v3277_v41  ;;  %v5103_v45 = vld [vmem:[#allocation2 + $0x20] ss:$8 sps:$4 sm:$0xff]  }
 0x1e3   : > { %4882 = vmatprep.subr.bf16.mxu1 %v5096_v0  ;;  %4912 = vmatprep.subr.bf16.mxu0 %v5097_v30 }
 0x1e4   : > { %v3304_v54 = vrot.slane %v3302_v12, 5  ;;  %v3511_v12 = vsel %vm5784_vm11, %v4251_v10, %v3510_v47 }
 0x1e5   : > { %4913 = vmatpush3.bf16.msra.mxu0 %v5097_v30  ;;  %v3486_v30 = vrot.slane %v5930_v63, 5  ;;  %v5109_v63 = vld [vmem:[%s6142_s2 + $0x220] sm:$0xff]  }
 0x1e6   : > { %4883 = vmatpush3.bf16.msra.mxu1 %v5096_v0  ;;  %4914 = vmatprep.subr.bf16.mxu0 %v5099_v5  ;;  %v3305_v0 = vsel %vm5685_vm8, %v3300_v40, %v3304_v54 }
 0x1e7   : > { %4884 = vmatprep.subr.bf16.mxu1 %v5098_v15  ;;  %v4236_v49 = vcombine.low %v3291_v56, %v3305_v0  ;;  %v3487_v53 = vsel %vm5784_vm11, %v4245_v9, %v3486_v30 }
 0x1e9   : > { %4915 = vmatpush3.bf16.msra.mxu0 %v5099_v5  ;;  %v3464_v5 = vld [vmem:[#allocation2 + $0x30] sm:$0xe] }
 0x1ea   : > { %4885 = vmatpush3.bf16.msra.mxu1 %v5098_v15  ;;  %v4269_v15 = vcombine.low %v3487_v53, %v3491_v60  ;;  %v4249_v27 = vrot.slane %v3464_v5, 9 }
 0x1eb   : > { %4886 = vmatprep.subr.bf16.mxu1 %v5100_v7 }
 0x1ec   : > { %4917 = vmatmul.mubr.bf16.vlgmr.msra.gmra.mxu0 %v4234_v37  ;;  %v3503_v11 = vsel %vm5784_vm11, %v4249_v27, %v3502_v22 }
 0x1ed   : > { %4920 = vmatprep.mubr.bf16.mxu0 %v4235_v43 }
 0x1ee   : > { %4887 = vmatpush3.bf16.msra.mxu1 %v5100_v7  ;;  %v3494_v7 = vrot.slane %v6008_v39, 5  ;;  %v3507_v39 = vsel %vm5784_vm11, %v4250_v19, %v3506_v13 }
 0x1ef   : > { %4888 = vmatprep.subr.bf16.mxu1 %v5101_v21  ;;  %v4271_v24 = vcombine.low %v3503_v11, %v3507_v39 }
 0x1f0   : > { %v3495_v28 = vsel %vm5784_vm11, %v4247_v35, %v3494_v7 }
 0x1f1   : > { %v4270_v36 = vcombine.low %v3495_v28, %v3499_v3 }
 0x1f2   : > { %4889 = vmatpush3.bf16.msra.mxu1 %v5101_v21  ;;  %v3515_v21 = vsel %vm5784_vm11, %v4252_v16, %v3514_v48 }
 0x1f3   : > { %4890 = vmatprep.subr.bf16.mxu1 %v5102_v44  ;;  %v4272_v25 = vcombine.low %v3511_v12, %v3515_v21 }
 0x1f4   : > { %4921 = vmatmul.mubr.bf16.gmra.mxu0 %v4236_v49 }
 0x1f6   : > { %4891 = vmatpush3.bf16.msra.mxu1 %v5102_v44 }
 0x1f7   : > { %4924 = vmatprep.subr.bf16.mxu1 %v5104_v20 }
 0x1f9   : > { %4893 = vmatmul.mubr.bf16.vlgmr.msra.gmra.mxu1 %v5103_v45 }
 0x1fa   : > { %4896 = vmatprep.mubr.bf16.mxu1 %v5105_v4  ;;  %4925 = vmatpush3.bf16.msra.mxu1 %v5104_v20 }
 0x1fb   : > { %4926 = vmatprep.subr.bf16.mxu1 %v5106_v52 }
 0x1fe   : > { %4927 = vmatpush3.bf16.msra.mxu1 %v5106_v52 }
 0x1ff   : > { %4928 = vmatprep.subr.bf16.mxu1 %v5108_v51 }
 0x201   : > { %4897 = vmatmul.mubr.bf16.gmra.mxu1 %v5107_v55 }
 0x202   : > { %4929 = vmatpush3.bf16.msra.mxu1 %v5108_v51  ;;  %4940 = vmatprep.mubr.bf16.mxu1 %v4269_v15 }
 0x203   : > { %4930 = vmatprep.subr.bf16.mxu1 %v5109_v63 }
 0x206   : > { %4931 = vmatpush3.bf16.msra.mxu1 %v5109_v63 }
 0x207   : > { %4932 = vmatprep.subr.bf16.mxu1 %v5110_v17 }
 0x20a   : > { %4933 = vmatpush3.bf16.msra.mxu1 %v5110_v17 }
 0x20b   : > { %4934 = vmatprep.subr.bf16.mxu1 %v5111_v57 }
 0x20e   : > { %4935 = vmatpush3.bf16.msra.mxu1 %v5111_v57 }
 0x20f   : > { %4936 = vmatprep.subr.bf16.mxu1 %v5112_v62 }
 0x212   : > { %4937 = vmatpush3.bf16.msra.mxu1 %v5112_v62 }
 0x213   : > { %4938 = vmatprep.subr.bf16.mxu1 %v5113_v6 }
 0x216   : > { %4939 = vmatpush3.bf16.msra.mxu1 %v5113_v6 }
 0x219   : > { %4941 = vmatmul.mubr.bf16.vlgmr.msra.gmra.mxu1 %v4270_v36 }
 0x21a   : > { %4944 = vmatprep.mubr.bf16.mxu1 %v4271_v24 }
 0x221   : > { %4945 = vmatmul.mubr.bf16.gmra.mxu1 %v4272_v25 }
 0x24c   : > { %v4774_v41 = vpop.f32.mrf.mxu0 }
 0x24e   : > { %v2101_v31 = vpop.f32.mrf.mxu0 }
 0x250   : > { %v4775_v40 = vpop.f32.mrf.mxu0 }
 0x252   : > { %v2104_v54 = vpop.f32.mrf.mxu0 }
 0x257   : > { %v4778_v61 = vpop.f32.mrf.mxu0 }
 0x259   : > { %v4750_v34 = vpop.f32.mrf.mxu1  ;;  %v2117_v58 = vpop.f32.mrf.mxu0 }
 0x25a   : > { %v2110_v42 = vadd.f32 %v4774_v41, %v4750_v34 }
 0x25b   : > { %v1964_v26 = vpop.f32.mrf.mxu1  ;;  %v4779_v20 = vpop.f32.mrf.mxu0 }
 0x25c   : > { %v2102_v28 = vadd.f32 %v2101_v31, %v1964_v26 }
 0x25d   : > { %v4751_v32 = vpop.f32.mrf.mxu1  ;;  %v2120_v50 = vpop.f32.mrf.mxu0 }
 0x25e   : > { %v2113_v16 = vadd.f32 %v4775_v40, %v4751_v32 }
 0x25f   : > { %v1967_v37 = vpop.f32.mrf.mxu1 }
 0x260   : > { %v2105_v47 = vadd.f32 %v2104_v54, %v1967_v37 }
 0x261   : > { %v4754_v43 = vpop.f32.mrf.mxu1 }
 0x262   : > { %v2126_v21 = vadd.f32 %v4778_v61, %v4754_v43 }
 0x263   : > { %v1980_v46 = vpop.f32.mrf.mxu1 }
 0x265   : > { %v6094_v14 = vpop.f32.mrf.mxu1 }
 0x266   : > { %v2129_v26 = vadd.f32 %v4779_v20, %v6094_v14 }
 0x267   : > { %v6096_v44 = vpop.f32.mrf.mxu1 }
 0x268   : > { %6160 = vst [vmem:[#allocation5_spill] sm:$0xff] %v6096_v44 }
 0x26c   : > { %v4822_v52 = vpop.f32.mrf.mxu0 }
 0x26e   : > { %v2476_v1 = vpop.f32.mrf.mxu0 }
 0x26f   : > { %v6166_v37 = vld [vmem:[#allocation5_spill] sm:$0xff] }
 0x270   : > { %v4823_v30 = vpop.f32.mrf.mxu0  ;;  %v2121_v54 = vadd.f32 %v2120_v50, %v6166_v37 }
 0x272   : > { %v2479_v33 = vpop.f32.mrf.mxu0 }
 0x274   : > { %v4826_v53 = vpop.f32.mrf.mxu0 }
 0x276   : > { %v2492_v60 = vpop.f32.mrf.mxu0 }
 0x278   : > { %v4827_v15 = vpop.f32.mrf.mxu0 }
 0x279   : > { %v4798_v56 = vpop.f32.mrf.mxu1 }
 0x27a   : > { %v6098_v57 = vpop.f32.mrf.mxu0  ;;  %v2339_v36 = vadd.f32 %v4798_v56, %v2110_v42 }
 0x27b   : > { %v2306_v0 = vpop.f32.mrf.mxu1  ;;  %6161 = vst [vmem:[#allocation3_spill] sm:$0xff] %v6098_v57 }
 0x27c   : > { %v2337_v24 = vadd.f32 %v2306_v0, %v2102_v28  ;;  %v2509_v12 = vadd.f32 %v4822_v52, %v2339_v36  ;;  %v4284_v28 = vld [vmem:[%s5187_s10 + $0x41] sm:$0xff] }
 0x27d   : > { %v4799_v49 = vpop.f32.mrf.mxu1 }
 0x27e   : > { %v2340_v48 = vadd.f32 %v4799_v49, %v2113_v16  ;;  %v2507_v57 = vadd.f32 %v2476_v1, %v2337_v24 }
 0x27f   : > { %v2309_v45 = vpop.f32.mrf.mxu1 }
 0x281   : > { %v4802_v4 = vpop.f32.mrf.mxu1 }
 0x282   : > { %v2343_v44 = vadd.f32 %v4802_v4, %v2126_v21 }
 0x283   : > { %v2322_v9 = vpop.f32.mrf.mxu1 }
 0x284   : > { %v2513_v43 = vadd.f32 %v4826_v53, %v2343_v44 }
 0x285   : > { %v4803_v51 = vpop.f32.mrf.mxu1 }
 0x286   : > { %v2344_v49 = vadd.f32 %v4803_v51, %v2129_v26  ;;  %v6167_v51 = vld [vmem:[#allocation3_spill] sm:$0xff] }
 0x287   : > { %v2325_v29 = vpop.f32.mrf.mxu1 }
 0x28c   : > { %v4870_v2 = vpop.f32.mrf.mxu0 }
 0x28e   : > { %v2968_v6 = vpop.f32.mrf.mxu0 }
 0x290   : > { %v4871_v18 = vpop.f32.mrf.mxu0 }
 0x292   : > { %v2971_v23 = vpop.f32.mrf.mxu0 }
 0x294   : > { %v4874_v22 = vpop.f32.mrf.mxu0 }
 0x296   : > { %v6102_v7 = vpop.f32.mrf.mxu0 }
 0x297   : > { %6163 = vst [vmem:[#allocation6_spill] sm:$0xff] %v6102_v7  ;;  %v2338_v7 = vadd.f32 %v2309_v45, %v2105_v47 }
 0x298   : > { %v6104_v13 = vpop.f32.mrf.mxu0 }
 0x299   : > { %v4846_v55 = vpop.f32.mrf.mxu1  ;;  %6164 = vst [vmem:[#allocation7_spill] sm:$0xff] %v6104_v13  ;;  %v2118_v13 = vadd.f32 %v2117_v58, %v1980_v46  ;;  %v2508_v40 = vadd.f32 %v2479_v33, %v2338_v7  ;;  %v2342_v46 = vadd.f32 %v2325_v29, %v2121_v54  ;;  %v4281_v7 = vld [vmem:[%s5187_s10 + $0x11] sm:$0xff] }
 0x29a   : > { %v6106_v11 = vpop.f32.mrf.mxu0 }
 0x29b   : > { %v2758_v63 = vpop.f32.mrf.mxu1  ;;  %6165 = vst [vmem:[#allocation8_spill] sm:$0xff] %v6106_v11  ;;  %v2510_v11 = vadd.f32 %v4823_v30, %v2340_v48  ;;  %v2341_v31 = vadd.f32 %v2322_v9, %v2118_v13  ;;  %v2512_v53 = vadd.f32 %v6167_v51, %v2342_v46 }
 0x29c   : > { %v2789_v41 = vadd.f32 %v2758_v63, %v2507_v57 }
 0x29d   : > { %v4847_v17 = vpop.f32.mrf.mxu1  ;;  %v2511_v4 = vadd.f32 %v2492_v60, %v2341_v31 }
 0x29e   : > { %v2792_v32 = vadd.f32 %v4847_v17, %v2510_v11  ;;  %v2999_v1 = vadd.f32 %v2968_v6, %v2789_v41 }
 0x29f   : > { %v2761_v62 = vpop.f32.mrf.mxu1 }
 0x2a0   : > { %v2790_v45 = vadd.f32 %v2761_v62, %v2508_v40  ;;  %v3002_v20 = vadd.f32 %v4871_v18, %v2792_v32  ;;  %v6170_v42 = vld [vmem:[#allocation7_spill] sm:$0xff] }
 0x2a1   : > { %v4850_v5 = vpop.f32.mrf.mxu1  ;;  %v4287_v32 = vld [vmem:[%s5187_s10 + $0x71] sm:$0xff] }
 0x2a2   : > { %v2795_v58 = vadd.f32 %v4850_v5, %v2513_v43  ;;  %v3000_v17 = vadd.f32 %v2971_v23, %v2790_v45  ;;  %v4285_v45 = vld [vmem:[%s5187_s10 + $0x51] sm:$0xff] }
 0x2a3   : > { %v2774_v38 = vpop.f32.mrf.mxu1 }
 0x2a4   : > { %v2793_v9 = vadd.f32 %v2774_v38, %v2511_v4  ;;  %v3005_v62 = vadd.f32 %v4874_v22, %v2795_v58 }
 0x2a5   : > { %v4851_v8 = vpop.f32.mrf.mxu1 }
 0x2a7   : > { %v6100_v27 = vpop.f32.mrf.mxu1 }
 0x2a8   : > { %6162 = vst [vmem:[#allocation4_spill] sm:$0xff] %v6100_v27  ;;  %v2791_v27 = vadd.f32 %v4846_v55, %v2509_v12  ;;  %v2514_v55 = vadd.f32 %v4827_v15, %v2344_v49  ;;  %v4282_v12 = vld [vmem:[%s5187_s10 + $0x21] sm:$0xff] }
 0x2aa   : > { %v3001_v0 = vadd.f32 %v4870_v2, %v2791_v27  ;;  %v2796_v44 = vadd.f32 %v4851_v8, %v2514_v55  ;;  %v4283_v2 = vld [vmem:[%s5187_s10 + $0x31] sm:$0xff]  ;;  %v6169_v27 = vld [vmem:[#allocation6_spill] sm:$0xff] }
 0x2ac   : > { %v4918_v39 = vpop.f32.mrf.mxu0  ;;  %v3006_v11 = vadd.f32 %v6170_v42, %v2796_v44 }
 0x2ae   : > { %v3421_v25 = vpop.f32.mrf.mxu0 }
 0x2af   : > { %v6168_v18 = vld [vmem:[#allocation4_spill] sm:$0xff] }
 0x2b0   : > { %v4919_v56 = vpop.f32.mrf.mxu0  ;;  %v2794_v38 = vadd.f32 %v6168_v18, %v2512_v53 }
 0x2b2   : > { %v3424_v30 = vpop.f32.mrf.mxu0 }
 0x2b4   : > { %v4922_v57 = vpop.f32.mrf.mxu0 }
 0x2b9   : > { %v4894_v35 = vpop.f32.mrf.mxu1 }
 0x2ba   : > { %v3172_v52 = vadd.f32 %v4894_v35, %v3001_v0  ;;  %v3003_v35 = vadd.f32 %v6169_v27, %v2793_v9 }
 0x2bb   : > { %v3139_v19 = vpop.f32.mrf.mxu1 }
 0x2bc   : > { %v3170_v14 = vadd.f32 %v3139_v19, %v2999_v1  ;;  %v3454_v50 = vadd.f32 %v4918_v39, %v3172_v52 }
 0x2bd   : > { %v4895_v3 = vpop.f32.mrf.mxu1 }
 0x2be   : > { %v3173_v63 = vadd.f32 %v4895_v3, %v3002_v20  ;;  %v3452_v6 = vadd.f32 %v3421_v25, %v3170_v14  ;;  %v3437_v3 = vpop.f32.mrf.mxu0 }
 0x2bf   : > { %v3142_v59 = vpop.f32.mrf.mxu1 }
 0x2c0   : > { %v3171_v5 = vadd.f32 %v3142_v59, %v3000_v17  ;;  %v3455_v13 = vadd.f32 %v4919_v56, %v3173_v63  ;;  %v4923_v31 = vpop.f32.mrf.mxu0  ;;  %v4286_v63 = vld [vmem:[%s5187_s10 + $0x61] sm:$0xff] }
 0x2c1   : > { %v4898_v10 = vpop.f32.mrf.mxu1 }
 0x2c2   : > { %v3176_v15 = vadd.f32 %v4898_v10, %v3005_v62  ;;  %v3453_v24 = vadd.f32 %v3424_v30, %v3171_v5  ;;  %v6171_v10 = vld [vmem:[#allocation8_spill] sm:$0xff]  ;;  %v3440_v58 = vpop.f32.mrf.mxu0  ;;  %v4288_v30 = vld [vmem:[%s5187_s10 + $0x81] sm:$0xff] }
 0x2c3   : > { %v3155_v34 = vpop.f32.mrf.mxu1  ;;  %v3004_v47 = vadd.f32 %v6171_v10, %v2794_v38 }
 0x2c4   : > { %v3174_v22 = vadd.f32 %v3155_v34, %v3003_v35  ;;  %v3458_v21 = vadd.f32 %v4922_v57, %v3176_v15 }
 0x2c5   : > { %v4899_v61 = vpop.f32.mrf.mxu1 }
 0x2c6   : > { %v3177_v25 = vadd.f32 %v4899_v61, %v3006_v11  ;;  %v3456_v40 = vadd.f32 %v3437_v3, %v3174_v22 }
 0x2c7   : > { %v3158_v33 = vpop.f32.mrf.mxu1 }
 0x2c8   : > { %v3175_v0 = vadd.f32 %v3158_v33, %v3004_v47  ;;  %v3459_v46 = vadd.f32 %v4923_v31, %v3177_v25 }
 0x2ca   : > { %v3457_v55 = vadd.f32 %v3440_v58, %v3175_v0 }
 0x2d9   : > { %v4942_v29 = vpop.f32.mrf.mxu1 }
 0x2da   : > { %v3664_v60 = vadd.f32 %v4942_v29, %v3454_v50 }
 0x2db   : > { %v3631_v23 = vpop.f32.mrf.mxu1 }
 0x2dc   : > { %v3680_v8 = vadd.f32 %v4283_v2, %v3664_v60  ;;  %v3662_v19 = vadd.f32 %v3631_v23, %v3452_v6 }
 0x2dd   : > { %v4943_v59 = vpop.f32.mrf.mxu1 }
 0x2de   : > { %v3688_v36 = vmax.f32 %v3680_v8, 0.0  ;;  %v3678_v39 = vadd.f32 %v4281_v7, %v3662_v19  ;;  %v3665_v16 = vadd.f32 %v4943_v59, %v3455_v13 }
 0x2df   : > { %v3634_v48 = vpop.f32.mrf.mxu1 }
 0x2e0   : > { %3696 = vst [vmem:[%s6120_s19 + $0x10] sm:$0xff] %v3688_v36  ;;  %v3686_v34 = vmax.f32 %v3678_v39, 0.0  ;;  %v3681_v41 = vadd.f32 %v4284_v28, %v3665_v16  ;;  %v3663_v26 = vadd.f32 %v3634_v48, %v3453_v24 }
 0x2e1   : > { %v4946_v56 = vpop.f32.mrf.mxu1 }
 0x2e2   : > { %3694 = vst [vmem:[%s6120_s19] sm:$0xff] %v3686_v34  ;;  %v3689_v37 = vmax.f32 %v3681_v41, 0.0  ;;  %v3679_v54 = vadd.f32 %v4282_v12, %v3663_v26  ;;  %v3668_v49 = vadd.f32 %v4946_v56, %v3458_v21 }
 0x2e3   : > { %v3647_v43 = vpop.f32.mrf.mxu1 }
 0x2e4   : > { %3697 = vst [vmem:[%s6120_s19 + $0x18] sm:$0xff] %v3689_v37  ;;  %v3687_v61 = vmax.f32 %v3679_v54, 0.0  ;;  %v3684_v52 = vadd.f32 %v4287_v32, %v3668_v49  ;;  %v3666_v1 = vadd.f32 %v3647_v43, %v3456_v40 }
 0x2e5   : > { %v4947_v4 = vpop.f32.mrf.mxu1 }
 0x2e6   : > { %3695 = vst [vmem:[%s6120_s19 + $0x8] sm:$0xff] %v3687_v61  ;;  %v3692_v14 = vmax.f32 %v3684_v52, 0.0  ;;  %v3682_v20 = vadd.f32 %v4285_v45, %v3666_v1  ;;  %v3669_v9 = vadd.f32 %v4947_v4, %v3459_v46 }
 0x2e7   : > { %v3650_v33 = vpop.f32.mrf.mxu1 }
 0x2e8   : > { %3700 = vst [vmem:[%s6120_s19 + $0x30] sm:$0xff] %v3692_v14  ;;  %v3690_v17 = vmax.f32 %v3682_v20, 0.0  ;;  %v3685_v50 = vadd.f32 %v4288_v30, %v3669_v9  ;;  %v3667_v44 = vadd.f32 %v3650_v33, %v3457_v55 }
 0x2ea   : > { %3698 = vst [vmem:[%s6120_s19 + $0x20] sm:$0xff] %v3690_v17  ;;  %v3693_v51 = vmax.f32 %v3685_v50, 0.0  ;;  %v3683_v53 = vadd.f32 %v4286_v63, %v3667_v44 }
 0x2ec   : > { %3701 = vst [vmem:[%s6120_s19 + $0x38] sm:$0xff] %v3693_v51  ;;  %v3691_v57 = vmax.f32 %v3683_v53, 0.0 }
 0x2ee   : > { %3699 = vst [vmem:[%s6120_s19 + $0x28] sm:$0xff] %v3691_v57 }
 0x2ef PF: > { %s13_s12 = sadd.s32 1, %s5120_s12  }
 0x2f0   : > { %p10_p4 = scmp.ge.s32.totalorder %s13_s12, 6  }
 0x2f2   :  { %12 = sbr.rel (!%p10_p4) target bundleno = 1 (0x1), region = 82 }

// kernel: volume_encoder_forward.7
= control target key start
LH: loop header
LB: loop body
LE: loop exit
PB: predicated region body
PF: predicated region fallthrough
CT: control target
= control target key end

     0   :  { %s371_s9 = smov 0   ;;  %s400_s0 = inlined_call_operand.vmem [shape: f32[4,32,16], index: 0, kind: input, shape index: {}]   ;;  %s401_s1 = inlined_call_operand.vmem [shape: f32[16,256], index: 1, kind: input, shape index: {}]   ;;  %s402_s2 = inlined_call_operand.vmem [shape: f32[4,32,256], index: 2, kind: output, shape index: {}]  }
   0x1 LB: > { %s317_s10 = sadd.s32 4294967295, %s353_s9   ;;  %p321_p0 = scmp.ge.s32.totalorder %s353_s9, 1  ;;  %s353_s9 = sphi %s371_s9, %s12_s9  }
   0x2   : > { %p112_p1 = scmp.lt.s32.totalorder %s353_s9, 5 }
   0x4   : > { %p113_p2 = pnand %p321_p0, %p112_p1 }
   0x5   : > { %p134_p3 = scmp.lt.s32.totalorder (!%p113_p2), %s317_s10, 3 }
   0x6   : > { %116 = sbr.rel (%p113_p2) target bundleno = 217 (0xd9), region = 28 }
   0xb   : > { %v151_v0 = vld [vmem:[%s401_s1 + $0x18] sm:$0xff]  ;;  %v150_v1 = vld [vmem:[%s401_s1 + $0x10] sm:$0xff]  ;;  %v149_v2 = vld [vmem:[%s401_s1 + $0x8] sm:$0xff]  ;;  %s404_s10 = smov (!%p134_p3, %s317_s10), 3  ;;  %vm152_vm0 = vcmask 130048   ;;  %v355_v4 = vmov 0.0  }
   0xc   : > { %193 = vmatprep.subr.mxu0 %v151_v0  ;;  %334 = vmatprep.subr.mxu1 %v151_v0  ;;  %v148_v3 = vld [vmem:[%s401_s1] sm:$0xff]  ;;  %s332_s19 = sshll.u32 %s404_s10, 5  ;;  %s333_s23 = sshll.u32 %s404_s10, 6 }
   0xd   : > { %194 = vmatpush1.msra.mxu0 %v150_v1  ;;  %336 = vmatpush1.msra.mxu1 %v150_v1  ;;  %s138_s22 = scalar_lea.vmem %s400_s0, %s332_s19  ;;  %s143_s26 = scalar_lea.vmem %s402_s2, %s333_s23 }
   0xe   : > { %195 = vmatprep.subr.mxu0 %v149_v2  ;;  %335 = vmatprep.subr.mxu1 %v149_v2  ;;  %v144_v5 = vld [vmem:[%s138_s22] sm:$0xff]  ;;  %v146_v6 = vld [vmem:[%s138_s22 + $0x10] sm:$0xff]  ;;  %v145_v7 = vld [vmem:[%s138_s22 + $0x8] sm:$0xff] }
   0xf   : > { %196 = vmatpush1.msra.mxu0 %v148_v3  ;;  %337 = vmatpush1.msra.mxu1 %v148_v3  ;;  %v147_v8 = vld [vmem:[%s138_s22 + $0x18] sm:$0xff] }
  0x10   : > { %229 = vmatprep.mubr.f32.mxu0 %v355_v4  ;;  %241 = vmatprep.mubr.f32.mxu1 %v355_v4 }
  0x11   : > { %326 = vmatmul.mubr.msk.f32.vlgmr.msra.gmra.mxu0 %vm152_vm0, %v144_v5  ;;  %328 = vmatmul.mubr.msk.f32.vlgmr.msra.gmra.mxu1 %vm152_vm0, %v146_v6 }
  0x12   : > { %235 = vmatprep.mubr.f32.mxu0 %v355_v4  ;;  %247 = vmatprep.mubr.f32.mxu1 %v355_v4 }
  0x15   : > { %327 = vmatmul.mubr.msk.f32.gmra.mxu0 %vm152_vm0, %v145_v7  ;;  %329 = vmatmul.mubr.msk.f32.gmra.mxu1 %vm152_vm0, %v147_v8 }
  0xd1   : > { %v231_v9 = vpop.f32.mrf.mxu0  ;;  %v243_v10 = vpop.f32.mrf.mxu1 }
  0xd2   : > { %254 = vst [vmem:[%s143_s26] sm:$0xff] %v231_v9  ;;  %258 = vst [vmem:[%s143_s26 + $0x20] sm:$0xff] %v243_v10 }
  0xd3   : > { %v233_v11 = vpop.f32.mrf.mxu0  ;;  %v245_v12 = vpop.f32.mrf.mxu1 }
  0xd4   : > { %255 = vst [vmem:[%s143_s26 + $0x8] sm:$0xff] %v233_v11  ;;  %259 = vst [vmem:[%s143_s26 + $0x28] sm:$0xff] %v245_v12 }
  0xd5   : > { %v237_v13 = vpop.f32.mrf.mxu0  ;;  %v249_v14 = vpop.f32.mrf.mxu1 }
  0xd6   : > { %256 = vst [vmem:[%s143_s26 + $0x10] sm:$0xff] %v237_v13  ;;  %260 = vst [vmem:[%s143_s26 + $0x30] sm:$0xff] %v249_v14 }
  0xd7   : > { %v239_v15 = vpop.f32.mrf.mxu0  ;;  %v251_v16 = vpop.f32.mrf.mxu1 }
  0xd8   : > { %257 = vst [vmem:[%s143_s26 + $0x18] sm:$0xff] %v239_v15  ;;  %261 = vst [vmem:[%s143_s26 + $0x38] sm:$0xff] %v251_v16 }
  0xd9 PF: > { %s12_s9 = sadd.s32 1, %s353_s9  }
  0xda   : > { %p9_p4 = scmp.ge.s32.totalorder %s12_s9, 6  }
  0xdc   :  { %11 = sbr.rel (!%p9_p4) target bundleno = 1 (0x1), region = 58 }

// kernel: volume_encoder_forward.6
= control target key start
LH: loop header
LB: loop body
LE: loop exit
PB: predicated region body
PF: predicated region fallthrough
CT: control target
= control target key end

     0   :  { %s3689_s15 = smov 0   ;;  %s4282_s0 = inlined_call_operand.vmem [shape: f32[4,4,5,5,128], index: 0, kind: input, shape index: {}]   ;;  %s4283_s1 = inlined_call_operand.vmem [shape: bf16[9,128,32], index: 1, kind: input, shape index: {}]   ;;  %s4284_s2 = inlined_call_operand.vmem [shape: bf16[9,32,32], index: 2, kind: input, shape index: {}]   ;;  %s4285_s3 = inlined_call_operand.vmem [shape: bf16[128,32], index: 3, kind: input, shape index: {}]   ;;  %s4286_s4 = inlined_call_operand.vmem [shape: f32[4,4,4,32], index: 4, kind: output, shape index: {}]  }
   0x1 LB: > { %s2766_s16 = sadd.s32 4294967295, %s3658_s15   ;;  %p2770_p0 = scmp.ge.s32.totalorder %s3658_s15, 1  ;;  %s3658_s15 = sphi %s3689_s15, %s14_s15  }
   0x2   : > { %p162_p1 = scmp.lt.s32.totalorder %s3658_s15, 5 }
   0x4   : > { %p163_p2 = pnand %p2770_p0, %p162_p1 }
   0x5   : > { %p188_p3 = scmp.lt.s32.totalorder (!%p163_p2), %s2766_s16, 3 }
   0x6   : > { %166 = sbr.rel (%p163_p2) target bundleno = 664 (0x298), region = 36 }
   0xb   : > { %v3522_v0 = vld [vmem:[%s4283_s1 + $0x78] sm:$0xff]   ;;  %v3660_v1 = vmov 0.0   ;;  %v3524_v3 = vld [vmem:[%s4283_s1 + $0x70] sm:$0xff]   ;;  %vm3661_vm0 = vmmov 0   ;;  %v3526_v5 = vld [vmem:[%s4283_s1 + $0x68] sm:$0xff]   ;;  %s4294_s16 = smov (!%p188_p3, %s2766_s16), 3 }
   0xc   : > { %3237 = vmatprep.subr.bf16.mxu0 %v3660_v1  ;;  %3257 = vmatprep.subr.bf16.mxu1 %v3660_v1  ;;  %v3523_v2 = vld [vmem:[%s4283_s1 + $0x38] sm:$0xff]   ;;  %v3525_v4 = vld [vmem:[%s4283_s1 + $0x30] sm:$0xff]   ;;  %v3527_v6 = vld [vmem:[%s4283_s1 + $0x28] sm:$0xff]   ;;  %s3509_s7 = smul.u32 160, %s4294_s16  ;;  %vm1290_vm1 = vcmask 256000   ;;  %vm1674_vm4 = vcmask 1040384  }
   0xd   : > { %3238 = vmatpush3.bf16.msra.mxu0 %v3522_v0  ;;  %3253 = vmatprep.mubr.msk.bf16.mxu0 %vm3661_vm0, %v3660_v1  ;;  %v3528_v7 = vld [vmem:[%s4283_s1 + $0x60] sm:$0xff]   ;;  %v3530_v9 = vld [vmem:[%s4283_s1 + $0x58] sm:$0xff]   ;;  %v3532_v11 = vld [vmem:[%s4283_s1 + $0x50] sm:$0xff]   ;;  %vm1353_vm2 = vsmask.f32 2306  ;;  %vm1675_vm5 = vcmask 1042434  }
   0xe   : > { %3258 = vmatpush3.bf16.msra.mxu1 %v3523_v2  ;;  %3239 = vmatprep.subr.bf16.mxu0 %v3660_v1  ;;  %v3529_v8 = vld [vmem:[%s4283_s1 + $0x20] sm:$0xff]   ;;  %v3531_v10 = vld [vmem:[%s4283_s1 + $0x18] sm:$0xff]   ;;  %s3746_s14 = scalar_lea.vmem %s4282_s0, %s3509_s7  ;;  %v3533_v12 = vld [vmem:[%s4283_s1 + $0x10] sm:$0xff]   ;;  %vm1677_vm7 = vcmask 1044484   ;;  %vm1679_vm8 = vcmask 1046534   ;;  %vm1512_vm13 = vcmask 261120  }
   0xf   : > { %3259 = vmatprep.subr.bf16.mxu1 %v3660_v1  ;;  %3273 = vmatprep.mubr.msk.bf16.mxu1 %vm3661_vm0, %v3660_v1  ;;  %v3534_v13 = vld [vmem:[%s4283_s1 + $0x48] sm:$0xff]   ;;  %v3536_v16 = vld [vmem:[%s4283_s1 + $0x40] sm:$0xff]   ;;  %v3541_v19 = vld [vmem:[%s3746_s14 + $0x10] ss:$8 sps:$4 sm:$0xff]   ;;  %vm1415_vm9 = vsmask.f32 1280 }
  0x10   : > { %v3535_v14 = vld [vmem:[%s4283_s1 + $0x8] sm:$0xff]   ;;  %v3539_v17 = vld [vmem:[%s3746_s14 + $0x38] ss:$8 sps:$4 sm:$0xff]   ;;  %v3544_v25 = vld [vmem:[%s4283_s1 + $0xb0] sm:$0xff]   ;;  %vm1416_vm10 = vsmask.f32 3336 }
  0x11   : > { %3240 = vmatpush3.bf16.msra.mxu0 %v3524_v3  ;;  %v3538_v15 = vld [vmem:[%s3746_s14 + $0x28] ss:$8 sps:$4 sm:$0xff]   ;;  %v3537_v20 = vld [vmem:[%s4283_s1] sm:$0xff]   ;;  %v3542_v23 = vld [vmem:[%s4283_s1 + $0xb8] sm:$0xff]   ;;  %vm1418_vm11 = vsmask.f32 5392 }
  0x12   : > { %3260 = vmatpush3.bf16.msra.mxu1 %v3525_v4  ;;  %3241 = vmatprep.subr.bf16.mxu0 %v3660_v1  ;;  %v3540_v18 = vld [vmem:[%s3746_s14] ss:$8 sps:$4 sm:$0xff]   ;;  %v241_v21 = vpack.c.bf16 %v3539_v17, %v3538_v15  ;;  %v3543_v24 = vld [vmem:[%s4283_s1 + $0xf8] sm:$0xff]   ;;  %v3545_v26 = vld [vmem:[%s4283_s1 + $0xf0] sm:$0xff]   ;;  %vm1420_vm12 = vsmask.f32 7448 }
  0x13   : > { %3261 = vmatprep.subr.bf16.mxu1 %v3660_v1  ;;  %v211_v22 = vpack.c.bf16 %v3541_v19, %v3540_v18  ;;  %v3546_v27 = vld [vmem:[%s4283_s1 + $0xa8] sm:$0xff]   ;;  %v3548_v29 = vld [vmem:[%s4283_s1 + $0xa0] sm:$0xff]   ;;  %v3550_v31 = vld [vmem:[%s4283_s1 + $0x98] sm:$0xff]  }
  0x14   : > { %v3547_v28 = vld [vmem:[%s4283_s1 + $0xe8] sm:$0xff]   ;;  %v3549_v30 = vld [vmem:[%s4283_s1 + $0xe0] sm:$0xff]   ;;  %v3551_v32 = vld [vmem:[%s4283_s1 + $0xd8] sm:$0xff]  }
  0x15   : > { %3242 = vmatpush3.bf16.msra.mxu0 %v3526_v5  ;;  %v3552_v33 = vld [vmem:[%s4283_s1 + $0x90] sm:$0xff]   ;;  %v3554_v35 = vld [vmem:[%s4283_s1 + $0x88] sm:$0xff]   ;;  %v3556_v38 = vld [vmem:[%s4283_s1 + $0x80] sm:$0xff]  }
  0x16   : > { %3262 = vmatpush3.bf16.msra.mxu1 %v3527_v6  ;;  %3243 = vmatprep.subr.bf16.mxu0 %v3660_v1  ;;  %v3553_v34 = vld [vmem:[%s4283_s1 + $0xd0] sm:$0xff]   ;;  %v3555_v36 = vld [vmem:[%s4283_s1 + $0xc8] sm:$0xff]   ;;  %v3557_v39 = vld [vmem:[%s4283_s1 + $0xc0] sm:$0xff]  }
  0x17   : > { %3263 = vmatprep.subr.bf16.mxu1 %v3660_v1  ;;  %v3558_v37 = vld [vmem:[%s3746_s14 + $0x1] ss:$8 sps:$4 sm:$0xff]   ;;  %v3559_v40 = vld [vmem:[%s3746_s14 + $0x11] ss:$8 sps:$4 sm:$0xff]   ;;  %vm4058_vm3 = vmand %vm1290_vm1, %vm1353_vm2 }
  0x18   : > { %v3561_v41 = vld [vmem:[%s3746_s14 + $0x50] ss:$8 sps:$4 sm:$0xff]   ;;  %v3562_v42 = vld [vmem:[%s3746_s14 + $0x60] ss:$8 sps:$4 sm:$0xff]   ;;  %v449_v43 = vpack.c.bf16 %v3559_v40, %v3558_v37  ;;  %vm1676_vm6 = vmor %vm1674_vm4, %vm1675_vm5 }
  0x19   : > { %3244 = vmatpush3.bf16.msra.mxu0 %v3528_v7  ;;  %v3560_v44 = vld [vmem:[%s4283_s1 + $0x138] sm:$0xff]   ;;  %v571_v45 = vpack.c.bf16 %v3562_v42, %v3561_v41  ;;  %v3564_v47 = vld [vmem:[%s4283_s1 + $0x130] sm:$0xff]   ;;  %v3566_v49 = vld [vmem:[%s4283_s1 + $0x128] sm:$0xff]  }
  0x1a   : > { %3264 = vmatpush3.bf16.msra.mxu1 %v3529_v8  ;;  %3245 = vmatprep.subr.bf16.mxu0 %v3660_v1  ;;  %v3563_v46 = vld [vmem:[%s4283_s1 + $0x178] sm:$0xff]   ;;  %v3565_v48 = vld [vmem:[%s4283_s1 + $0x170] sm:$0xff]   ;;  %v3567_v50 = vld [vmem:[%s4283_s1 + $0x168] sm:$0xff]  }
  0x1b   : > { %3265 = vmatprep.subr.bf16.mxu1 %v3660_v1  ;;  %v3568_v51 = vld [vmem:[%s4283_s1 + $0x120] sm:$0xff]   ;;  %v3570_v53 = vld [vmem:[%s4283_s1 + $0x118] sm:$0xff]   ;;  %v3572_v55 = vld [vmem:[%s4283_s1 + $0x110] sm:$0xff]  }
  0x1c   : > { %v3569_v52 = vld [vmem:[%s4283_s1 + $0x160] sm:$0xff]   ;;  %v3571_v54 = vld [vmem:[%s4283_s1 + $0x158] sm:$0xff]   ;;  %v3573_v56 = vld [vmem:[%s4283_s1 + $0x150] sm:$0xff]  }
  0x1d   : > { %3246 = vmatpush3.bf16.msra.mxu0 %v3530_v9  ;;  %v3574_v57 = vld [vmem:[%s4283_s1 + $0x108] sm:$0xff]   ;;  %v3578_v59 = vld [vmem:[%s3746_s14 + $0x78] ss:$8 sps:$4 sm:$0xff]   ;;  %v3584_v6 = vld [vmem:[%s4283_s1 + $0x1b0] sm:$0xff]  }
  0x1e   : > { %3266 = vmatpush3.bf16.msra.mxu1 %v3531_v10  ;;  %3247 = vmatprep.subr.bf16.mxu0 %v3660_v1  ;;  %v3575_v58 = vld [vmem:[%s4283_s1 + $0x148] sm:$0xff]   ;;  %v3576_v61 = vld [vmem:[%s4283_s1 + $0x100] sm:$0xff]   ;;  %v3581_v63 = vld [vmem:[%s3746_s14 + $0x51] ss:$8 sps:$4 sm:$0xff]  }
  0x1f   : > { %3267 = vmatprep.subr.bf16.mxu1 %v3660_v1  ;;  %v3579_v60 = vld [vmem:[%s3746_s14 + $0x88] ss:$8 sps:$4 sm:$0xff]   ;;  %v3577_v62 = vld [vmem:[%s4283_s1 + $0x140] sm:$0xff]   ;;  %v3580_v2 = vld [vmem:[%s4283_s1 + $0x1b8] sm:$0xff]  }
  0x20   : > { %v3582_v0 = vld [vmem:[%s3746_s14 + $0x61] ss:$8 sps:$4 sm:$0xff]   ;;  %v693_v3 = vpack.c.bf16 %v3579_v60, %v3578_v59  ;;  %v3583_v4 = vld [vmem:[%s4283_s1 + $0x1f8] sm:$0xff]   ;;  %v3585_v7 = vld [vmem:[%s4283_s1 + $0x1f0] sm:$0xff]  }
  0x21   : > { %3248 = vmatpush3.bf16.msra.mxu0 %v3532_v11  ;;  %v814_v5 = vpack.c.bf16 %v3582_v0, %v3581_v63  ;;  %v3586_v8 = vld [vmem:[%s4283_s1 + $0x1a8] sm:$0xff]   ;;  %v3588_v10 = vld [vmem:[%s4283_s1 + $0x1a0] sm:$0xff]   ;;  %v3593_v15 = vld [vmem:[%s4283_s1 + $0x1d0] sm:$0xff]  }
  0x22   : > { %3268 = vmatpush3.bf16.msra.mxu1 %v3533_v12  ;;  %3249 = vmatprep.subr.bf16.mxu0 %v3660_v1  ;;  %v3587_v9 = vld [vmem:[%s4283_s1 + $0x1e8] sm:$0xff]   ;;  %v3589_v11 = vld [vmem:[%s4283_s1 + $0x1e0] sm:$0xff]   ;;  %v3590_v12 = vld [vmem:[%s4283_s1 + $0x198] sm:$0xff]  }
  0x23   : > { %3269 = vmatprep.subr.bf16.mxu1 %v3660_v1  ;;  %v3595_v17 = vld [vmem:[%s4283_s1 + $0x1c8] sm:$0xff]   ;;  %v3599_v19 = vld [vmem:[%s3746_s14 + $0x18] ss:$8 sps:$4 sm:$0xff]   ;;  %v3619_v60 = vld [vmem:[%s4284_s2 + $0x10] sm:$0xff]  }
  0x24   : > { %v3598_v18 = vld [vmem:[%s3746_s14 + $0x8] ss:$8 sps:$4 sm:$0xff]   ;;  %vm1678_vm14 = vmor %vm1676_vm6, %vm1677_vm7 }
  0x25   : > { %3250 = vmatpush3.bf16.msra.mxu0 %v3534_v13  ;;  %v3591_v13 = vld [vmem:[%s4283_s1 + $0x1d8] sm:$0xff]   ;;  %vm4082_vm15 = vmor %vm1678_vm14, %vm1679_vm8 }
  0x26   : > { %3270 = vmatpush3.bf16.msra.mxu1 %v3535_v14  ;;  %3251 = vmatprep.subr.bf16.mxu0 %v3660_v1  ;;  %v3592_v14 = vld [vmem:[%s4283_s1 + $0x190] sm:$0xff]  }
  0x27   : > { %3271 = vmatprep.subr.bf16.mxu1 %v3660_v1 }
  0x29   : > { %3252 = vmatpush3.bf16.msra.mxu0 %v3536_v16  ;;  %v3594_v16 = vld [vmem:[%s4283_s1 + $0x188] sm:$0xff]  }
  0x2a   : > { %3272 = vmatpush3.bf16.msra.mxu1 %v3537_v20  ;;  %3277 = vmatprep.subr.bf16.mxu0 %v3660_v1  ;;  %v3596_v20 = vld [vmem:[%s4283_s1 + $0x180] sm:$0xff]  }
  0x2b   : > { %3297 = vmatprep.subr.bf16.mxu1 %v3660_v1 }
  0x2c   : > { %3254 = vmatmul.mubr.bf16.vlgmr.msra.gmra.mxu0 %v241_v21  ;;  %v3601_v21 = vld [vmem:[%s3746_s14 + $0x30] ss:$8 sps:$4 sm:$0xff]  }
  0x2d   : > { %3274 = vmatmul.mubr.bf16.vlgmr.msra.gmra.mxu1 %v211_v22  ;;  %3278 = vmatpush3.bf16.msra.mxu0 %v3542_v23  ;;  %v3602_v22 = vld [vmem:[%s3746_s14 + $0x40] ss:$8 sps:$4 sm:$0xff]  }
  0x2e   : > { %3298 = vmatpush3.bf16.msra.mxu1 %v3543_v24  ;;  %3279 = vmatprep.subr.bf16.mxu0 %v3660_v1  ;;  %v3597_v23 = vld [vmem:[%s4283_s1 + $0x1c0] sm:$0xff]   ;;  %v936_v24 = vpack.c.bf16 %v3599_v19, %v3598_v18 }
  0x2f   : > { %3299 = vmatprep.subr.bf16.mxu1 %v3660_v1  ;;  %3293 = vmatprep.mubr.msk.bf16.mxu0 %vm3661_vm0, %v3660_v1 }
  0x30   : > { %3313 = vmatprep.mubr.msk.bf16.mxu1 %vm3661_vm0, %v3660_v1 }
  0x31   : > { %3280 = vmatpush3.bf16.msra.mxu0 %v3544_v25  ;;  %v3600_v25 = vld [vmem:[%s4283_s1 + $0x238] sm:$0xff]  }
  0x32   : > { %3300 = vmatpush3.bf16.msra.mxu1 %v3545_v26  ;;  %3281 = vmatprep.subr.bf16.mxu0 %v3660_v1  ;;  %v1058_v26 = vpack.c.bf16 %v3602_v22, %v3601_v21 }
  0x33   : > { %3301 = vmatprep.subr.bf16.mxu1 %v3660_v1 }
  0x35   : > { %3282 = vmatpush3.bf16.msra.mxu0 %v3546_v27  ;;  %v3603_v27 = vld [vmem:[%s4283_s1 + $0x230] sm:$0xff]  }
  0x36   : > { %3302 = vmatpush3.bf16.msra.mxu1 %v3547_v28  ;;  %3283 = vmatprep.subr.bf16.mxu0 %v3660_v1  ;;  %v3604_v28 = vld [vmem:[%s4283_s1 + $0x228] sm:$0xff]  }
  0x37   : > { %3303 = vmatprep.subr.bf16.mxu1 %v3660_v1 }
  0x39   : > { %3284 = vmatpush3.bf16.msra.mxu0 %v3548_v29  ;;  %v3605_v29 = vld [vmem:[%s4283_s1 + $0x220] sm:$0xff]  }
  0x3a   : > { %3304 = vmatpush3.bf16.msra.mxu1 %v3549_v30  ;;  %3285 = vmatprep.subr.bf16.mxu0 %v3660_v1  ;;  %v3606_v30 = vld [vmem:[%s4283_s1 + $0x218] sm:$0xff]  }
  0x3b   : > { %3305 = vmatprep.subr.bf16.mxu1 %v3660_v1 }
  0x3d   : > { %3286 = vmatpush3.bf16.msra.mxu0 %v3550_v31  ;;  %v3607_v31 = vld [vmem:[%s4283_s1 + $0x210] sm:$0xff]  }
  0x3e   : > { %3306 = vmatpush3.bf16.msra.mxu1 %v3551_v32  ;;  %3287 = vmatprep.subr.bf16.mxu0 %v3660_v1  ;;  %v3608_v32 = vld [vmem:[%s4283_s1 + $0x208] sm:$0xff]  }
  0x3f   : > { %3307 = vmatprep.subr.bf16.mxu1 %v3660_v1 }
  0x41   : > { %3288 = vmatpush3.bf16.msra.mxu0 %v3552_v33  ;;  %v3610_v33 = vld [vmem:[%s3746_s14 + $0x9] ss:$8 sps:$4 sm:$0xff]  }
  0x42   : > { %3308 = vmatpush3.bf16.msra.mxu1 %v3553_v34  ;;  %3289 = vmatprep.subr.bf16.mxu0 %v3660_v1  ;;  %v3611_v34 = vld [vmem:[%s3746_s14 + $0x19] ss:$8 sps:$4 sm:$0xff]  }
  0x43   : > { %3309 = vmatprep.subr.bf16.mxu1 %v3660_v1 }
  0x45   : > { %3290 = vmatpush3.bf16.msra.mxu0 %v3554_v35  ;;  %v3609_v35 = vld [vmem:[%s4283_s1 + $0x200] sm:$0xff]  }
  0x46   : > { %3310 = vmatpush3.bf16.msra.mxu1 %v3555_v36  ;;  %3291 = vmatprep.subr.bf16.mxu0 %v3660_v1  ;;  %v1179_v36 = vpack.c.bf16 %v3611_v34, %v3610_v33 }
  0x47   : > { %3311 = vmatprep.subr.bf16.mxu1 %v3660_v1 }
  0x49   : > { %3292 = vmatpush3.bf16.msra.mxu0 %v3556_v38 }
  0x4a   : > { %3312 = vmatpush3.bf16.msra.mxu1 %v3557_v39  ;;  %3317 = vmatprep.subr.bf16.mxu0 %v3660_v1 }
  0x4b   : > { %3337 = vmatprep.subr.bf16.mxu1 %v3660_v1 }
  0x4c   : > { %3294 = vmatmul.mubr.bf16.vlgmr.msra.gmra.mxu0 %v449_v43  ;;  %v3662_v43 = vmov 0  }
  0x4d   : > { %3318 = vmatpush3.bf16.msra.mxu0 %v3560_v44  ;;  %3314 = vmatmul.mubr.bf16.vlgmr.msra.gmra.mxu1 %v571_v45  ;;  %1291 = vst.msk [vmem:[#allocation2] sm:$0x7] %vm1290_vm1, %v3662_v43  ;;  %1292 = vst.msk [vmem:[#allocation2 + $0x4] sm:$0x7] %vm1290_vm1, %v3662_v43 }
  0x4e   : > { %3338 = vmatpush3.bf16.msra.mxu1 %v3563_v46  ;;  %3319 = vmatprep.subr.bf16.mxu0 %v3660_v1  ;;  %1293 = vst.msk [vmem:[#allocation2 + $0x8] sm:$0x7] %vm1290_vm1, %v3662_v43  ;;  %1296 = vst.msk [vmem:[#allocation2 + $0x14] sm:$0x7] %vm1290_vm1, %v3662_v43 }
  0x4f   : > { %3339 = vmatprep.subr.bf16.mxu1 %v3660_v1  ;;  %3333 = vmatprep.mubr.msk.bf16.mxu0 %vm3661_vm0, %v3660_v1  ;;  %1294 = vst.msk [vmem:[#allocation2 + $0xc] sm:$0x7] %vm1290_vm1, %v3662_v43  ;;  %1295 = vst.msk [vmem:[#allocation2 + $0x10] sm:$0x7] %vm1290_vm1, %v3662_v43 }
  0x50   : > { %3353 = vmatprep.mubr.msk.bf16.mxu1 %vm3661_vm0, %v3660_v1  ;;  %vm1417_vm1 = vmor %vm1415_vm9, %vm1416_vm10 }
  0x51   : > { %3320 = vmatpush3.bf16.msra.mxu0 %v3564_v47  ;;  %vm1419_vm2 = vmor %vm1417_vm1, %vm1418_vm11 }
  0x52   : > { %3340 = vmatpush3.bf16.msra.mxu1 %v3565_v48  ;;  %3321 = vmatprep.subr.bf16.mxu0 %v3660_v1  ;;  %v3612_v48 = vld [vmem:[%s4284_s2 + $0x8] sm:$0xff]  }
  0x53   : > { %3341 = vmatprep.subr.bf16.mxu1 %v3660_v1 }
  0x54   : > { %v3006_v33 = vld.sshfl [vmem:[#allocation2] sm:$0x13 pattern:$0x76325410] }
  0x55   : > { %3322 = vmatpush3.bf16.msra.mxu0 %v3566_v49  ;;  %v3613_v49 = vld [vmem:[%s4284_s2] sm:$0xff]  }
  0x56   : > { %3342 = vmatpush3.bf16.msra.mxu1 %v3567_v50  ;;  %3323 = vmatprep.subr.bf16.mxu0 %v3660_v1 }
  0x57   : > { %3343 = vmatprep.subr.bf16.mxu1 %v3660_v1 }
  0x59   : > { %3324 = vmatpush3.bf16.msra.mxu0 %v3568_v51 }
  0x5a   : > { %3344 = vmatpush3.bf16.msra.mxu1 %v3569_v52  ;;  %3325 = vmatprep.subr.bf16.mxu0 %v3660_v1 }
  0x5b   : > { %3345 = vmatprep.subr.bf16.mxu1 %v3660_v1 }
  0x5d   : > { %3326 = vmatpush3.bf16.msra.mxu0 %v3570_v53  ;;  %v3617_v53 = vld [vmem:[%s4284_s2 + $0x18] sm:$0xff]  }
  0x5e   : > { %3346 = vmatpush3.bf16.msra.mxu1 %v3571_v54  ;;  %3327 = vmatprep.subr.bf16.mxu0 %v3660_v1 }
  0x5f   : > { %3347 = vmatprep.subr.bf16.mxu1 %v3660_v1 }
  0x61   : > { %3328 = vmatpush3.bf16.msra.mxu0 %v3572_v55 }
  0x62   : > { %3348 = vmatpush3.bf16.msra.mxu1 %v3573_v56  ;;  %3329 = vmatprep.subr.bf16.mxu0 %v3660_v1 }
  0x63   : > { %3349 = vmatprep.subr.bf16.mxu1 %v3660_v1 }
  0x65   : > { %3330 = vmatpush3.bf16.msra.mxu0 %v3574_v57 }
  0x66   : > { %3350 = vmatpush3.bf16.msra.mxu1 %v3575_v58  ;;  %3331 = vmatprep.subr.bf16.mxu0 %v3660_v1 }
  0x67   : > { %3351 = vmatprep.subr.bf16.mxu1 %v3660_v1 }
  0x69   : > { %3332 = vmatpush3.bf16.msra.mxu0 %v3576_v61 }
  0x6a   : > { %3352 = vmatpush3.bf16.msra.mxu1 %v3577_v62  ;;  %3357 = vmatprep.subr.bf16.mxu0 %v3660_v1 }
  0x6b   : > { %3377 = vmatprep.subr.bf16.mxu1 %v3660_v1 }
  0x6c   : > { %3334 = vmatmul.mubr.bf16.vlgmr.msra.gmra.mxu0 %v693_v3 }
  0x6d   : > { %3358 = vmatpush3.bf16.msra.mxu0 %v3580_v2  ;;  %3354 = vmatmul.mubr.bf16.vlgmr.msra.gmra.mxu1 %v814_v5 }
  0x6e   : > { %3378 = vmatpush3.bf16.msra.mxu1 %v3583_v4  ;;  %3359 = vmatprep.subr.bf16.mxu0 %v3660_v1 }
  0x6f   : > { %3379 = vmatprep.subr.bf16.mxu1 %v3660_v1  ;;  %3373 = vmatprep.mubr.msk.bf16.mxu0 %vm3661_vm0, %v3660_v1 }
  0x70   : > { %3393 = vmatprep.mubr.msk.bf16.mxu1 %vm3661_vm0, %v3660_v1 }
  0x71   : > { %3360 = vmatpush3.bf16.msra.mxu0 %v3584_v6 }
  0x72   : > { %3380 = vmatpush3.bf16.msra.mxu1 %v3585_v7  ;;  %3361 = vmatprep.subr.bf16.mxu0 %v3660_v1 }
  0x73   : > { %3381 = vmatprep.subr.bf16.mxu1 %v3660_v1 }
  0x75   : > { %3362 = vmatpush3.bf16.msra.mxu0 %v3586_v8 }
  0x76   : > { %3382 = vmatpush3.bf16.msra.mxu1 %v3587_v9  ;;  %3363 = vmatprep.subr.bf16.mxu0 %v3660_v1 }
  0x77   : > { %3383 = vmatprep.subr.bf16.mxu1 %v3660_v1 }
  0x79   : > { %3364 = vmatpush3.bf16.msra.mxu0 %v3588_v10 }
  0x7a   : > { %3384 = vmatpush3.bf16.msra.mxu1 %v3589_v11  ;;  %3365 = vmatprep.subr.bf16.mxu0 %v3660_v1 }
  0x7b   : > { %3385 = vmatprep.subr.bf16.mxu1 %v3660_v1 }
  0x7d   : > { %3366 = vmatpush3.bf16.msra.mxu0 %v3590_v12 }
  0x7e   : > { %3386 = vmatpush3.bf16.msra.mxu1 %v3591_v13  ;;  %3367 = vmatprep.subr.bf16.mxu0 %v3660_v1 }
  0x7f   : > { %3387 = vmatprep.subr.bf16.mxu1 %v3660_v1 }
  0x81   : > { %3368 = vmatpush3.bf16.msra.mxu0 %v3592_v14 }
  0x82   : > { %3388 = vmatpush3.bf16.msra.mxu1 %v3593_v15  ;;  %3369 = vmatprep.subr.bf16.mxu0 %v3660_v1 }
  0x83   : > { %3389 = vmatprep.subr.bf16.mxu1 %v3660_v1 }
  0x85   : > { %3370 = vmatpush3.bf16.msra.mxu0 %v3594_v16 }
  0x86   : > { %3390 = vmatpush3.bf16.msra.mxu1 %v3595_v17  ;;  %3371 = vmatprep.subr.bf16.mxu0 %v3660_v1 }
  0x87   : > { %3391 = vmatprep.subr.bf16.mxu1 %v3660_v1 }
  0x89   : > { %3372 = vmatpush3.bf16.msra.mxu0 %v3596_v20 }
  0x8a   : > { %3392 = vmatpush3.bf16.msra.mxu1 %v3597_v23  ;;  %3397 = vmatprep.subr.bf16.mxu0 %v3660_v1 }
  0x8b   : > { %3425 = vmatprep.subr.bf16.mxu1 %v3660_v1 }
  0x8c   : > { %3374 = vmatmul.mubr.bf16.vlgmr.msra.gmra.mxu0 %v936_v24 }
  0x8d   : > { %3398 = vmatpush3.bf16.msra.mxu0 %v3600_v25  ;;  %3394 = vmatmul.mubr.bf16.vlgmr.msra.gmra.mxu1 %v1058_v26 }
  0x8e   : > { %3399 = vmatprep.subr.bf16.mxu0 %v3660_v1  ;;  %3413 = vmatprep.mubr.msk.bf16.mxu0 %vm3661_vm0, %v3660_v1 }
  0x8f   : > { %3429 = vmatprep.mubr.msk.bf16.mxu1 %vm3661_vm0, %v3660_v1  ;;  %3426 = vmatpush3.bf16.msra.mxu1 %v3612_v48 }
  0x90   : > { %3427 = vmatprep.subr.bf16.mxu1 %v3660_v1 }
  0x91   : > { %3400 = vmatpush3.bf16.msra.mxu0 %v3603_v27 }
  0x92   : > { %3401 = vmatprep.subr.bf16.mxu0 %v3660_v1 }
  0x93   : > { %3428 = vmatpush3.bf16.msra.mxu1 %v3613_v49 }
  0x94   : > { %3433 = vmatprep.subr.bf16.mxu1 %v3660_v1 }
  0x95   : > { %3402 = vmatpush3.bf16.msra.mxu0 %v3604_v28 }
  0x96   : > { %3403 = vmatprep.subr.bf16.mxu0 %v3660_v1 }
  0x99   : > { %3404 = vmatpush3.bf16.msra.mxu0 %v3605_v29 }
  0x9a   : > { %3405 = vmatprep.subr.bf16.mxu0 %v3660_v1 }
  0x9d   : > { %3406 = vmatpush3.bf16.msra.mxu0 %v3606_v30 }
  0x9e   : > { %3407 = vmatprep.subr.bf16.mxu0 %v3660_v1 }
  0xa1   : > { %3408 = vmatpush3.bf16.msra.mxu0 %v3607_v31 }
  0xa2   : > { %3409 = vmatprep.subr.bf16.mxu0 %v3660_v1 }
  0xa5   : > { %3410 = vmatpush3.bf16.msra.mxu0 %v3608_v32 }
  0xa6   : > { %3411 = vmatprep.subr.bf16.mxu0 %v3660_v1 }
  0xa9   : > { %3412 = vmatpush3.bf16.msra.mxu0 %v3609_v35 }
  0xaa   : > { %3417 = vmatprep.subr.bf16.mxu0 %v3660_v1 }
  0xac   : > { %3414 = vmatmul.mubr.bf16.vlgmr.msra.gmra.mxu0 %v1179_v36 }
  0xad   : > { %3421 = vmatprep.mubr.msk.bf16.mxu0 %vm3661_vm0, %v3660_v1  ;;  %3418 = vmatpush3.bf16.msra.mxu0 %v3617_v53  ;;  %v4062_v53 = vld.sshfl [vmem:[#allocation2] sm:$0x12 pattern:$0x76325410] }
  0xae   : > { %3419 = vmatprep.subr.bf16.mxu0 %v3660_v1 }
  0xb1   : > { %3420 = vmatpush3.bf16.msra.mxu0 %v3619_v60 }
  0xb2   : > { %3449 = vmatprep.subr.bf16.mxu0 %v3660_v1 }
  0xec   : > { %v341_v37 = vpop.f32.mrf.mxu0 }
  0xed   : > { %v430_v38 = vpop.f32.mrf.mxu1 }
  0xee   : > { %v431_v39 = vadd.f32 %v430_v38, %v341_v37  ;;  %v3255_v40 = vpop.f32.mrf.mxu0  ;;  %v1423_v38 = vshrl.u32 %v3006_v33, 16 }
  0xef   : > { %v3275_v41 = vpop.f32.mrf.mxu1 }
  0xf0   : > { %v344_v42 = vpop.f32.mrf.mxu0 }
  0xf1   : > { %v433_v44 = vpop.f32.mrf.mxu1 }
  0xf2   : > { %v434_v45 = vadd.f32 %v433_v44, %v344_v42  ;;  %v3256_v46 = vpop.f32.mrf.mxu0 }
  0xf3   : > { %v3276_v47 = vpop.f32.mrf.mxu1 }
  0xf4   : > { %v3663_v47 = vmov 1983009808  }
  0xf5   : > { %v1486_v48 = vunpack.c.l.s4 %v3663_v47 }
 0x10c   : > { %v549_v50 = vpop.f32.mrf.mxu0 }
 0x10d   : > { %v556_v51 = vadd.f32 %v549_v50, %v431_v39  ;;  %v671_v52 = vpop.f32.mrf.mxu1  ;;  %v1426_v39 = vshll.u32 %v3006_v33, 16 }
 0x10e   : > { %v3295_v54 = vpop.f32.mrf.mxu0 }
 0x10f   : > { %v678_v55 = vadd.f32 %v671_v52, %v556_v51  ;;  %v3315_v56 = vpop.f32.mrf.mxu1  ;;  %v1358_v54 = vld [vmem:[#allocation2 + $0x8] sm:$0x7] }
 0x110   : > { %v552_v57 = vpop.f32.mrf.mxu0  ;;  %v1488_v56 = vlaneseq }
 0x111   : > { %v557_v58 = vadd.f32 %v552_v57, %v434_v45  ;;  %v674_v59 = vpop.f32.mrf.mxu1  ;;  %v1355_v45 = vld [vmem:[#allocation2 + $0x4] sm:$0x7]  ;;  %v1390_v57 = vcombine.high %v3006_v33, %v3006_v33 }
 0x112   : > { %v3296_v61 = vpop.f32.mrf.mxu0 }
 0x113   : > { %v679_v62 = vadd.f32 %v674_v59, %v557_v58  ;;  %v3316_v63 = vpop.f32.mrf.mxu1  ;;  %v1425_v58 = vrot.slane %v1423_v38, 6 }
 0x12c   : > { %v793_v0 = vpop.f32.mrf.mxu0 }
 0x12d   : > { %v914_v2 = vpop.f32.mrf.mxu1  ;;  %v800_v17 = vadd.f32 %v793_v0, %v678_v55 }
 0x12e   : > { %v3335_v3 = vpop.f32.mrf.mxu0 }
 0x12f   : > { %v3355_v4 = vpop.f32.mrf.mxu1  ;;  %v921_v18 = vadd.f32 %v914_v2, %v800_v17  ;;  %v1649_v2 = vcombine.high %v4062_v53, %v4062_v53 }
 0x130   : > { %v796_v5 = vpop.f32.mrf.mxu0 }
 0x131   : > { %v917_v6 = vpop.f32.mrf.mxu1  ;;  %v801_v19 = vadd.f32 %v796_v5, %v679_v62  ;;  %v1428_v62 = vrot.slane %v1426_v39, 7  ;;  %v1683_v17 = vrot.slane %v1649_v2, 7 }
 0x132   : > { %v3336_v7 = vpop.f32.mrf.mxu0 }
 0x133   : > { %v3356_v8 = vpop.f32.mrf.mxu1  ;;  %v922_v21 = vadd.f32 %v917_v6, %v801_v19  ;;  %v1361_v6 = vld [vmem:[#allocation2 + $0xc] sm:$0x7] }
 0x134   : > { %v1364_v8 = vld [vmem:[#allocation2 + $0x10] sm:$0x7] }
 0x14c   : > { %v1036_v9 = vpop.f32.mrf.mxu0 }
 0x14d   : > { %v1158_v10 = vpop.f32.mrf.mxu1  ;;  %v1043_v20 = vadd.f32 %v1036_v9, %v921_v18 }
 0x14e   : > { %v3375_v11 = vpop.f32.mrf.mxu0 }
 0x14f   : > { %v3395_v12 = vpop.f32.mrf.mxu1  ;;  %v1165_v22 = vadd.f32 %v1158_v10, %v1043_v20  ;;  %v1487_v10 = vunpack.c.0.s8 %v1486_v48  ;;  %v1429_v11 = vor.u32 %v1428_v62, %v1425_v58 }
 0x150   : > { %v1039_v13 = vpop.f32.mrf.mxu0  ;;  %v4070_v12 = vshll.u32 %v1390_v57, 16 }
 0x151   : > { %v1161_v14 = vpop.f32.mrf.mxu1  ;;  %v1044_v23 = vadd.f32 %v1039_v13, %v922_v21  ;;  %v1430_v18 = vrot.slane %v1429_v11, 2 }
 0x152   : > { %v3376_v15 = vpop.f32.mrf.mxu0  ;;  %v1434_v19 = vrot.slane %v4070_v12, 7 }
 0x153   : > { %v3396_v16 = vpop.f32.mrf.mxu1  ;;  %v1166_v27 = vadd.f32 %v1161_v14, %v1044_v23  ;;  %v1489_v14 = vshrl.u32 %v1488_v56, 7 }
 0x154   : > { %v3024_v16 = vrot.slane %v4062_v53, 9 }
 0x156   : > { %v1684_v38 = vsel %vm4082_vm15, %v3024_v16, %v1683_v17 }
 0x16c   : > { %v1279_v24 = vpop.f32.mrf.mxu0 }
 0x16d   : > { %v1286_v25 = vadd.f32 %v1279_v24, %v1165_v22  ;;  %v4079_v22 = vsub.s32 %v1487_v10, %v1489_v14 }
 0x16e   : > { %v3415_v26 = vpop.f32.mrf.mxu0 }
 0x16f   : > { %v1288_v28 = vmax.f32 %v1286_v25, 0.0  ;;  %v3636_v26 = vld [vmem:[%s4285_s3 + $0x38] sm:$0xff]  }
 0x170   : > { %v1282_v29 = vpop.f32.mrf.mxu0 }
 0x171   : > { %v1299_v30 = vcombine.high %v1288_v28, %v1288_v28  ;;  %v3116_v31 = vpack.c.bf16 %v1288_v28, %v1288_v28  ;;  %v1287_v32 = vadd.f32 %v1282_v29, %v1166_v27 }
 0x172   : > { %v3416_v34 = vpop.f32.mrf.mxu0 }
 0x173   : > { %v3117_v35 = vpack.c.bf16 %v1299_v30, %v1299_v30  ;;  %v1320_v36 = vshrl.u32 %v3116_v31, 16  ;;  %v1289_v37 = vmax.f32 %v1287_v32, 0.0  ;;  %v1323_v41 = vshll.u32 %v3116_v31, 16 }
 0x175   : > { %v1322_v40 = vrot.slane %v1320_v36, 7  ;;  %v1327_v42 = vshrl.u32 %v3117_v35, 16  ;;  %v1300_v43 = vcombine.high %v1289_v37, %v1289_v37  ;;  %v3118_v46 = vpack.c.bf16 %v1289_v37, %v1289_v37 }
 0x176   : > { %v1330_v51 = vshll.u32 %v3117_v35, 16 }
 0x177   : > { %v1325_v49 = vor.u32 %v1323_v41, %v1322_v40  ;;  %v1329_v50 = vrot.slane %v1327_v42, 7  ;;  %v3119_v52 = vpack.c.bf16 %v1300_v43, %v1300_v43  ;;  %v1334_v55 = vshrl.u32 %v3118_v46, 16  ;;  %v3616_v41 = vld [vmem:[%s4284_s2 + $0x28] sm:$0xff]  }
 0x178   : > { %v1337_v0 = vshll.u32 %v3118_v46, 16 }
 0x179   : > { %v1332_v59 = vor.u32 %v1330_v51, %v1329_v50  ;;  %v1356_v60 = vsel %vm4058_vm3, %v1325_v49, %v1355_v45  ;;  %v1341_v61 = vshrl.u32 %v3119_v52, 16  ;;  %v1336_v63 = vrot.slane %v1334_v55, 7 }
 0x17a   : > { %1357 = vst [vmem:[#allocation2 + $0x4] sm:$0x7] %v1356_v60  ;;  %v1344_v5 = vshll.u32 %v3119_v52, 16 }
 0x17b   : > { %v1359_v3 = vsel %vm4058_vm3, %v1332_v59, %v1358_v54  ;;  %v1343_v4 = vrot.slane %v1341_v61, 7  ;;  %v1339_v7 = vor.u32 %v1337_v0, %v1336_v63  ;;  %v4108_v59 = vld.sshfl [vmem:[#allocation2 + $0x14] sm:$0x13 pattern:$0x76325410]  ;;  %v3618_v0 = vld [vmem:[%s4284_s2 + $0x20] sm:$0xff]  }
 0x17c   : > { %1360 = vst [vmem:[#allocation2 + $0x8] sm:$0x7] %v1359_v3  ;;  %v2349_v14 = vshrl.u32 %v4108_v59, 16 }
 0x17d   : > { %v1346_v9 = vor.u32 %v1344_v5, %v1343_v4  ;;  %v1362_v13 = vsel %vm4058_vm3, %v1339_v7, %v1361_v6 }
 0x17e   : > { %1363 = vst [vmem:[#allocation2 + $0xc] sm:$0x7] %v1362_v13 }
 0x17f   : > { %v1365_v15 = vsel %vm4058_vm3, %v1346_v9, %v1364_v8  ;;  %vm4104_vm3 = vmor %vm1419_vm2, %vm1420_vm12 }
 0x180   : > { %1366 = vst [vmem:[#allocation2 + $0x10] sm:$0x7] %v1365_v15  ;;  %v1435_v6 = vsel %vm4104_vm3, %v1430_v18, %v1434_v19  ;;  %v2352_v18 = vshll.u32 %v4108_v59, 16  ;;  %v3620_v19 = vld [vmem:[%s4284_s2 + $0x38] sm:$0xff]  }
 0x181   : > { %v3646_v20 = vld.sshfl [vmem:[#allocation2] sm:$0xf pattern:$0x76325410] }
 0x182   : > { %v3021_v21 = vld.sshfl [vmem:[#allocation2 + $0x4] sm:$0x12 pattern:$0x76325410] }
 0x183   : > { %v3022_v23 = vld.sshfl [vmem:[#allocation2 + $0x8] sm:$0x12 pattern:$0x76325410]  ;;  %v1657_v24 = vcombine.high %v3021_v21, %v3021_v21  ;;  %v3025_v27 = vrot.slane %v3021_v21, 9 }
 0x184   : > { %v1665_v25 = vcombine.high %v3022_v23, %v3022_v23  ;;  %v3026_v28 = vrot.slane %v3022_v23, 9  ;;  %v3007_v29 = vld.sshfl [vmem:[#allocation2 + $0x4] sm:$0x13 pattern:$0x76325410] }
 0x185   : > { %v1687_v30 = vrot.slane %v1657_v24, 7  ;;  %v3008_v31 = vld.sshfl [vmem:[#allocation2 + $0x8] sm:$0x13 pattern:$0x76325410]  ;;  %v1398_v32 = vcombine.high %v3007_v29, %v3007_v29  ;;  %v1437_v33 = vshrl.u32 %v3007_v29, 16 }
 0x186   : > { %v3647_v34 = vld.sshfl [vmem:[#allocation2 + $0x8] sm:$0xf pattern:$0x76325410]  ;;  %v1691_v35 = vrot.slane %v1665_v25, 7  ;;  %v1440_v36 = vshll.u32 %v3007_v29, 16  ;;  %v1406_v45 = vcombine.high %v3008_v31, %v3008_v31  ;;  %v2305_v25 = vcombine.high %v4108_v59, %v4108_v59 }
 0x187   : > { %v3023_v37 = vld.sshfl [vmem:[#allocation2 + $0xc] sm:$0x12 pattern:$0x76325410]  ;;  %v1439_v39 = vrot.slane %v1437_v33, 6  ;;  %v1446_v40 = vshll.u32 %v1398_v32, 16  ;;  %v4095_v43 = vsel %vm4082_vm15, %v3025_v27, %v1687_v30  ;;  %v1577_v50 = vcombine.low %v3646_v20, %v3647_v34 }
 0x188   : > { %v1673_v42 = vcombine.high %v3023_v37, %v3023_v37  ;;  %v3009_v44 = vld.sshfl [vmem:[#allocation2 + $0xc] sm:$0x13 pattern:$0x76325410]  ;;  %v4100_v46 = vsel %vm4082_vm15, %v3026_v28, %v1691_v35  ;;  %v3027_v47 = vrot.slane %v3023_v37, 9  ;;  %v1442_v49 = vrot.slane %v1440_v36, 7 }
 0x189   : > { %v1414_v48 = vcombine.high %v3009_v44, %v3009_v44  ;;  %v1451_v52 = vshrl.u32 %v3008_v31, 16  ;;  %v1454_v53 = vshll.u32 %v3008_v31, 16  ;;  %v1702_v54 = vcombine.low %v1684_v38, %v4095_v43  ;;  %3430 = vmatmul.mubr.msk.bf16.vlgmr.msra.gmra.mxu1 %vm1512_vm13, %v1577_v50  ;;  %v3045_v10 = vld.sshfl [vmem:[#allocation2 + $0x10] sm:$0x13 pattern:$0x76325410] }
 0x18a   : > { %v1695_v51 = vrot.slane %v1673_v42, 7  ;;  %v1443_v56 = vor.u32 %v1442_v49, %v1439_v39  ;;  %v1448_v57 = vrot.slane %v1446_v40, 7  ;;  %v1465_v58 = vshrl.u32 %v3009_v44, 16  ;;  %3434 = vmatpush3.bf16.msra.mxu1 %v3616_v41  ;;  %3437 = vmatprep.mubr.msk.bf16.mxu1 %vm3661_vm0, %v3660_v1  ;;  %v3622_v42 = vld [vmem:[%s4284_s2 + $0x30] sm:$0xff]  }
 0x18b   : > { %v1453_v61 = vrot.slane %v1451_v52, 6  ;;  %v1456_v62 = vrot.slane %v1454_v53, 7  ;;  %v1468_v63 = vshll.u32 %v3009_v44, 16  ;;  %v1460_v4 = vshll.u32 %v1406_v45, 16  ;;  %3435 = vmatprep.subr.bf16.mxu1 %v3660_v1  ;;  %v3621_v52 = vld [vmem:[%s4284_s2 + $0x48] sm:$0xff]  }
 0x18c   : > { %v4113_v60 = vsel %vm4082_vm15, %v3027_v47, %v1695_v51  ;;  %v1444_v3 = vrot.slane %v1443_v56, 2  ;;  %v1467_v5 = vrot.slane %v1465_v58, 6  ;;  %v1474_v9 = vshll.u32 %v1414_v48, 16 }
 0x18d   : > { %v1703_v2 = vcombine.low %v4100_v46, %v4113_v60  ;;  %v1457_v7 = vor.u32 %v1456_v62, %v1453_v61  ;;  %v1470_v8 = vrot.slane %v1468_v63, 7  ;;  %v1904_v13 = vcombine.high %v3045_v10, %v3045_v10  ;;  %v3056_v20 = vld.sshfl [vmem:[#allocation2 + $0x10] sm:$0x12 pattern:$0x76325410]  ;;  %v3626_v61 = vld [vmem:[%s4284_s2 + $0x58] sm:$0xff]  }
 0x18e   : > { %v4130_v12 = vsel %vm4104_vm3, %v1444_v3, %v1448_v57  ;;  %v1710_v15 = vrot.slane %v1702_v54, %v4079_v22  ;;  %3436 = vmatpush3.bf16.msra.mxu1 %v3618_v0  ;;  %v1462_v21 = vrot.slane %v1460_v4, 7  ;;  %v1948_v23 = vshrl.u32 %v3045_v10, 16  ;;  %v3648_v31 = vld.sshfl [vmem:[#allocation2 + $0xc] sm:$0xf pattern:$0x76325410] }
 0x18f   : > { %v4126_v11 = vrot.slane %v1703_v2, %v4079_v22  ;;  %v1458_v16 = vrot.slane %v1457_v7, 2  ;;  %v1471_v17 = vor.u32 %v1470_v8, %v1467_v5  ;;  %v1951_v24 = vshll.u32 %v3045_v10, 16  ;;  %3441 = vmatprep.subr.bf16.mxu1 %v3660_v1  ;;  %v3649_v38 = vld.sshfl [vmem:[#allocation2 + $0x4] sm:$0xf pattern:$0x76325410] }
 0x190   : > { %v1476_v29 = vrot.slane %v1474_v9, 7  ;;  %v1483_v30 = vcombine.low %v1435_v6, %v4130_v12  ;;  %v1950_v32 = vrot.slane %v1948_v23, 6  ;;  %v1957_v34 = vshll.u32 %v1904_v13, 16  ;;  %v3623_v3 = vld [vmem:[%s4284_s2 + $0x40] sm:$0xff]   ;;  %v3628_v7 = vld [vmem:[%s4284_s2 + $0x50] sm:$0xff]  }
 0x191   : > { %v1718_v27 = vcombine.low %v1710_v15, %v4126_v11  ;;  %v1472_v28 = vrot.slane %v1471_v17, 2  ;;  %v1953_v33 = vrot.slane %v1951_v24, 7  ;;  %v2080_v35 = vcombine.high %v3056_v20, %v3056_v20  ;;  %v3089_v2 = vld.sshfl [vmem:[#allocation2 + $0x14] sm:$0x12 pattern:$0x76325410] }
 0x192   : > { %v1463_v36 = vsel %vm4104_vm3, %v1458_v16, %v1462_v21  ;;  %v2351_v39 = vrot.slane %v2349_v14, 6  ;;  %v2354_v40 = vrot.slane %v2352_v18, 7  ;;  %v3060_v47 = vrot.slane %v3056_v20, 9  ;;  %v3630_v15 = vld [vmem:[%s4284_s2 + $0x78] sm:$0xff]   ;;  %v3634_v21 = vld [vmem:[%s4284_s2 + $0x70] sm:$0xff]  }
 0x193   : > { %3438 = vmatmul.mubr.msk.bf16.vlgmr.msra.gmra.mxu1 %vm1512_vm13, %v1718_v27  ;;  %v1477_v37 = vsel %vm4104_vm3, %v1472_v28, %v1476_v29  ;;  %v1954_v44 = vor.u32 %v1953_v33, %v1950_v32  ;;  %v2095_v45 = vrot.slane %v2080_v35, 7  ;;  %v1491_v48 = vrot.slane %v1483_v30, %v4079_v22  ;;  %v3650_v14 = vld.sshfl [vmem:[#allocation2 + $0x10] sm:$0xf pattern:$0x76325410]  ;;  %v3635_v30 = vld [vmem:[%s4284_s2 + $0x80] sm:$0xff]  }
 0x194   : > { %3442 = vmatpush3.bf16.msra.mxu1 %v3620_v19  ;;  %v1484_v41 = vcombine.low %v1463_v36, %v1477_v37  ;;  %3445 = vmatprep.mubr.msk.bf16.mxu1 %vm3661_vm0, %v3660_v1  ;;  %v1959_v51 = vrot.slane %v1957_v34, 7  ;;  %v2355_v54 = vor.u32 %v2354_v40, %v2351_v39  ;;  %v2358_v56 = vshll.u32 %v2305_v25, 16  ;;  %v3651_v55 = vld.sshfl [vmem:[#allocation2 + $0x8] sm:$0xf pattern:$0x76325410] }
 0x195   : > { %3443 = vmatprep.subr.bf16.mxu1 %v3660_v1  ;;  %v1955_v50 = vrot.slane %v1954_v44, 2  ;;  %v4163_v53 = vsel %vm4082_vm15, %v3060_v47, %v2095_v45  ;;  %v1806_v59 = vcombine.low %v3649_v38, %v3648_v31  ;;  %v1966_v63 = vcombine.low %v4130_v12, %v1463_v36  ;;  %v3629_v19 = vld [vmem:[%s4284_s2 + $0x60] sm:$0xff]   ;;  %v3633_v25 = vld [vmem:[%s4284_s2 + $0x88] sm:$0xff]   ;;  %v3637_v32 = vld [vmem:[%s4285_s3 + $0x30] sm:$0xff]  }
 0x196   : > { %v4156_v49 = vrot.slane %v1484_v41, %v4079_v22  ;;  %v2103_v0 = vcombine.low %v4113_v60, %v4163_v53  ;;  %v2356_v4 = vrot.slane %v2355_v54, 2  ;;  %v2360_v5 = vrot.slane %v2358_v56, 7  ;;  %v3638_v34 = vld [vmem:[%s4285_s3 + $0x28] sm:$0xff]   ;;  %v3641_v35 = vld [vmem:[%s4285_s3 + $0x10] sm:$0xff]   ;;  %v3643_v39 = vld [vmem:[%s4285_s3] sm:$0xff]  }
 0x197   : > { %v1960_v58 = vsel %vm4104_vm3, %v1955_v50, %v1959_v51  ;;  %v2102_v60 = vcombine.low %v4095_v43, %v4100_v46  ;;  %v2481_v8 = vcombine.high %v3089_v2, %v3089_v2  ;;  %v1974_v9 = vrot.slane %v1966_v63, %v4079_v22  ;;  %v3627_v43 = vld [vmem:[%s4284_s2 + $0x68] sm:$0xff]  }
 0x198   : > { %v1499_v57 = vcombine.low %v1491_v48, %v4156_v49  ;;  %3444 = vmatpush3.bf16.msra.mxu1 %v3622_v42  ;;  %v1967_v62 = vcombine.low %v1477_v37, %v1960_v58  ;;  %v2117_v10 = vrot.slane %v2103_v0, %v4079_v22  ;;  %v2361_v46 = vsel %vm4104_vm3, %v2356_v4, %v2360_v5  ;;  %v3642_v36 = vld [vmem:[%s4285_s3 + $0x8] sm:$0xff]   ;;  %v3644_v37 = vld [vmem:[%s3746_s14 + $0x78] ss:$8 sps:$4 sm:$0xff]  }
 0x199   : > { %3457 = vmatprep.subr.bf16.mxu1 %v3660_v1  ;;  %v2110_v13 = vrot.slane %v2102_v60, %v4079_v22  ;;  %v3093_v16 = vrot.slane %v3089_v2, 9  ;;  %v2496_v17 = vrot.slane %v2481_v8, 7  ;;  %v2368_v18 = vcombine.low %v1960_v58, %v2361_v46  ;;  %v3645_v38 = vld [vmem:[%s3746_s14 + $0x88] ss:$8 sps:$4 sm:$0xff]   ;;  %s3115_s14 = sshll.u32 %s4294_s16, 4 }
 0x19a   : > { %3422 = vmatmul.mubr.msk.bf16.vlgmr.msra.gmra.mxu0 %vm1512_vm13, %v1499_v57  ;;  %v1981_v6 = vrot.slane %v1967_v62, %v4079_v22  ;;  %v2207_v27 = vcombine.low %v3651_v55, %v3650_v14  ;;  %v2590_v40 = vpack.c.bf16 %v3645_v38, %v3644_v37  ;;  %s197_s8 = scalar_lea.vmem %s4286_s4, %s3115_s14 }
 0x19b   : > { %3450 = vmatpush3.bf16.msra.mxu0 %v3621_v52  ;;  %3446 = vmatmul.mubr.msk.bf16.vlgmr.msra.gmra.mxu1 %vm1512_vm13, %v1806_v59  ;;  %v2118_v20 = vcombine.low %v2110_v13, %v2117_v10  ;;  %v2497_v23 = vsel %vm4082_vm15, %v3093_v16, %v2496_v17  ;;  %v2382_v24 = vrot.slane %v2368_v18, %v4079_v22 }
 0x19c   : > { %3451 = vmatprep.subr.bf16.mxu0 %v3660_v1  ;;  %3453 = vmatprep.mubr.msk.bf16.mxu0 %vm3661_vm0, %v3660_v1  ;;  %v1982_v12 = vcombine.low %v1974_v9, %v1981_v6  ;;  %v2504_v28 = vcombine.low %v4163_v53, %v2497_v23 }
 0x19d   : > { %3458 = vmatpush3.bf16.msra.mxu1 %v3626_v61  ;;  %3461 = vmatprep.mubr.msk.bf16.mxu1 %vm3661_vm0, %v3660_v1  ;;  %v2383_v29 = vcombine.low %v4156_v49, %v2382_v24 }
 0x19e   : > { %3459 = vmatprep.subr.bf16.mxu1 %v3660_v1  ;;  %v2518_v31 = vrot.slane %v2504_v28, %v4079_v22  ;;  %v3639_v22 = vld [vmem:[%s4285_s3 + $0x20] sm:$0xff]  }
 0x19f   : > { %3452 = vmatpush3.bf16.msra.mxu0 %v3623_v3 }
 0x1a0   : > { %3465 = vmatprep.subr.bf16.mxu0 %v3660_v1  ;;  %v2519_v33 = vcombine.low %v4126_v11, %v2518_v31  ;;  %v3640_v11 = vld [vmem:[%s4285_s3 + $0x18] sm:$0xff]  }
 0x1a1   : > { %3460 = vmatpush3.bf16.msra.mxu1 %v3628_v7 }
 0x1a2   : > { %3454 = vmatmul.mubr.msk.bf16.vlgmr.msra.gmra.mxu0 %vm1512_vm13, %v1982_v12  ;;  %3473 = vmatprep.subr.bf16.mxu1 %v3660_v1 }
 0x1a3   : > { %3466 = vmatpush3.bf16.msra.mxu0 %v3627_v43  ;;  %3469 = vmatprep.mubr.msk.bf16.mxu0 %vm3661_vm0, %v3660_v1 }
 0x1a4   : > { %3467 = vmatprep.subr.bf16.mxu0 %v3660_v1  ;;  %3462 = vmatmul.mubr.msk.bf16.vlgmr.msra.gmra.mxu1 %vm1512_vm13, %v2118_v20 }
 0x1a5   : > { %3474 = vmatpush3.bf16.msra.mxu1 %v3630_v15  ;;  %3477 = vmatprep.mubr.msk.bf16.mxu1 %vm3661_vm0, %v3660_v1 }
 0x1a6   : > { %3475 = vmatprep.subr.bf16.mxu1 %v3660_v1 }
 0x1a7   : > { %3468 = vmatpush3.bf16.msra.mxu0 %v3629_v19 }
 0x1a8   : > { %3481 = vmatprep.subr.bf16.mxu0 %v3660_v1 }
 0x1a9   : > { %3476 = vmatpush3.bf16.msra.mxu1 %v3634_v21 }
 0x1aa   : > { %3470 = vmatmul.mubr.msk.bf16.vlgmr.msra.gmra.mxu0 %vm1512_vm13, %v2207_v27  ;;  %3489 = vmatprep.subr.bf16.mxu1 %v3660_v1 }
 0x1ab   : > { %3482 = vmatpush3.bf16.msra.mxu0 %v3633_v25  ;;  %3485 = vmatprep.mubr.msk.bf16.mxu0 %vm3661_vm0, %v3660_v1 }
 0x1ac   : > { %3483 = vmatprep.subr.bf16.mxu0 %v3660_v1  ;;  %3478 = vmatmul.mubr.msk.bf16.vlgmr.msra.gmra.mxu1 %vm1512_vm13, %v2383_v29 }
 0x1ad   : > { %3490 = vmatpush3.bf16.msra.mxu1 %v3636_v26  ;;  %3505 = vmatprep.mubr.msk.bf16.mxu1 %vm3661_vm0, %v3660_v1  ;;  %vm2706_vm0 = vcmask 257024  }
 0x1ae   : > { %3491 = vmatprep.subr.bf16.mxu1 %v3660_v1 }
 0x1af   : > { %3484 = vmatpush3.bf16.msra.mxu0 %v3635_v30 }
 0x1b1   : > { %3492 = vmatpush3.bf16.msra.mxu1 %v3637_v32 }
 0x1b2   : > { %3486 = vmatmul.mubr.msk.bf16.vlgmr.msra.gmra.mxu0 %vm1512_vm13, %v2519_v33  ;;  %3493 = vmatprep.subr.bf16.mxu1 %v3660_v1 }
 0x1b5   : > { %3494 = vmatpush3.bf16.msra.mxu1 %v3638_v34 }
 0x1b6   : > { %3495 = vmatprep.subr.bf16.mxu1 %v3660_v1 }
 0x1b9   : > { %3496 = vmatpush3.bf16.msra.mxu1 %v3639_v22 }
 0x1ba   : > { %3497 = vmatprep.subr.bf16.mxu1 %v3660_v1 }
 0x1bd   : > { %3498 = vmatpush3.bf16.msra.mxu1 %v3640_v11 }
 0x1be   : > { %3499 = vmatprep.subr.bf16.mxu1 %v3660_v1 }
 0x1c1   : > { %3500 = vmatpush3.bf16.msra.mxu1 %v3641_v35 }
 0x1c2   : > { %3501 = vmatprep.subr.bf16.mxu1 %v3660_v1 }
 0x1c5   : > { %3502 = vmatpush3.bf16.msra.mxu1 %v3642_v36 }
 0x1c6   : > { %3503 = vmatprep.subr.bf16.mxu1 %v3660_v1 }
 0x1c9   : > { %3504 = vmatpush3.bf16.msra.mxu1 %v3643_v39 }
 0x1cc   : > { %3506 = vmatmul.mubr.bf16.vlgmr.msra.gmra.mxu1 %v2590_v40 }
 0x249   : > { %v1627_v41 = vpop.f32.mrf.mxu1 }
 0x24b   : > { %v3431_v42 = vpop.f32.mrf.mxu1 }
 0x24d   : > { %v1630_v44 = vpop.f32.mrf.mxu1 }
 0x24f   : > { %v3432_v45 = vpop.f32.mrf.mxu1 }
 0x253   : > { %v1768_v47 = vpop.f32.mrf.mxu1 }
 0x255   : > { %v3439_v48 = vpop.f32.mrf.mxu1 }
 0x257   : > { %v1771_v49 = vpop.f32.mrf.mxu1 }
 0x259   : > { %v3440_v50 = vpop.f32.mrf.mxu1 }
 0x25a   : > { %v1550_v51 = vpop.f32.mrf.mxu0 }
 0x25b   : > { %v1856_v52 = vpop.f32.mrf.mxu1  ;;  %v1628_v13 = vadd.f32 %v1627_v41, %v1550_v51 }
 0x25c   : > { %v3423_v53 = vpop.f32.mrf.mxu0 }
 0x25d   : > { %v3447_v54 = vpop.f32.mrf.mxu1  ;;  %v1775_v17 = vadd.f32 %v1768_v47, %v1628_v13 }
 0x25e   : > { %v1553_v56 = vpop.f32.mrf.mxu0 }
 0x25f   : > { %v1859_v57 = vpop.f32.mrf.mxu1  ;;  %v1631_v16 = vadd.f32 %v1630_v44, %v1553_v56  ;;  %v1863_v20 = vadd.f32 %v1856_v52, %v1775_v17 }
 0x260   : > { %v3424_v58 = vpop.f32.mrf.mxu0 }
 0x261   : > { %v3448_v59 = vpop.f32.mrf.mxu1  ;;  %v1776_v55 = vadd.f32 %v1771_v49, %v1631_v16 }
 0x262   : > { %v2032_v1 = vpop.f32.mrf.mxu0 }
 0x263   : > { %v2039_v18 = vadd.f32 %v2032_v1, %v1863_v20  ;;  %v1864_v19 = vadd.f32 %v1859_v57, %v1776_v55 }
 0x264   : > { %v3455_v61 = vpop.f32.mrf.mxu0  ;;  %v2168_v62 = vpop.f32.mrf.mxu1 }
 0x265   : > { %v2175_v21 = vadd.f32 %v2168_v62, %v2039_v18 }
 0x266   : > { %v2035_v63 = vpop.f32.mrf.mxu0  ;;  %v3463_v0 = vpop.f32.mrf.mxu1 }
 0x267   : > { %v2040_v23 = vadd.f32 %v2035_v63, %v1864_v19 }
 0x268   : > { %v3456_v2 = vpop.f32.mrf.mxu0  ;;  %v2171_v3 = vpop.f32.mrf.mxu1 }
 0x269   : > { %v2176_v25 = vadd.f32 %v2171_v3, %v2040_v23 }
 0x26a   : > { %v2257_v4 = vpop.f32.mrf.mxu0  ;;  %v3464_v5 = vpop.f32.mrf.mxu1 }
 0x26b   : > { %v2264_v24 = vadd.f32 %v2257_v4, %v2175_v21 }
 0x26c   : > { %v3471_v6 = vpop.f32.mrf.mxu0  ;;  %v2433_v60 = vpop.f32.mrf.mxu1 }
 0x26d   : > { %v2440_v27 = vadd.f32 %v2433_v60, %v2264_v24 }
 0x26e   : > { %v2260_v7 = vpop.f32.mrf.mxu0  ;;  %v3479_v8 = vpop.f32.mrf.mxu1 }
 0x26f   : > { %v2265_v28 = vadd.f32 %v2260_v7, %v2176_v25 }
 0x270   : > { %v3472_v9 = vpop.f32.mrf.mxu0  ;;  %v2436_v10 = vpop.f32.mrf.mxu1 }
 0x271   : > { %v2441_v29 = vadd.f32 %v2436_v10, %v2265_v28 }
 0x272   : > { %v2569_v43 = vpop.f32.mrf.mxu0  ;;  %v3480_v46 = vpop.f32.mrf.mxu1 }
 0x273   : > { %v2576_v26 = vadd.f32 %v2569_v43, %v2440_v27 }
 0x274   : > { %v3487_v12 = vpop.f32.mrf.mxu0 }
 0x276   : > { %v2572_v14 = vpop.f32.mrf.mxu0 }
 0x277   : > { %v2577_v33 = vadd.f32 %v2572_v14, %v2441_v29 }
 0x278   : > { %v3488_v15 = vpop.f32.mrf.mxu0 }
 0x28c   : > { %v2689_v30 = vpop.f32.mrf.mxu1 }
 0x28d   : > { %v2696_v31 = vadd.f32 %v2689_v30, %v2576_v26 }
 0x28e   : > { %v3507_v32 = vpop.f32.mrf.mxu1 }
 0x28f   : > { %v2698_v34 = vmax.f32 %v2696_v31, 0.0 }
 0x290   : > { %v2692_v22 = vpop.f32.mrf.mxu1 }
 0x291   : > { %v2702_v11 = vcombine.high %v2698_v34, %v2698_v34  ;;  %2707 = vst.msk [vmem:[%s197_s8] sm:$0xf] %vm2706_vm0, %v2698_v34  ;;  %v2697_v35 = vadd.f32 %v2692_v22, %v2577_v33 }
 0x292   : > { %v3508_v36 = vpop.f32.mrf.mxu1 }
 0x293   : > { %2708 = vst.msk [vmem:[%s197_s8 + $0x4] sm:$0xf] %vm2706_vm0, %v2702_v11  ;;  %v2699_v37 = vmax.f32 %v2697_v35, 0.0 }
 0x295   : > { %v2703_v38 = vcombine.high %v2699_v37, %v2699_v37  ;;  %2709 = vst.msk [vmem:[%s197_s8 + $0x8] sm:$0xf] %vm2706_vm0, %v2699_v37 }
 0x297   : > { %2710 = vst.msk [vmem:[%s197_s8 + $0xc] sm:$0xf] %vm2706_vm0, %v2703_v38 }
 0x298 PF: > { %s14_s15 = sadd.s32 1, %s3658_s15  }
 0x299   : > { %p11_p4 = scmp.ge.s32.totalorder %s14_s15, 6  }
 0x29b   :  { %13 = sbr.rel (!%p11_p4) target bundleno = 1 (0x1), region = 89 }

</bundles_post_ra>
